<compile_context>
chip_gen: v6e
topology: v6e:2x2x1
jax: 0.10.0
libtpu: 0.0.40
codegen_flags: <defaults>
</compile_context>

<pallas_src>
import jax
import jax.numpy as jnp
from jax.experimental import pallas as pl
from jax.experimental.pallas import tpu as pltpu

LANE = 128


def _round_up(x, m):
    return ((x + m - 1) // m) * m


def _basic_block_kernel(x_ref, w1_ref, w2_ref, s1_ref, b1_ref, s2_ref, b2_ref,
                        out_ref, xpad_s, hpad_s):
    # x_ref   : (1, H, W, Cp)   bf16  one batch image, channel-padded to Cp
    # w*_ref  : (9*Cp, Cp)      bf16  conv weights, tap-major K layout
    # s*,b*   : (1, Cp)         f32   folded BN scale / bias
    # out_ref : (1, H, W, Cp)   bf16
    # xpad_s / hpad_s : (H+2, Wp2, Cp) f32 VMEM scratch (1-pixel zero halo,
    #                   row width padded up to a sublane multiple)
    _, H, W, Cp = x_ref.shape
    HW = H * W
    Hp2, Wp2, _ = xpad_s.shape

    def zero_border(ref):
        # Only the halo strips are zeroed; the interior is fully overwritten
        # every step.  Done unconditionally so it stays correct when the batch
        # axis is sharded across TensorCores.
        ref[0:1, :, :] = jnp.zeros((1, Wp2, Cp), ref.dtype)
        ref[Hp2 - 1:Hp2, :, :] = jnp.zeros((1, Wp2, Cp), ref.dtype)
        ref[:, 0:1, :] = jnp.zeros((Hp2, 1, Cp), ref.dtype)
        ref[:, W + 1:Wp2, :] = jnp.zeros((Hp2, Wp2 - (W + 1), Cp), ref.dtype)

    zero_border(xpad_s)
    zero_border(hpad_s)

    # Load the bf16 image once, keep an f32 copy for the residual add.
    x_f32 = x_ref[0].astype(jnp.float32)               # (H, W, Cp)
    xpad_s[1:H + 1, 1:W + 1, :] = x_f32

    def conv3x3(pad_ref, w_ref):
        # 9 accumulating K=Cp matmuls; never materialize a (HW, 9*Cp) patch.
        acc = None
        k = 0
        for kh in range(3):
            for kw in range(3):
                tap = pad_ref[kh:kh + H, kw:kw + W, :]            # (H, W, Cp) f32
                tap = tap.reshape(HW, Cp).astype(jnp.bfloat16)     # free reshape (W % 8 == 0)
                part = jnp.dot(tap, w_ref[k * Cp:(k + 1) * Cp, :],
                               preferred_element_type=jnp.float32)
                acc = part if acc is None else acc + part
                k += 1
        return acc                                                 # (HW, Cp) f32

    # conv1 -> bn1 -> relu
    h1 = jnp.maximum(conv3x3(xpad_s, w1_ref) * s1_ref[...] + b1_ref[...], 0.0)
    hpad_s[1:H + 1, 1:W + 1, :] = h1.reshape(H, W, Cp)

    # conv2 -> bn2 -> + identity -> relu
    h2 = conv3x3(hpad_s, w2_ref) * s2_ref[...] + b2_ref[...]
    out = jnp.maximum(h2 + x_f32.reshape(HW, Cp), 0.0)
    out_ref[...] = out.reshape(1, H, W, Cp).astype(out_ref.dtype)


def _vmem_limit_bytes(H, W, Wp2, Cp):
    f32, bf16 = 4, 2
    scratch = 2 * (H + 2) * Wp2 * Cp * f32               # two halo scratches
    io = (2 + 2) * H * W * Cp * bf16                      # in + out, double-buffered
    consts = 2 * (2 * 9 * Cp * Cp * bf16 + 4 * Cp * f32)  # weights + BN vecs (2 bufs)
    need = scratch + io + consts
    try:
        cap = int(pltpu.get_tpu_info().vmem_capacity_bytes)
    except Exception:
        cap = 64 * 1024 * 1024                             # conservative (v7x) fallback
    return int(min(max(2 * need, 32 * 1024 * 1024), int(0.75 * cap)))


def prepare_basic_block_params(params, eps=1e-5):
    """Fold BN into per-channel scale/bias, pad channels to Cp, bf16 weights."""
    w1, w2, g1, be1, m1, v1, g2, be2, m2, v2 = params
    Cout, Cin = w1.shape[0], w1.shape[1]
    assert Cout == Cin and w2.shape[0] == Cout and w2.shape[1] == Cout, \
        "stride=1 / no-downsample BasicBlock"
    C = Cout
    Cp = _round_up(C, LANE)

    def prep_w(w):
        # torch (Cout, Cin, 3, 3) -> (3, 3, Cin, Cout) -> zero-pad -> (9*Cp, Cp)
        wt = jnp.transpose(w, (2, 3, 1, 0)).astype(jnp.float32)
        wt = jnp.pad(wt, ((0, 0), (0, 0),
                          (0, Cp - w.shape[1]), (0, Cp - w.shape[0])))
        return wt.reshape(9 * Cp, Cp).astype(jnp.bfloat16)

    def fold_bn(g, b, m, v):
        s = g / jnp.sqrt(v + eps)
        bias = b - m * s
        s = jnp.pad(s, (0, Cp - C)).reshape(1, Cp).astype(jnp.float32)
        bias = jnp.pad(bias, (0, Cp - C)).reshape(1, Cp).astype(jnp.float32)
        return s, bias

    s1, b1 = fold_bn(g1, be1, m1, v1)
    s2, b2 = fold_bn(g2, be2, m2, v2)
    return (prep_w(w1), prep_w(w2), s1, b1, s2, b2), Cp


def basic_block_nhwc(x_nhwc_p, prepped):
    """Fused BasicBlock on channel-padded NHWC bf16 activations.

    x_nhwc_p : (N, H, W, Cp) bf16, Cp a multiple of 128, padded channels zero.
    Returns  : (N, H, W, Cp) bf16.
    Use this entry point between blocks of a ResNet stack (no layout churn).
    """
    w1_t, w2_t, s1, b1, s2, b2 = prepped
    N, H, W, Cp = x_nhwc_p.shape
    assert Cp % LANE == 0
    assert W % 8 == 0, "W should be a sublane multiple for free (H,W)->(H*W) reshapes"
    Wp2 = _round_up(W + 2, 8)

    img_spec = pl.BlockSpec((1, H, W, Cp), lambda n: (n, 0, 0, 0))
    w_spec = pl.BlockSpec((9 * Cp, Cp), lambda n: (0, 0))
    vec_spec = pl.BlockSpec((1, Cp), lambda n: (0, 0))

    return pl.pallas_call(
        _basic_block_kernel,
        out_shape=jax.ShapeDtypeStruct((N, H, W, Cp), jnp.bfloat16),
        grid=(N,),
        in_specs=[img_spec, w_spec, w_spec,
                  vec_spec, vec_spec, vec_spec, vec_spec],
        out_specs=img_spec,
        scratch_shapes=[
            pltpu.VMEM((H + 2, Wp2, Cp), jnp.float32),   # padded input halo
            pltpu.VMEM((H + 2, Wp2, Cp), jnp.float32),   # padded conv1 output halo
        ],
        compiler_params=pltpu.CompilerParams(
            dimension_semantics=("parallel",),
            vmem_limit_bytes=_vmem_limit_bytes(H, W, Wp2, Cp),
        ),
    )(x_nhwc_p, w1_t, w2_t, s1, b1, s2, b2)


def basic_block_forward(x_nchw, params, eps=1e-5):
    """BasicBlock._forward_v1 (stride=1, downsample=None, eval-mode BN).

    PyTorch-parity wrapper: NCHW f32 in/out.  In a full ResNet stack, convert
    to padded NHWC once at the network boundary and call `basic_block_nhwc`
    directly to avoid per-block transpose/pad/slice HBM passes.
    """
    N, C, H, W = x_nchw.shape
    prepped, Cp = prepare_basic_block_params(params, eps)

    x_nhwc = jnp.transpose(x_nchw, (0, 2, 3, 1))
    x_p = jnp.pad(x_nhwc, ((0, 0), (0, 0), (0, 0), (0, Cp - C))).astype(jnp.bfloat16)

    out_p = basic_block_nhwc(x_p, prepped)

    # drop padded channels, NHWC -> NCHW, back to f32 for the caller
    return jnp.transpose(out_p[..., :C].astype(jnp.float32), (0, 3, 1, 2))


def _reference_forward(x_nchw, params, eps=1e-5):
    """Pure-JAX reference (lax.conv, f32) for a correctness check."""
    w1, w2, g1, be1, m1, v1, g2, be2, m2, v2 = params
    dn = jax.lax.conv_dimension_numbers(x_nchw.shape, w1.shape,
                                        ("NCHW", "OIHW", "NCHW"))

    def conv(x, w):
        return jax.lax.conv_general_dilated(
            x, w, window_strides=(1, 1), padding=((1, 1), (1, 1)),
            dimension_numbers=dn, precision=jax.lax.Precision.HIGHEST)

    def bn(x, g, b, m, v):
        sc = (g / jnp.sqrt(v + eps)).reshape(1, -1, 1, 1)
        bi = (b - m * g / jnp.sqrt(v + eps)).reshape(1, -1, 1, 1)
        return x * sc + bi

    out = jax.nn.relu(bn(conv(x_nchw, w1), g1, be1, m1, v1))
    out = bn(conv(out, w2), g2, be2, m2, v2)
    return jax.nn.relu(out + x_nchw)


if __name__ == "__main__":
    N, C, H, W = 2, 4, 16, 16      # in_planes == out_planes == 4, stride == 1
    key = jax.random.PRNGKey(0)
    kx, kw1, kw2, kg1, kb1, km1, kv1, kg2, kb2, km2, kv2 = jax.random.split(key, 11)

    x = jax.random.normal(kx, (N, C, H, W), jnp.float32)

    # Deterministic synthetic parameters (PyTorch shapes: conv [Cout,Cin,3,3]).
    w1 = jax.random.normal(kw1, (C, C, 3, 3), jnp.float32) * 0.1
    w2 = jax.random.normal(kw2, (C, C, 3, 3), jnp.float32) * 0.1
    g1 = 1.0 + 0.1 * jax.random.normal(kg1, (C,), jnp.float32)
    be1 = 0.1 * jax.random.normal(kb1, (C,), jnp.float32)
    m1 = 0.1 * jax.random.normal(km1, (C,), jnp.float32)
    v1 = 1.0 + 0.1 * jax.nn.softplus(jax.random.normal(kv1, (C,), jnp.float32))
    g2 = 1.0 + 0.1 * jax.random.normal(kg2, (C,), jnp.float32)
    be2 = 0.1 * jax.random.normal(kb2, (C,), jnp.float32)
    m2 = 0.1 * jax.random.normal(km2, (C,), jnp.float32)
    v2 = 1.0 + 0.1 * jax.nn.softplus(jax.random.normal(kv2, (C,), jnp.float32))

    params = (w1, w2, g1, be1, m1, v1, g2, be2, m2, v2)

    out = jax.block_until_ready(basic_block_forward(x, params))
    ref = jax.block_until_ready(_reference_forward(x, params))

    assert out.shape == (N, C, H, W)
    # Tolerance reflects bf16 boundary activations + bf16 MXU operands
    # (f32 accumulation) vs. the all-f32 reference.
    assert jnp.allclose(out, ref, rtol=5e-2, atol=5e-2), \
        f"max abs err {jnp.max(jnp.abs(out - ref))}"
    print("KERNEL_OK")
</pallas_src>

<mosaic_0001>
module attributes {stable_mosaic.version = 11 : i64} {
  func.func @_basic_block_kernel(%arg0: i32, %arg1: memref<1x16x16x128xbf16, #tpu.memory_space<vmem>>, %arg2: memref<1152x128xbf16, #tpu.memory_space<vmem>>, %arg3: memref<1152x128xbf16, #tpu.memory_space<vmem>>, %arg4: memref<1x128xf32, #tpu.memory_space<vmem>>, %arg5: memref<1x128xf32, #tpu.memory_space<vmem>>, %arg6: memref<1x128xf32, #tpu.memory_space<vmem>>, %arg7: memref<1x128xf32, #tpu.memory_space<vmem>>, %arg8: memref<1x16x16x128xbf16, #tpu.memory_space<vmem>>, %arg9: memref<18x24x128xf32, #tpu.memory_space<vmem>>, %arg10: memref<18x24x128xf32, #tpu.memory_space<vmem>>) attributes {dimension_semantics = [#tpu.dimension_semantics<parallel>], iteration_bounds = array<i64: 2>, scalar_prefetch = 0 : i64, scratch_operands = 2 : i64, tpu.core_type = #tpu.core_type<tc>, window_params = [{transform_indices = @transform_0, window_bounds = array<i64: 1, 16, 16, 128>}, {pipeline_mode = #tpu.pipeline_mode<synchronous>, transform_indices = @transform_1, window_bounds = array<i64: 1152, 128>}, {pipeline_mode = #tpu.pipeline_mode<synchronous>, transform_indices = @transform_2, window_bounds = array<i64: 1152, 128>}, {pipeline_mode = #tpu.pipeline_mode<synchronous>, transform_indices = @transform_3, window_bounds = array<i64: 1, 128>}, {pipeline_mode = #tpu.pipeline_mode<synchronous>, transform_indices = @transform_4, window_bounds = array<i64: 1, 128>}, {pipeline_mode = #tpu.pipeline_mode<synchronous>, transform_indices = @transform_5, window_bounds = array<i64: 1, 128>}, {pipeline_mode = #tpu.pipeline_mode<synchronous>, transform_indices = @transform_6, window_bounds = array<i64: 1, 128>}, {transform_indices = @transform_7, window_bounds = array<i64: 1, 16, 16, 128>}]} {
    %cst = arith.constant 0.000000e+00 : f32
    %0 = vector.broadcast %cst : f32 to vector<1x24x128xf32>
    %c0 = arith.constant 0 : index
    %c0_0 = arith.constant 0 : index
    %c0_1 = arith.constant 0 : index
    %1 = vector.load %arg9[%c0, %c0_0, %c0_1] : memref<18x24x128xf32, #tpu.memory_space<vmem>>, vector<1x24x128xf32>
    tpu.vector_store %arg9[%c0, %c0_0, %c0_1], %0 {strides = array<i32>} : memref<18x24x128xf32, #tpu.memory_space<vmem>>, vector<1x24x128xf32>,
    %cst_2 = arith.constant 0.000000e+00 : f32
    %2 = vector.broadcast %cst_2 : f32 to vector<1x24x128xf32>
    %c17 = arith.constant 17 : index
    %c0_3 = arith.constant 0 : index
    %c0_4 = arith.constant 0 : index
    %3 = vector.load %arg9[%c17, %c0_3, %c0_4] : memref<18x24x128xf32, #tpu.memory_space<vmem>>, vector<1x24x128xf32>
    tpu.vector_store %arg9[%c17, %c0_3, %c0_4], %2 {strides = array<i32>} : memref<18x24x128xf32, #tpu.memory_space<vmem>>, vector<1x24x128xf32>,
    %cst_5 = arith.constant 0.000000e+00 : f32
    %4 = vector.broadcast %cst_5 : f32 to vector<18x1x128xf32>
    %c0_6 = arith.constant 0 : index
    %c0_7 = arith.constant 0 : index
    %c0_8 = arith.constant 0 : index
    %5 = vector.load %arg9[%c0_6, %c0_7, %c0_8] : memref<18x24x128xf32, #tpu.memory_space<vmem>>, vector<18x1x128xf32>
    tpu.vector_store %arg9[%c0_6, %c0_7, %c0_8], %4 {strides = array<i32>} : memref<18x24x128xf32, #tpu.memory_space<vmem>>, vector<18x1x128xf32>,
    %cst_9 = arith.constant 0.000000e+00 : f32
    %6 = vector.broadcast %cst_9 : f32 to vector<18x7x128xf32>
    %c0_10 = arith.constant 0 : index
    %c17_11 = arith.constant 17 : index
    %c0_12 = arith.constant 0 : index
    %7 = vector.load %arg9[%c0_10, %c17_11, %c0_12] : memref<18x24x128xf32, #tpu.memory_space<vmem>>, vector<18x7x128xf32>
    tpu.vector_store %arg9[%c0_10, %c17_11, %c0_12], %6 {strides = array<i32>} : memref<18x24x128xf32, #tpu.memory_space<vmem>>, vector<18x7x128xf32>,
    %cst_13 = arith.constant 0.000000e+00 : f32
    %8 = vector.broadcast %cst_13 : f32 to vector<1x24x128xf32>
    %c0_14 = arith.constant 0 : index
    %c0_15 = arith.constant 0 : index
    %c0_16 = arith.constant 0 : index
    %9 = vector.load %arg10[%c0_14, %c0_15, %c0_16] : memref<18x24x128xf32, #tpu.memory_space<vmem>>, vector<1x24x128xf32>
    tpu.vector_store %arg10[%c0_14, %c0_15, %c0_16], %8 {strides = array<i32>} : memref<18x24x128xf32, #tpu.memory_space<vmem>>, vector<1x24x128xf32>,
    %cst_17 = arith.constant 0.000000e+00 : f32
    %10 = vector.broadcast %cst_17 : f32 to vector<1x24x128xf32>
    %c17_18 = arith.constant 17 : index
    %c0_19 = arith.constant 0 : index
    %c0_20 = arith.constant 0 : index
    %11 = vector.load %arg10[%c17_18, %c0_19, %c0_20] : memref<18x24x128xf32, #tpu.memory_space<vmem>>, vector<1x24x128xf32>
    tpu.vector_store %arg10[%c17_18, %c0_19, %c0_20], %10 {strides = array<i32>} : memref<18x24x128xf32, #tpu.memory_space<vmem>>, vector<1x24x128xf32>,
    %cst_21 = arith.constant 0.000000e+00 : f32
    %12 = vector.broadcast %cst_21 : f32 to vector<18x1x128xf32>
    %c0_22 = arith.constant 0 : index
    %c0_23 = arith.constant 0 : index
    %c0_24 = arith.constant 0 : index
    %13 = vector.load %arg10[%c0_22, %c0_23, %c0_24] : memref<18x24x128xf32, #tpu.memory_space<vmem>>, vector<18x1x128xf32>
    tpu.vector_store %arg10[%c0_22, %c0_23, %c0_24], %12 {strides = array<i32>} : memref<18x24x128xf32, #tpu.memory_space<vmem>>, vector<18x1x128xf32>,
    %cst_25 = arith.constant 0.000000e+00 : f32
    %14 = vector.broadcast %cst_25 : f32 to vector<18x7x128xf32>
    %c0_26 = arith.constant 0 : index
    %c17_27 = arith.constant 17 : index
    %c0_28 = arith.constant 0 : index
    %15 = vector.load %arg10[%c0_26, %c17_27, %c0_28] : memref<18x24x128xf32, #tpu.memory_space<vmem>>, vector<18x7x128xf32>
    tpu.vector_store %arg10[%c0_26, %c17_27, %c0_28], %14 {strides = array<i32>} : memref<18x24x128xf32, #tpu.memory_space<vmem>>, vector<18x7x128xf32>,
    %c0_29 = arith.constant 0 : index
    %c0_30 = arith.constant 0 : index
    %c0_31 = arith.constant 0 : index
    %c0_32 = arith.constant 0 : index
    %16 = vector.load %arg1[%c0_29, %c0_30, %c0_31, %c0_32] : memref<1x16x16x128xbf16, #tpu.memory_space<vmem>>, vector<1x16x16x128xbf16>
    %17 = vector.shape_cast %16 : vector<1x16x16x128xbf16> to vector<16x16x128xbf16>
    %18 = arith.extf %17 : vector<16x16x128xbf16> to vector<16x16x128xf32>
    %c1 = arith.constant 1 : index
    %c1_33 = arith.constant 1 : index
    %c0_34 = arith.constant 0 : index
    %19 = vector.load %arg9[%c1, %c1_33, %c0_34] : memref<18x24x128xf32, #tpu.memory_space<vmem>>, vector<16x16x128xf32>
    tpu.vector_store %arg9[%c1, %c1_33, %c0_34], %18 {strides = array<i32>} : memref<18x24x128xf32, #tpu.memory_space<vmem>>, vector<16x16x128xf32>,
    %c0_35 = arith.constant 0 : index
    %c0_36 = arith.constant 0 : index
    %c0_37 = arith.constant 0 : index
    %20 = vector.load %arg9[%c0_35, %c0_36, %c0_37] : memref<18x24x128xf32, #tpu.memory_space<vmem>>, vector<16x16x128xf32>
    %21 = vector.shape_cast %20 : vector<16x16x128xf32> to vector<256x128xf32>
    %22 = arith.truncf %21 : vector<256x128xf32> to vector<256x128xbf16>
    %c0_38 = arith.constant 0 : index
    %c0_39 = arith.constant 0 : index
    %23 = vector.load %arg2[%c0_38, %c0_39] : memref<1152x128xbf16, #tpu.memory_space<vmem>>, vector<128x128xbf16>
    %cst_40 = arith.constant dense<0.000000e+00> : vector<256x128xf32>
    %24 = tpu.matmul %22, %23, %cst_40 {dimension_numbers = #tpu.dot_dimension_numbers<[1], [0], [0], [1], [0, 0, 1, 1], [], []>} : vector<256x128xbf16>, vector<128x128xbf16>, vector<256x128xf32> -> vector<256x128xf32>
    %c0_41 = arith.constant 0 : index
    %c1_42 = arith.constant 1 : index
    %c0_43 = arith.constant 0 : index
    %25 = vector.load %arg9[%c0_41, %c1_42, %c0_43] : memref<18x24x128xf32, #tpu.memory_space<vmem>>, vector<16x16x128xf32>
    %26 = vector.shape_cast %25 : vector<16x16x128xf32> to vector<256x128xf32>
    %27 = arith.truncf %26 : vector<256x128xf32> to vector<256x128xbf16>
    %c128 = arith.constant 128 : index
    %c0_44 = arith.constant 0 : index
    %28 = vector.load %arg2[%c128, %c0_44] : memref<1152x128xbf16, #tpu.memory_space<vmem>>, vector<128x128xbf16>
    %cst_45 = arith.constant dense<0.000000e+00> : vector<256x128xf32>
    %29 = tpu.matmul %27, %28, %cst_45 {dimension_numbers = #tpu.dot_dimension_numbers<[1], [0], [0], [1], [0, 0, 1, 1], [], []>} : vector<256x128xbf16>, vector<128x128xbf16>, vector<256x128xf32> -> vector<256x128xf32>
    %30 = arith.addf %24, %29 : vector<256x128xf32>
    %c0_46 = arith.constant 0 : index
    %c2 = arith.constant 2 : index
    %c0_47 = arith.constant 0 : index
    %31 = vector.load %arg9[%c0_46, %c2, %c0_47] : memref<18x24x128xf32, #tpu.memory_space<vmem>>, vector<16x16x128xf32>
    %32 = vector.shape_cast %31 : vector<16x16x128xf32> to vector<256x128xf32>
    %33 = arith.truncf %32 : vector<256x128xf32> to vector<256x128xbf16>
    %c256 = arith.constant 256 : index
    %c0_48 = arith.constant 0 : index
    %34 = vector.load %arg2[%c256, %c0_48] : memref<1152x128xbf16, #tpu.memory_space<vmem>>, vector<128x128xbf16>
    %cst_49 = arith.constant dense<0.000000e+00> : vector<256x128xf32>
    %35 = tpu.matmul %33, %34, %cst_49 {dimension_numbers = #tpu.dot_dimension_numbers<[1], [0], [0], [1], [0, 0, 1, 1], [], []>} : vector<256x128xbf16>, vector<128x128xbf16>, vector<256x128xf32> -> vector<256x128xf32>
    %36 = arith.addf %30, %35 : vector<256x128xf32>
    %c1_50 = arith.constant 1 : index
    %c0_51 = arith.constant 0 : index
    %c0_52 = arith.constant 0 : index
    %37 = vector.load %arg9[%c1_50, %c0_51, %c0_52] : memref<18x24x128xf32, #tpu.memory_space<vmem>>, vector<16x16x128xf32>
    %38 = vector.shape_cast %37 : vector<16x16x128xf32> to vector<256x128xf32>
    %39 = arith.truncf %38 : vector<256x128xf32> to vector<256x128xbf16>
    %c384 = arith.constant 384 : index
    %c0_53 = arith.constant 0 : index
    %40 = vector.load %arg2[%c384, %c0_53] : memref<1152x128xbf16, #tpu.memory_space<vmem>>, vector<128x128xbf16>
    %cst_54 = arith.constant dense<0.000000e+00> : vector<256x128xf32>
    %41 = tpu.matmul %39, %40, %cst_54 {dimension_numbers = #tpu.dot_dimension_numbers<[1], [0], [0], [1], [0, 0, 1, 1], [], []>} : vector<256x128xbf16>, vector<128x128xbf16>, vector<256x128xf32> -> vector<256x128xf32>
    %42 = arith.addf %36, %41 : vector<256x128xf32>
    %c1_55 = arith.constant 1 : index
    %c1_56 = arith.constant 1 : index
    %c0_57 = arith.constant 0 : index
    %43 = vector.load %arg9[%c1_55, %c1_56, %c0_57] : memref<18x24x128xf32, #tpu.memory_space<vmem>>, vector<16x16x128xf32>
    %44 = vector.shape_cast %43 : vector<16x16x128xf32> to vector<256x128xf32>
    %45 = arith.truncf %44 : vector<256x128xf32> to vector<256x128xbf16>
    %c512 = arith.constant 512 : index
    %c0_58 = arith.constant 0 : index
    %46 = vector.load %arg2[%c512, %c0_58] : memref<1152x128xbf16, #tpu.memory_space<vmem>>, vector<128x128xbf16>
    %cst_59 = arith.constant dense<0.000000e+00> : vector<256x128xf32>
    %47 = tpu.matmul %45, %46, %cst_59 {dimension_numbers = #tpu.dot_dimension_numbers<[1], [0], [0], [1], [0, 0, 1, 1], [], []>} : vector<256x128xbf16>, vector<128x128xbf16>, vector<256x128xf32> -> vector<256x128xf32>
    %48 = arith.addf %42, %47 : vector<256x128xf32>
    %c1_60 = arith.constant 1 : index
    %c2_61 = arith.constant 2 : index
    %c0_62 = arith.constant 0 : index
    %49 = vector.load %arg9[%c1_60, %c2_61, %c0_62] : memref<18x24x128xf32, #tpu.memory_space<vmem>>, vector<16x16x128xf32>
    %50 = vector.shape_cast %49 : vector<16x16x128xf32> to vector<256x128xf32>
    %51 = arith.truncf %50 : vector<256x128xf32> to vector<256x128xbf16>
    %c640 = arith.constant 640 : index
    %c0_63 = arith.constant 0 : index
    %52 = vector.load %arg2[%c640, %c0_63] : memref<1152x128xbf16, #tpu.memory_space<vmem>>, vector<128x128xbf16>
    %cst_64 = arith.constant dense<0.000000e+00> : vector<256x128xf32>
    %53 = tpu.matmul %51, %52, %cst_64 {dimension_numbers = #tpu.dot_dimension_numbers<[1], [0], [0], [1], [0, 0, 1, 1], [], []>} : vector<256x128xbf16>, vector<128x128xbf16>, vector<256x128xf32> -> vector<256x128xf32>
    %54 = arith.addf %48, %53 : vector<256x128xf32>
    %c2_65 = arith.constant 2 : index
    %c0_66 = arith.constant 0 : index
    %c0_67 = arith.constant 0 : index
    %55 = vector.load %arg9[%c2_65, %c0_66, %c0_67] : memref<18x24x128xf32, #tpu.memory_space<vmem>>, vector<16x16x128xf32>
    %56 = vector.shape_cast %55 : vector<16x16x128xf32> to vector<256x128xf32>
    %57 = arith.truncf %56 : vector<256x128xf32> to vector<256x128xbf16>
    %c768 = arith.constant 768 : index
    %c0_68 = arith.constant 0 : index
    %58 = vector.load %arg2[%c768, %c0_68] : memref<1152x128xbf16, #tpu.memory_space<vmem>>, vector<128x128xbf16>
    %cst_69 = arith.constant dense<0.000000e+00> : vector<256x128xf32>
    %59 = tpu.matmul %57, %58, %cst_69 {dimension_numbers = #tpu.dot_dimension_numbers<[1], [0], [0], [1], [0, 0, 1, 1], [], []>} : vector<256x128xbf16>, vector<128x128xbf16>, vector<256x128xf32> -> vector<256x128xf32>
    %60 = arith.addf %54, %59 : vector<256x128xf32>
    %c2_70 = arith.constant 2 : index
    %c1_71 = arith.constant 1 : index
    %c0_72 = arith.constant 0 : index
    %61 = vector.load %arg9[%c2_70, %c1_71, %c0_72] : memref<18x24x128xf32, #tpu.memory_space<vmem>>, vector<16x16x128xf32>
    %62 = vector.shape_cast %61 : vector<16x16x128xf32> to vector<256x128xf32>
    %63 = arith.truncf %62 : vector<256x128xf32> to vector<256x128xbf16>
    %c896 = arith.constant 896 : index
    %c0_73 = arith.constant 0 : index
    %64 = vector.load %arg2[%c896, %c0_73] : memref<1152x128xbf16, #tpu.memory_space<vmem>>, vector<128x128xbf16>
    %cst_74 = arith.constant dense<0.000000e+00> : vector<256x128xf32>
    %65 = tpu.matmul %63, %64, %cst_74 {dimension_numbers = #tpu.dot_dimension_numbers<[1], [0], [0], [1], [0, 0, 1, 1], [], []>} : vector<256x128xbf16>, vector<128x128xbf16>, vector<256x128xf32> -> vector<256x128xf32>
    %66 = arith.addf %60, %65 : vector<256x128xf32>
    %c2_75 = arith.constant 2 : index
    %c2_76 = arith.constant 2 : index
    %c0_77 = arith.constant 0 : index
    %67 = vector.load %arg9[%c2_75, %c2_76, %c0_77] : memref<18x24x128xf32, #tpu.memory_space<vmem>>, vector<16x16x128xf32>
    %68 = vector.shape_cast %67 : vector<16x16x128xf32> to vector<256x128xf32>
    %69 = arith.truncf %68 : vector<256x128xf32> to vector<256x128xbf16>
    %c1024 = arith.constant 1024 : index
    %c0_78 = arith.constant 0 : index
    %70 = vector.load %arg2[%c1024, %c0_78] : memref<1152x128xbf16, #tpu.memory_space<vmem>>, vector<128x128xbf16>
    %cst_79 = arith.constant dense<0.000000e+00> : vector<256x128xf32>
    %71 = tpu.matmul %69, %70, %cst_79 {dimension_numbers = #tpu.dot_dimension_numbers<[1], [0], [0], [1], [0, 0, 1, 1], [], []>} : vector<256x128xbf16>, vector<128x128xbf16>, vector<256x128xf32> -> vector<256x128xf32>
    %72 = arith.addf %66, %71 : vector<256x128xf32>
    %c0_80 = arith.constant 0 : index
    %c0_81 = arith.constant 0 : index
    %73 = vector.load %arg4[%c0_80, %c0_81] : memref<1x128xf32, #tpu.memory_space<vmem>>, vector<1x128xf32>
    %74 = vector.broadcast %73 : vector<1x128xf32> to vector<256x128xf32>
    %75 = arith.mulf %72, %74 : vector<256x128xf32>
    %c0_82 = arith.constant 0 : index
    %c0_83 = arith.constant 0 : index
    %76 = vector.load %arg5[%c0_82, %c0_83] : memref<1x128xf32, #tpu.memory_space<vmem>>, vector<1x128xf32>
    %77 = vector.broadcast %76 : vector<1x128xf32> to vector<256x128xf32>
    %78 = arith.addf %75, %77 : vector<256x128xf32>
    %cst_84 = arith.constant 0.000000e+00 : f32
    %79 = vector.broadcast %cst_84 : f32 to vector<256x128xf32>
    %80 = arith.maximumf %78, %79 : vector<256x128xf32>
    %81 = vector.shape_cast %80 : vector<256x128xf32> to vector<16x16x128xf32>
    %c1_85 = arith.constant 1 : index
    %c1_86 = arith.constant 1 : index
    %c0_87 = arith.constant 0 : index
    %82 = vector.load %arg10[%c1_85, %c1_86, %c0_87] : memref<18x24x128xf32, #tpu.memory_space<vmem>>, vector<16x16x128xf32>
    tpu.vector_store %arg10[%c1_85, %c1_86, %c0_87], %81 {strides = array<i32>} : memref<18x24x128xf32, #tpu.memory_space<vmem>>, vector<16x16x128xf32>,
    %c0_88 = arith.constant 0 : index
    %c0_89 = arith.constant 0 : index
    %c0_90 = arith.constant 0 : index
    %83 = vector.load %arg10[%c0_88, %c0_89, %c0_90] : memref<18x24x128xf32, #tpu.memory_space<vmem>>, vector<16x16x128xf32>
    %84 = vector.shape_cast %83 : vector<16x16x128xf32> to vector<256x128xf32>
    %85 = arith.truncf %84 : vector<256x128xf32> to vector<256x128xbf16>
    %c0_91 = arith.constant 0 : index
    %c0_92 = arith.constant 0 : index
    %86 = vector.load %arg3[%c0_91, %c0_92] : memref<1152x128xbf16, #tpu.memory_space<vmem>>, vector<128x128xbf16>
    %cst_93 = arith.constant dense<0.000000e+00> : vector<256x128xf32>
    %87 = tpu.matmul %85, %86, %cst_93 {dimension_numbers = #tpu.dot_dimension_numbers<[1], [0], [0], [1], [0, 0, 1, 1], [], []>} : vector<256x128xbf16>, vector<128x128xbf16>, vector<256x128xf32> -> vector<256x128xf32>
    %c0_94 = arith.constant 0 : index
    %c1_95 = arith.constant 1 : index
    %c0_96 = arith.constant 0 : index
    %88 = vector.load %arg10[%c0_94, %c1_95, %c0_96] : memref<18x24x128xf32, #tpu.memory_space<vmem>>, vector<16x16x128xf32>
    %89 = vector.shape_cast %88 : vector<16x16x128xf32> to vector<256x128xf32>
    %90 = arith.truncf %89 : vector<256x128xf32> to vector<256x128xbf16>
    %c128_97 = arith.constant 128 : index
    %c0_98 = arith.constant 0 : index
    %91 = vector.load %arg3[%c128_97, %c0_98] : memref<1152x128xbf16, #tpu.memory_space<vmem>>, vector<128x128xbf16>
    %cst_99 = arith.constant dense<0.000000e+00> : vector<256x128xf32>
    %92 = tpu.matmul %90, %91, %cst_99 {dimension_numbers = #tpu.dot_dimension_numbers<[1], [0], [0], [1], [0, 0, 1, 1], [], []>} : vector<256x128xbf16>, vector<128x128xbf16>, vector<256x128xf32> -> vector<256x128xf32>
    %93 = arith.addf %87, %92 : vector<256x128xf32>
    %c0_100 = arith.constant 0 : index
    %c2_101 = arith.constant 2 : index
    %c0_102 = arith.constant 0 : index
    %94 = vector.load %arg10[%c0_100, %c2_101, %c0_102] : memref<18x24x128xf32, #tpu.memory_space<vmem>>, vector<16x16x128xf32>
    %95 = vector.shape_cast %94 : vector<16x16x128xf32> to vector<256x128xf32>
    %96 = arith.truncf %95 : vector<256x128xf32> to vector<256x128xbf16>
    %c256_103 = arith.constant 256 : index
    %c0_104 = arith.constant 0 : index
    %97 = vector.load %arg3[%c256_103, %c0_104] : memref<1152x128xbf16, #tpu.memory_space<vmem>>, vector<128x128xbf16>
    %cst_105 = arith.constant dense<0.000000e+00> : vector<256x128xf32>
    %98 = tpu.matmul %96, %97, %cst_105 {dimension_numbers = #tpu.dot_dimension_numbers<[1], [0], [0], [1], [0, 0, 1, 1], [], []>} : vector<256x128xbf16>, vector<128x128xbf16>, vector<256x128xf32> -> vector<256x128xf32>
    %99 = arith.addf %93, %98 : vector<256x128xf32>
    %c1_106 = arith.constant 1 : index
    %c0_107 = arith.constant 0 : index
    %c0_108 = arith.constant 0 : index
    %100 = vector.load %arg10[%c1_106, %c0_107, %c0_108] : memref<18x24x128xf32, #tpu.memory_space<vmem>>, vector<16x16x128xf32>
    %101 = vector.shape_cast %100 : vector<16x16x128xf32> to vector<256x128xf32>
    %102 = arith.truncf %101 : vector<256x128xf32> to vector<256x128xbf16>
    %c384_109 = arith.constant 384 : index
    %c0_110 = arith.constant 0 : index
    %103 = vector.load %arg3[%c384_109, %c0_110] : memref<1152x128xbf16, #tpu.memory_space<vmem>>, vector<128x128xbf16>
    %cst_111 = arith.constant dense<0.000000e+00> : vector<256x128xf32>
    %104 = tpu.matmul %102, %103, %cst_111 {dimension_numbers = #tpu.dot_dimension_numbers<[1], [0], [0], [1], [0, 0, 1, 1], [], []>} : vector<256x128xbf16>, vector<128x128xbf16>, vector<256x128xf32> -> vector<256x128xf32>
    %105 = arith.addf %99, %104 : vector<256x128xf32>
    %c1_112 = arith.constant 1 : index
    %c1_113 = arith.constant 1 : index
    %c0_114 = arith.constant 0 : index
    %106 = vector.load %arg10[%c1_112, %c1_113, %c0_114] : memref<18x24x128xf32, #tpu.memory_space<vmem>>, vector<16x16x128xf32>
    %107 = vector.shape_cast %106 : vector<16x16x128xf32> to vector<256x128xf32>
    %108 = arith.truncf %107 : vector<256x128xf32> to vector<256x128xbf16>
    %c512_115 = arith.constant 512 : index
    %c0_116 = arith.constant 0 : index
    %109 = vector.load %arg3[%c512_115, %c0_116] : memref<1152x128xbf16, #tpu.memory_space<vmem>>, vector<128x128xbf16>
    %cst_117 = arith.constant dense<0.000000e+00> : vector<256x128xf32>
    %110 = tpu.matmul %108, %109, %cst_117 {dimension_numbers = #tpu.dot_dimension_numbers<[1], [0], [0], [1], [0, 0, 1, 1], [], []>} : vector<256x128xbf16>, vector<128x128xbf16>, vector<256x128xf32> -> vector<256x128xf32>
    %111 = arith.addf %105, %110 : vector<256x128xf32>
    %c1_118 = arith.constant 1 : index
    %c2_119 = arith.constant 2 : index
    %c0_120 = arith.constant 0 : index
    %112 = vector.load %arg10[%c1_118, %c2_119, %c0_120] : memref<18x24x128xf32, #tpu.memory_space<vmem>>, vector<16x16x128xf32>
    %113 = vector.shape_cast %112 : vector<16x16x128xf32> to vector<256x128xf32>
    %114 = arith.truncf %113 : vector<256x128xf32> to vector<256x128xbf16>
    %c640_121 = arith.constant 640 : index
    %c0_122 = arith.constant 0 : index
    %115 = vector.load %arg3[%c640_121, %c0_122] : memref<1152x128xbf16, #tpu.memory_space<vmem>>, vector<128x128xbf16>
    %cst_123 = arith.constant dense<0.000000e+00> : vector<256x128xf32>
    %116 = tpu.matmul %114, %115, %cst_123 {dimension_numbers = #tpu.dot_dimension_numbers<[1], [0], [0], [1], [0, 0, 1, 1], [], []>} : vector<256x128xbf16>, vector<128x128xbf16>, vector<256x128xf32> -> vector<256x128xf32>
    %117 = arith.addf %111, %116 : vector<256x128xf32>
    %c2_124 = arith.constant 2 : index
    %c0_125 = arith.constant 0 : index
    %c0_126 = arith.constant 0 : index
    %118 = vector.load %arg10[%c2_124, %c0_125, %c0_126] : memref<18x24x128xf32, #tpu.memory_space<vmem>>, vector<16x16x128xf32>
    %119 = vector.shape_cast %118 : vector<16x16x128xf32> to vector<256x128xf32>
    %120 = arith.truncf %119 : vector<256x128xf32> to vector<256x128xbf16>
    %c768_127 = arith.constant 768 : index
    %c0_128 = arith.constant 0 : index
    %121 = vector.load %arg3[%c768_127, %c0_128] : memref<1152x128xbf16, #tpu.memory_space<vmem>>, vector<128x128xbf16>
    %cst_129 = arith.constant dense<0.000000e+00> : vector<256x128xf32>
    %122 = tpu.matmul %120, %121, %cst_129 {dimension_numbers = #tpu.dot_dimension_numbers<[1], [0], [0], [1], [0, 0, 1, 1], [], []>} : vector<256x128xbf16>, vector<128x128xbf16>, vector<256x128xf32> -> vector<256x128xf32>
    %123 = arith.addf %117, %122 : vector<256x128xf32>
    %c2_130 = arith.constant 2 : index
    %c1_131 = arith.constant 1 : index
    %c0_132 = arith.constant 0 : index
    %124 = vector.load %arg10[%c2_130, %c1_131, %c0_132] : memref<18x24x128xf32, #tpu.memory_space<vmem>>, vector<16x16x128xf32>
    %125 = vector.shape_cast %124 : vector<16x16x128xf32> to vector<256x128xf32>
    %126 = arith.truncf %125 : vector<256x128xf32> to vector<256x128xbf16>
    %c896_133 = arith.constant 896 : index
    %c0_134 = arith.constant 0 : index
    %127 = vector.load %arg3[%c896_133, %c0_134] : memref<1152x128xbf16, #tpu.memory_space<vmem>>, vector<128x128xbf16>
    %cst_135 = arith.constant dense<0.000000e+00> : vector<256x128xf32>
    %128 = tpu.matmul %126, %127, %cst_135 {dimension_numbers = #tpu.dot_dimension_numbers<[1], [0], [0], [1], [0, 0, 1, 1], [], []>} : vector<256x128xbf16>, vector<128x128xbf16>, vector<256x128xf32> -> vector<256x128xf32>
    %129 = arith.addf %123, %128 : vector<256x128xf32>
    %c2_136 = arith.constant 2 : index
    %c2_137 = arith.constant 2 : index
    %c0_138 = arith.constant 0 : index
    %130 = vector.load %arg10[%c2_136, %c2_137, %c0_138] : memref<18x24x128xf32, #tpu.memory_space<vmem>>, vector<16x16x128xf32>
    %131 = vector.shape_cast %130 : vector<16x16x128xf32> to vector<256x128xf32>
    %132 = arith.truncf %131 : vector<256x128xf32> to vector<256x128xbf16>
    %c1024_139 = arith.constant 1024 : index
    %c0_140 = arith.constant 0 : index
    %133 = vector.load %arg3[%c1024_139, %c0_140] : memref<1152x128xbf16, #tpu.memory_space<vmem>>, vector<128x128xbf16>
    %cst_141 = arith.constant dense<0.000000e+00> : vector<256x128xf32>
    %134 = tpu.matmul %132, %133, %cst_141 {dimension_numbers = #tpu.dot_dimension_numbers<[1], [0], [0], [1], [0, 0, 1, 1], [], []>} : vector<256x128xbf16>, vector<128x128xbf16>, vector<256x128xf32> -> vector<256x128xf32>
    %135 = arith.addf %129, %134 : vector<256x128xf32>
    %c0_142 = arith.constant 0 : index
    %c0_143 = arith.constant 0 : index
    %136 = vector.load %arg6[%c0_142, %c0_143] : memref<1x128xf32, #tpu.memory_space<vmem>>, vector<1x128xf32>
    %137 = vector.broadcast %136 : vector<1x128xf32> to vector<256x128xf32>
    %138 = arith.mulf %135, %137 : vector<256x128xf32>
    %c0_144 = arith.constant 0 : index
    %c0_145 = arith.constant 0 : index
    %139 = vector.load %arg7[%c0_144, %c0_145] : memref<1x128xf32, #tpu.memory_space<vmem>>, vector<1x128xf32>
    %140 = vector.broadcast %139 : vector<1x128xf32> to vector<256x128xf32>
    %141 = arith.addf %138, %140 : vector<256x128xf32>
    %142 = vector.shape_cast %18 : vector<16x16x128xf32> to vector<256x128xf32>
    %143 = arith.addf %141, %142 : vector<256x128xf32>
    %cst_146 = arith.constant 0.000000e+00 : f32
    %144 = vector.broadcast %cst_146 : f32 to vector<256x128xf32>
    %145 = arith.maximumf %143, %144 : vector<256x128xf32>
    %146 = vector.shape_cast %145 : vector<256x128xf32> to vector<1x16x16x128xf32>
    %147 = arith.truncf %146 : vector<1x16x16x128xf32> to vector<1x16x16x128xbf16>
    %c0_147 = arith.constant 0 : index
    %c0_148 = arith.constant 0 : index
    %c0_149 = arith.constant 0 : index
    %c0_150 = arith.constant 0 : index
    %148 = vector.load %arg8[%c0_147, %c0_148, %c0_149, %c0_150] : memref<1x16x16x128xbf16, #tpu.memory_space<vmem>>, vector<1x16x16x128xbf16>
    tpu.vector_store %arg8[%c0_147, %c0_148, %c0_149, %c0_150], %147 {strides = array<i32>} : memref<1x16x16x128xbf16, #tpu.memory_space<vmem>>, vector<1x16x16x128xbf16>,
    return
  }
  func.func @transform_0(%arg0: i32) -> (i32, i32, i32, i32) {
    %c0_i32 = arith.constant 0 : i32
    %c0_i32_0 = arith.constant 0 : i32
    %c0_i32_1 = arith.constant 0 : i32
    %c0_i32_2 = arith.constant 0 : i32
    return %arg0, %c0_i32, %c0_i32_0, %c0_i32_1 : i32, i32, i32, i32
  }
  func.func @transform_1(%arg0: i32) -> (i32, i32) {
    %c0_i32 = arith.constant 0 : i32
    %c0_i32_0 = arith.constant 0 : i32
    %c0_i32_1 = arith.constant 0 : i32
    return %c0_i32, %c0_i32_0 : i32, i32
  }
  func.func @transform_2(%arg0: i32) -> (i32, i32) {
    %c0_i32 = arith.constant 0 : i32
    %c0_i32_0 = arith.constant 0 : i32
    %c0_i32_1 = arith.constant 0 : i32
    return %c0_i32, %c0_i32_0 : i32, i32
  }
  func.func @transform_3(%arg0: i32) -> (i32, i32) {
    %c0_i32 = arith.constant 0 : i32
    %c0_i32_0 = arith.constant 0 : i32
    %c0_i32_1 = arith.constant 0 : i32
    return %c0_i32, %c0_i32_0 : i32, i32
  }
  func.func @transform_4(%arg0: i32) -> (i32, i32) {
    %c0_i32 = arith.constant 0 : i32
    %c0_i32_0 = arith.constant 0 : i32
    %c0_i32_1 = arith.constant 0 : i32
    return %c0_i32, %c0_i32_0 : i32, i32
  }
  func.func @transform_5(%arg0: i32) -> (i32, i32) {
    %c0_i32 = arith.constant 0 : i32
    %c0_i32_0 = arith.constant 0 : i32
    %c0_i32_1 = arith.constant 0 : i32
    return %c0_i32, %c0_i32_0 : i32, i32
  }
  func.func @transform_6(%arg0: i32) -> (i32, i32) {
    %c0_i32 = arith.constant 0 : i32
    %c0_i32_0 = arith.constant 0 : i32
    %c0_i32_1 = arith.constant 0 : i32
    return %c0_i32, %c0_i32_0 : i32, i32
  }
  func.func @transform_7(%arg0: i32) -> (i32, i32, i32, i32) {
    %c0_i32 = arith.constant 0 : i32
    %c0_i32_0 = arith.constant 0 : i32
    %c0_i32_1 = arith.constant 0 : i32
    %c0_i32_2 = arith.constant 0 : i32
    return %arg0, %c0_i32, %c0_i32_0, %c0_i32_1 : i32, i32, i32, i32
  }
}

</mosaic_0001>

<bundles_post_ra>
// kernel: tpu_custom_call.1
= control target key start
LH: loop header
LB: loop body
LE: loop exit
PB: predicated region body
PF: predicated region fallthrough
CT: control target
= control target key end

     0   :  { %s10690_s0 = inlined_call_operand.hbm [shape: bf16[2,16,16,128], index: 0, kind: input, shape index: {}]   ;;  %s10691_s1 = inlined_call_operand.hbm [shape: bf16[1152,128], index: 1, kind: input, shape index: {}]   ;;  %s10692_s2 = inlined_call_operand.hbm [shape: bf16[1152,128], index: 2, kind: input, shape index: {}]   ;;  %s10693_s3 = inlined_call_operand.vmem [shape: f32[1,128], index: 3, kind: input, shape index: {}]   ;;  %s10694_s4 = inlined_call_operand.vmem [shape: f32[1,128], index: 4, kind: input, shape index: {}]   ;;  %s10695_s5 = inlined_call_operand.vmem [shape: f32[1,128], index: 5, kind: input, shape index: {}]   ;;  %s10696_s6 = inlined_call_operand.vmem [shape: f32[1,128], index: 6, kind: input, shape index: {}]   ;;  %s10697_s7 = inlined_call_operand.hbm [shape: bf16[2,16,16,128], index: 7, kind: output, shape index: {}]  }
   0x1   :  { %10706 = sst [smem:[#allocation91_spill]] %s10691_s1 }
   0x2   :  { %12 = vsyncpa [#allocation5], 0 }
   0x3   :  { %14 = vsyncpa [#allocation5 + $0x1], 0 }
   0x4   :  { %15 = vsyncpa [#allocation8], 0 }
   0x5   :  { %16 = vsyncpa [#allocation6], 0 }
   0x6   :  { %18 = vsyncpa [#allocation6 + $0x1], 0  ;;  %s8593_s24 = smov 0   ;;  %s8595_s25 = smov 0  }
   0x7   :  { %s8597_s26 = smov 0   ;;  %s8599_s27 = smov 0  }
   0x8 LB: > { %s8614_s28 = sadd.s32 4294967295, %s8542_s27   ;;  %s6425_s29 = sadd.s32 4294967294, %s8542_s27   ;;  %s8542_s27 = sphi %s8599_s27, %s10934_s27   ;;  %s8538_s26 = sphi %s8597_s26, %s10933_s26   ;;  %s8534_s25 = sphi %s8595_s25, %s10932_s25   ;;  %s8530_s24 = sphi %s8593_s24, %s10931_s24  }
   0x9   : > { %p44_p0 = scmp.ne.s32.totalorder %s8534_s25, %s8530_s24  ;;  %p10699_p1 = scmp.eq.s32.totalorder %s8614_s28, 0 }
   0xa   : > { %p194_p2 = scmp.eq.s32.totalorder %s8614_s28, 1  ;;  %p200_p3 = scmp.eq.s32.totalorder %s6425_s29, 1 }
   0xb   : > { %p8623_p4 = por %p10699_p1, %p44_p0  ;;  %p6426_p5 = scmp.ge.s32.totalorder %s8542_s27, 1 }
   0xc   : > { %p8628_p6 = por %p200_p3, %p44_p0  ;;  %p207_p7 = scmp.lt.s32.totalorder %s8542_s27, 3 }
   0xd   : > { %s10707_s30 = scalar_select %p8623_p4, 1, 0 }
   0xe   : > { %s10708_s8 = scalar_select %p8628_p6, 1, 0 }
   0xf   : > { %p8633_p8 = pnand %p6426_p5, %p207_p7  ;;  %s8544_s10 = smov [#allocation7]  }
  0x10   : > { %s219_s11 = sshll.u32 %s8544_s10, 4  ;;  %s8545_s13 = smov [#allocation9]   ;;  %s220_s11 = int_to_ptr.vmem [resolvable:$true] %s219_s11 }
  0x11   : > { %s10709_s9 = scalar_select %p8633_p8, 1, 0 }
  0x12   : > { %p8139_p9 = pneg %p8633_p8  ;;  %s232_s14 = sshll.u32 %s8545_s13, 4  ;;  %s233_s14 = int_to_ptr.vmem [resolvable:$true] %s232_s14 }
  0x13   : > { %s8405_s15 = scalar_lea.vmem %s220_s11, 9216  ;;  %p8413_p5 = scmp.lt.s32.totalorder %s220_s11, %s220_s11 }
  0x14   : > { %p8642_p11 = pnand %p8139_p9, %p10699_p1  ;;  %p8406_p13 = scmp.ne.s32.totalorder %s220_s11, %s8405_s15 }
  0x15   : > { %p8414_p7 = scmp.lt.s32.totalorder %s8405_s15, %s8405_s15 }
  0x16   : > { %p8396_p12 = pneg %p8642_p11 }
  0x17   : > { %p8415_p10 = por %p8414_p7, %p8413_p5 }
  0x18   : > { %p8408_p0 = pnand %p8406_p13, %p8396_p12 }
  0x1a   : > { %p8409_p3 = pneg %p8408_p0 }
  0x1c   : > { %p8416_p9 = pnand %p8415_p10, %p8409_p3 }
  0x1e   : > { %8419 = shalt.err (!%p8416_p9)
}
  0x1f   : > { %s10698_s16 = smov 64   ;;  %s10700_s17 = smov 4  }
  0x20   : > { %s10711_s1 = sld [smem:[#allocation91_spill]]  ;;  %s8431_s20 = scalar_lea.vmem %s233_s14, 9216 }
  0x21   : > { %p8432_p13 = scmp.ne.s32.totalorder %s233_s14, %s8431_s20  ;;  %p8439_p10 = scmp.lt.s32.totalorder %s233_s14, %s233_s14 }
  0x22   : > { %p8440_p3 = scmp.lt.s32.totalorder %s8431_s20, %s8431_s20 }
  0x23   : > { %p8434_p0 = pnand %p8432_p13, %p8396_p12 }
  0x24   : > { %p8441_p7 = por %p8440_p3, %p8439_p10 }
  0x25   : > { %p8435_p5 = pneg %p8434_p0 }
  0x26   : > { %8142 = dma.hbm_to_vmem [thread:$0]  (!%p8642_p11), %s10711_s1, 9216, %s220_s11, [#allocation8], %s10698_s16, %s10698_s16, %s10700_s17  }
  0x27   : > { %p8442_p9 = pnand %p8441_p7, %p8435_p5 }
  0x29   : > { %8445 = shalt.err (!%p8442_p9)
}
  0x2a   : > { %8145 = dma.hbm_to_vmem [thread:$0]  (!%p8642_p11), %s10692_s2, 9216, %s233_s14, [#allocation8], %s10698_s16, %s10698_s16, %s10700_s17  }
  0x2b   : > { %s8671_s23 = sadd.s32 1, %s8542_s27   ;;  %s31_s29 = sadd.s32 1, %s8538_s26 }
  0x2c   : > { %s28_s10 = ssub.s32 %s8542_s27, %s8671_s23  ;;  %p38_p12 = scmp.ne.s32.totalorder %s8538_s26, %s8534_s25 }
  0x2d   : > { %p29_p13 = scmp.eq.s32.totalorder %s28_s10, 0  ;;  %p39_p0 = scmp.eq.s32.totalorder %s8542_s27, 0 }
  0x2e   : > { %p8681_p5 = por %p194_p2, %p38_p12  ;;  %p8156_p10 = scmp.lt.s32.totalorder %s8542_s27, 2 }
  0x2f   : > { %s8687_s12 = scalar_select %p29_p13, %s8538_s26, %s31_s29  }
  0x30   : > { %s10712_s11 = scalar_select %p8681_p5, 1, 0 }
  0x31   : > { %p40_p3 = por %p39_p0, %p38_p12  ;;  %s258_s13 = sand.u32 1, %s8538_s26  }
  0x32   : > { %s6430_s15 = sshll.u32 %s258_s13, 7  ;;  %s6623_s14 = sshll.u32 %s8542_s27, 11 }
  0x33   : > { %s8694_s20 = scalar_lea.hbm %s10690_s0, %s6623_s14  ;;  %s262_s21 = scalar_lea.vmem [#allocation4], %s6430_s15 }
  0x34   : > { %s269_s22 = sshll.u32 %s262_s21, 4  ;;  %p8698_p2 = pnand %p8156_p10, %p40_p3  ;;  %s8696_s22 = int_to_ptr.vmem [resolvable:$true] %s269_s22 }
  0x35   : > { %s8702_s29 = scalar_lea.sflag [#allocation5], %s258_s13  ;;  %s8446_s16 = scalar_lea.hbm %s8694_s20, 2048 }
  0x36   : > { %p8447_p11 = scmp.ne.s32.totalorder %s8694_s20, %s8446_s16  ;;  %p8448_p7 = pneg %p8698_p2 }
  0x37   : > { %s8451_s15 = scalar_lea.hbm %s10690_s0, 4096  ;;  %p8452_p13 = scmp.lt.s32.totalorder %s8694_s20, %s10690_s0 }
  0x38   : > { %p8449_p9 = pnand %p8448_p7, %p8447_p11  ;;  %p8453_p0 = scmp.lt.s32.totalorder %s8451_s15, %s8446_s16 }
  0x3a   : > { %p8450_p12 = pneg %p8449_p9  ;;  %p8454_p10 = por %p8453_p0, %p8452_p13 }
  0x3c   : > { %p8455_p3 = pnand %p8454_p10, %p8450_p12 }
  0x3e   : > { %8458 = shalt.err (!%p8455_p3)
}
  0x3f   : > { %s8459_s13 = scalar_lea.vmem %s8696_s22, 2048  ;;  %s8548_s17 = smov [#allocation4]  }
  0x40   : > { %p8460_p1 = scmp.ne.s32.totalorder %s8696_s22, %s8459_s13  ;;  %s8464_s1 = sshll.u32 %s8548_s17, 4  ;;  %s8465_s1 = int_to_ptr.vmem [resolvable:$false] %s8464_s1 }
  0x41   : > { %s8466_s14 = scalar_lea.vmem %s8465_s1, 4096  ;;  %p8467_p9 = scmp.lt.s32.totalorder %s8696_s22, %s8465_s1 }
  0x42   : > { %p8462_p6 = pnand %p8460_p1, %p8448_p7  ;;  %p8468_p5 = scmp.lt.s32.totalorder %s8466_s14, %s8459_s13 }
  0x44   : > { %p8463_p11 = pneg %p8462_p6  ;;  %p8469_p4 = por %p8468_p5, %p8467_p9 }
  0x46   : > { %p8470_p8 = pnand %p8469_p4, %p8463_p11 }
  0x48   : > { %8473 = shalt.err (!%p8470_p8)
}
  0x49   : > { %s10714_s16 = smov 4   ;;  %s10715_s18 = smov 64  }
  0x4a   : > { %8149 = dma.hbm_to_vmem [thread:$0]  (!%p8698_p2), %s8694_s20, 2048, %s8696_s22, %s8702_s29, %s10715_s18, %s10715_s18, %s10714_s16  }
  0x4b   : > { %p10716_p1 = scmp.ne.s32.totalorder %s10709_s9, 0 }
  0x4d   : > { %281 = sbr.rel (%p10716_p1) target bundleno = 1143 (0x477), region = 48 }
  0x52   : > { %s8729_s17 = sand.u32 1, %s8534_s25   ;;  %p10717_p4 = scmp.ne.s32.totalorder %s10707_s30, 0 }
  0x53   : > { %s6434_s1 = sshll.u32 %s8729_s17, 7  ;;  %s284_s15 = scalar_lea.sflag [#allocation5], %s8729_s17 }
  0x54   : > { %s8735_s10 = scalar_lea.vmem [#allocation4], %s6434_s1 }
  0x55   : > { %8517 = dma.done.wait (%p10717_p4), %s284_s15, 2048  }
  0x56   : > { %8519 = vsyncadd (%p10717_p4), %s284_s15, 4294965248  ;;  %p10718_p6 = scmp.eq.s32.totalorder %s8614_s28, 0 }
  0x58   : > { %8521 = dma.done.wait (%p10718_p6), [#allocation8], 18432   ;;  %p10719_p8 = pmov %p10718_p6 }
  0x59   : > { %v8549_v0 = vmov 0.0   ;;  %v8199_v1 = vld [vmem:[#allocation7 + $0x78] sm:$0xff]   ;;  %v8201_v3 = vld [vmem:[#allocation7 + $0x70] sm:$0xff]   ;;  %v8203_v5 = vld [vmem:[#allocation7 + $0x68] sm:$0xff]   ;;  %s10502_s14 = scalar_lea.vmem [#allocation10], %s6434_s1  ;;  %s6656_s16 = sshll.u32 %s8614_s28, 11 }
  0x5a   : > { %8523 = vsyncadd (%p10719_p8), [#allocation8], 4294948864  ;;  %327 = vst [vmem:[#allocation2] sm:$0xff] %v8549_v0  ;;  %v8200_v2 = vld [vmem:[#allocation7 + $0x38] sm:$0xff]   ;;  %7263 = vmatprep.subr.bf16.mxu0 %v8199_v1  ;;  %v8202_v4 = vld [vmem:[#allocation7 + $0x30] sm:$0xff]   ;;  %s6333_s18 = sshll.u32 %s10502_s14, 4  ;;  %s10646_s18 = int_to_ptr.vmem [resolvable:$true] %s6333_s18 }
  0x5b   : > { %328 = vst [vmem:[#allocation2 + $0x8] sm:$0xff] %v8549_v0  ;;  %329 = vst [vmem:[#allocation2 + $0x10] sm:$0xff] %v8549_v0  ;;  %7311 = vmatprep.subr.bf16.mxu1 %v8200_v2  ;;  %7264 = vmatpush3.bf16.msra.mxu0 %v8199_v1  ;;  %v8204_v6 = vld [vmem:[#allocation7 + $0x28] sm:$0xff]   ;;  %v8205_v7 = vld [vmem:[#allocation7 + $0x60] sm:$0xff]   ;;  %s6320_s30 = scalar_lea.sflag [#allocation6], %s8729_s17  ;;  %s8474_s9 = scalar_lea.vmem %s10646_s18, 2048 }
  0x5c   : > { %331 = vst [vmem:[#allocation2 + $0x198] sm:$0xff] %v8549_v0  ;;  %332 = vst [vmem:[#allocation2 + $0x1a0] sm:$0xff] %v8549_v0  ;;  %7312 = vmatpush3.bf16.msra.mxu1 %v8200_v2  ;;  %7265 = vmatprep.subr.bf16.mxu0 %v8201_v3  ;;  %v8206_v8 = vld [vmem:[#allocation7 + $0x20] sm:$0xff]   ;;  %v8207_v9 = vld [vmem:[#allocation7 + $0x58] sm:$0xff]   ;;  %p8475_p5 = scmp.ne.s32.totalorder %s10646_s18, %s8474_s9  ;;  %p10928_p2 = scmp.ne.s32.totalorder %s10712_s11, 0 }
  0x5d   : > { %333 = vst [vmem:[#allocation2 + $0x1a8] sm:$0xff] %v8549_v0  ;;  %335 = vst [vmem:[#allocation2 + $0x18] sm:$0x1] %v8549_v0  ;;  %7313 = vmatprep.subr.bf16.mxu1 %v8202_v4  ;;  %v8208_v10 = vld [vmem:[#allocation7 + $0x18] sm:$0xff]   ;;  %v8209_v11 = vld [vmem:[#allocation7 + $0x50] sm:$0xff]   ;;  %s8550_s28 = smov [#allocation10]  }
  0x5e   : > { %336 = vst [vmem:[#allocation2 + $0x30] sm:$0x1] %v8549_v0  ;;  %337 = vst [vmem:[#allocation2 + $0x48] sm:$0x1] %v8549_v0  ;;  %v8210_v15 = vld [vmem:[#allocation7 + $0x10] sm:$0xff]   ;;  %v6658_v18 = vld [vmem:[%s8735_s10] sm:$0xff]   ;;  %p8476_p7 = pnand %p8475_p5, %p10928_p2 }
  0x5f   : > { %338 = vst [vmem:[#allocation2 + $0x60] sm:$0x1] %v8549_v0  ;;  %339 = vst [vmem:[#allocation2 + $0x78] sm:$0x1] %v8549_v0  ;;  %7266 = vmatpush3.bf16.msra.mxu0 %v8201_v3  ;;  %v6659_v19 = vunpack.c.l.bf16 %v6658_v18  ;;  %v6660_v20 = vunpack.c.h.bf16 %v6658_v18  ;;  %v6801_v21 = vld [vmem:[%s8735_s10 + $0x8] sm:$0xff]   ;;  %v6802_v24 = vld [vmem:[%s8735_s10 + $0x10] sm:$0xff]  }
  0x60   : > { %340 = vst [vmem:[#allocation2 + $0x90] sm:$0x1] %v8549_v0  ;;  %341 = vst [vmem:[#allocation2 + $0xa8] sm:$0x1] %v8549_v0  ;;  %7314 = vmatpush3.bf16.msra.mxu1 %v8202_v4  ;;  %7267 = vmatprep.subr.bf16.mxu0 %v8203_v5  ;;  %v6663_v22 = vunpack.c.l.bf16 %v6801_v21  ;;  %v6664_v23 = vunpack.c.h.bf16 %v6801_v21  ;;  %v8211_v25 = vld [vmem:[#allocation7 + $0x48] sm:$0xff]   ;;  %v6667_v26 = vunpack.c.l.bf16 %v6802_v24  ;;  %v6668_v27 = vunpack.c.h.bf16 %v6802_v24  ;;  %v6803_v29 = vld [vmem:[%s8735_s10 + $0x18] sm:$0xff]   ;;  %p8477_p12 = pneg %p8476_p7 }
  0x61   : > { %342 = vst [vmem:[#allocation2 + $0xc0] sm:$0x1] %v8549_v0  ;;  %343 = vst [vmem:[#allocation2 + $0xd8] sm:$0x1] %v8549_v0  ;;  %7315 = vmatprep.subr.bf16.mxu1 %v8204_v6  ;;  %v8212_v28 = vld [vmem:[#allocation7 + $0x8] sm:$0xff]   ;;  %v6804_v30 = vld [vmem:[%s8735_s10 + $0x20] sm:$0xff]   ;;  %v6671_v31 = vunpack.c.l.bf16 %v6803_v29  ;;  %v6672_v32 = vunpack.c.h.bf16 %v6803_v29 }
  0x62   : > { %344 = vst [vmem:[#allocation2 + $0xf0] sm:$0x1] %v8549_v0  ;;  %345 = vst [vmem:[#allocation2 + $0x108] sm:$0x1] %v8549_v0  ;;  %v574_v12 = vld [vmem:[#allocation2 + $0x1] sm:$0xff]  ;;  %v575_v13 = vld [vmem:[#allocation2 + $0x9] sm:$0xff]  ;;  %v6675_v33 = vunpack.c.l.bf16 %v6804_v30  ;;  %v6676_v34 = vunpack.c.h.bf16 %v6804_v30 }
  0x63   : > { %346 = vst [vmem:[#allocation2 + $0x120] sm:$0x1] %v8549_v0  ;;  %347 = vst [vmem:[#allocation2 + $0x138] sm:$0x1] %v8549_v0  ;;  %7268 = vmatpush3.bf16.msra.mxu0 %v8203_v5  ;;  %v606_v16 = vpack.c.bf16 %v575_v13, %v574_v12  ;;  %v6805_v35 = vld [vmem:[%s8735_s10 + $0x28] sm:$0xff]   ;;  %v8213_v36 = vld [vmem:[#allocation7 + $0x40] sm:$0xff]  }
  0x64   : > { %348 = vst [vmem:[#allocation2 + $0x150] sm:$0x1] %v8549_v0  ;;  %349 = vst [vmem:[#allocation2 + $0x168] sm:$0x1] %v8549_v0  ;;  %7316 = vmatpush3.bf16.msra.mxu1 %v8204_v6  ;;  %7269 = vmatprep.subr.bf16.mxu0 %v8205_v7  ;;  %v6679_v37 = vunpack.c.l.bf16 %v6805_v35  ;;  %v6680_v38 = vunpack.c.h.bf16 %v6805_v35  ;;  %v6806_v39 = vld [vmem:[%s8735_s10 + $0x30] sm:$0xff]   ;;  %v8214_v40 = vld [vmem:[#allocation7] sm:$0xff]  }
  0x65   : > { %350 = vst [vmem:[#allocation2 + $0x180] sm:$0x1] %v8549_v0  ;;  %353 = vst [vmem:[#allocation2 + $0x29] sm:$0x7f] %v8549_v0  ;;  %7317 = vmatprep.subr.bf16.mxu1 %v8206_v8  ;;  %7279 = vmatprep.mubr.bf16.mxu0 %v606_v16  ;;  %v6683_v41 = vunpack.c.l.bf16 %v6806_v39  ;;  %v6684_v42 = vunpack.c.h.bf16 %v6806_v39  ;;  %v6807_v43 = vld [vmem:[%s8735_s10 + $0x38] sm:$0xff]   ;;  %v6808_v46 = vld [vmem:[%s8735_s10 + $0x40] sm:$0xff]  }
  0x66   : > { %354 = vst [vmem:[#allocation2 + $0x41] sm:$0x7f] %v8549_v0  ;;  %355 = vst [vmem:[#allocation2 + $0x59] sm:$0x7f] %v8549_v0  ;;  %v6687_v44 = vunpack.c.l.bf16 %v6807_v43  ;;  %v6688_v45 = vunpack.c.h.bf16 %v6807_v43  ;;  %v8216_v47 = vld [vmem:[#allocation7 + $0xb8] sm:$0xff]   ;;  %v6691_v48 = vunpack.c.l.bf16 %v6808_v46  ;;  %v6692_v49 = vunpack.c.h.bf16 %v6808_v46  ;;  %v8840_v52 = vld [vmem:[%s8735_s10] sm:$0xff] }
  0x67   : > { %356 = vst [vmem:[#allocation2 + $0x71] sm:$0x7f] %v8549_v0  ;;  %357 = vst [vmem:[#allocation2 + $0x89] sm:$0x7f] %v8549_v0  ;;  %7270 = vmatpush3.bf16.msra.mxu0 %v8205_v7  ;;  %v8229_v55 = vld [vmem:[#allocation7 + $0xf8] sm:$0xff]   ;;  %v8845_v57 = vld [vmem:[%s8735_s10 + $0x8] sm:$0xff] }
  0x68   : > { %358 = vst [vmem:[#allocation2 + $0xa1] sm:$0x7f] %v8549_v0  ;;  %359 = vst [vmem:[#allocation2 + $0xb9] sm:$0x7f] %v8549_v0  ;;  %7318 = vmatpush3.bf16.msra.mxu1 %v8206_v8  ;;  %7271 = vmatprep.subr.bf16.mxu0 %v8207_v9  ;;  %v8219_v59 = vld [vmem:[#allocation7 + $0xb0] sm:$0xff]   ;;  %v6809_v61 = vld [vmem:[%s8735_s10 + $0x48] sm:$0xff]  }
  0x69   : > { %360 = vst [vmem:[#allocation2 + $0xd1] sm:$0x7f] %v8549_v0  ;;  %361 = vst [vmem:[#allocation2 + $0xe9] sm:$0x7f] %v8549_v0  ;;  %7319 = vmatprep.subr.bf16.mxu1 %v8208_v10  ;;  %v8230_v60 = vld [vmem:[#allocation7 + $0xf0] sm:$0xff]   ;;  %v8222_v63 = vld [vmem:[#allocation7 + $0xa8] sm:$0xff]   ;;  %v6696_v1 = vunpack.c.h.bf16 %v6809_v61 }
  0x6a   : > { %362 = vst [vmem:[#allocation2 + $0x101] sm:$0x7f] %v8549_v0  ;;  %363 = vst [vmem:[#allocation2 + $0x119] sm:$0x7f] %v8549_v0  ;;  %v8855_v2 = vld [vmem:[%s8735_s10 + $0x10] sm:$0xff]  ;;  %v6811_v13 = vld [vmem:[%s8735_s10 + $0x58] sm:$0xff]  }
  0x6b   : > { %364 = vst [vmem:[#allocation2 + $0x131] sm:$0x7f] %v8549_v0  ;;  %365 = vst [vmem:[#allocation2 + $0x149] sm:$0x7f] %v8549_v0  ;;  %7272 = vmatpush3.bf16.msra.mxu0 %v8207_v9  ;;  %v6810_v5 = vld [vmem:[%s8735_s10 + $0x50] sm:$0xff]   ;;  %v8220_v9 = vld [vmem:[%s8735_s10 + $0x18] sm:$0xff]  ;;  %v6704_v16 = vunpack.c.h.bf16 %v6811_v13 }
  0x6c   : > { %366 = vst [vmem:[#allocation2 + $0x161] sm:$0x7f] %v8549_v0  ;;  %367 = vst [vmem:[#allocation2 + $0x179] sm:$0x7f] %v8549_v0  ;;  %7320 = vmatpush3.bf16.msra.mxu1 %v8208_v10  ;;  %7273 = vmatprep.subr.bf16.mxu0 %v8209_v11  ;;  %v6699_v7 = vunpack.c.l.bf16 %v6810_v5  ;;  %v6700_v8 = vunpack.c.h.bf16 %v6810_v5  ;;  %v8235_v18 = vld [vmem:[#allocation7 + $0xe0] sm:$0xff]   ;;  %v8228_v21 = vld [vmem:[#allocation7 + $0x98] sm:$0xff]  }
  0x6d   : > { %368 = vst [vmem:[#allocation2 + $0x191] sm:$0x7f] %v8549_v0  ;;  %370 = vst [vmem:[#allocation3] sm:$0xff] %v8549_v0  ;;  %7321 = vmatprep.subr.bf16.mxu1 %v8210_v15  ;;  %v8238_v43 = vld [vmem:[#allocation7 + $0x88] sm:$0xff]   ;;  %s8478_s20 = sshll.u32 %s8550_s28, 4  ;;  %s8479_s20 = int_to_ptr.vmem [resolvable:$false] %s8478_s20 }
  0x6e   : > { %371 = vst [vmem:[#allocation3 + $0x8] sm:$0xff] %v8549_v0  ;;  %372 = vst [vmem:[#allocation3 + $0x10] sm:$0xff] %v8549_v0  ;;  %s8480_s22 = scalar_lea.vmem %s8479_s20, 4096  ;;  %p8481_p13 = scmp.lt.s32.totalorder %s10646_s18, %s8479_s20 }
  0x6f   : > { %374 = vst [vmem:[#allocation3 + $0x198] sm:$0xff] %v8549_v0  ;;  %375 = vst [vmem:[#allocation3 + $0x1a0] sm:$0xff] %v8549_v0  ;;  %7274 = vmatpush3.bf16.msra.mxu0 %v8209_v11  ;;  %v8234_v11 = vld [vmem:[#allocation7 + $0xe8] sm:$0xff]   ;;  %p8482_p0 = scmp.lt.s32.totalorder %s8480_s22, %s8474_s9 }
  0x70   : > { %376 = vst [vmem:[#allocation3 + $0x1a8] sm:$0xff] %v8549_v0  ;;  %378 = vst [vmem:[#allocation3 + $0x18] sm:$0x1] %v8549_v0  ;;  %7322 = vmatpush3.bf16.msra.mxu1 %v8210_v15  ;;  %7275 = vmatprep.subr.bf16.mxu0 %v8211_v25  ;;  %v6703_v15 = vunpack.c.l.bf16 %v6811_v13 }
  0x71   : > { %379 = vst [vmem:[#allocation3 + $0x30] sm:$0x1] %v8549_v0  ;;  %380 = vst [vmem:[#allocation3 + $0x48] sm:$0x1] %v8549_v0  ;;  %7323 = vmatprep.subr.bf16.mxu1 %v8212_v28  ;;  %p8483_p10 = por %p8482_p0, %p8481_p13 }
  0x72   : > { %381 = vst [vmem:[#allocation3 + $0x60] sm:$0x1] %v8549_v0  ;;  %382 = vst [vmem:[#allocation3 + $0x78] sm:$0x1] %v8549_v0 }
  0x73   : > { %383 = vst [vmem:[#allocation3 + $0x90] sm:$0x1] %v8549_v0  ;;  %384 = vst [vmem:[#allocation3 + $0xa8] sm:$0x1] %v8549_v0  ;;  %7276 = vmatpush3.bf16.msra.mxu0 %v8211_v25  ;;  %p8484_p3 = pnand %p8483_p10, %p8477_p12 }
  0x74   : > { %385 = vst [vmem:[#allocation3 + $0xc0] sm:$0x1] %v8549_v0  ;;  %386 = vst [vmem:[#allocation3 + $0xd8] sm:$0x1] %v8549_v0  ;;  %7324 = vmatpush3.bf16.msra.mxu1 %v8212_v28  ;;  %7277 = vmatprep.subr.bf16.mxu0 %v8213_v36  ;;  %v8239_v28 = vld [vmem:[#allocation7 + $0xd8] sm:$0xff]  }
  0x75   : > { %387 = vst [vmem:[#allocation3 + $0xf0] sm:$0x1] %v8549_v0  ;;  %388 = vst [vmem:[#allocation3 + $0x108] sm:$0x1] %v8549_v0  ;;  %7325 = vmatprep.subr.bf16.mxu1 %v8214_v40 }
  0x76   : > { %389 = vst [vmem:[#allocation3 + $0x120] sm:$0x1] %v8549_v0  ;;  %390 = vst [vmem:[#allocation3 + $0x138] sm:$0x1] %v8549_v0 }
  0x77   : > { %391 = vst [vmem:[#allocation3 + $0x150] sm:$0x1] %v8549_v0  ;;  %392 = vst [vmem:[#allocation3 + $0x168] sm:$0x1] %v8549_v0  ;;  %7278 = vmatpush3.bf16.msra.mxu0 %v8213_v36 }
  0x78   : > { %393 = vst [vmem:[#allocation3 + $0x180] sm:$0x1] %v8549_v0  ;;  %396 = vst [vmem:[#allocation3 + $0x29] sm:$0x7f] %v8549_v0  ;;  %7326 = vmatpush3.bf16.msra.mxu1 %v8214_v40  ;;  %7359 = vmatprep.subr.bf16.mxu0 %v8216_v47 }
  0x79   : > { %397 = vst [vmem:[#allocation3 + $0x41] sm:$0x7f] %v8549_v0  ;;  %398 = vst [vmem:[#allocation3 + $0x59] sm:$0x7f] %v8549_v0  ;;  %7407 = vmatprep.subr.bf16.mxu1 %v8229_v55 }
  0x7a   : > { %399 = vst [vmem:[#allocation3 + $0x71] sm:$0x7f] %v8549_v0  ;;  %400 = vst [vmem:[#allocation3 + $0x89] sm:$0x7f] %v8549_v0  ;;  %7280 = vmatmul.mubr.bf16.vlgmr.msra.gmra.mxu0 %v8840_v52 }
  0x7b   : > { %401 = vst [vmem:[#allocation3 + $0xa1] sm:$0x7f] %v8549_v0  ;;  %402 = vst [vmem:[#allocation3 + $0xb9] sm:$0x7f] %v8549_v0  ;;  %7360 = vmatpush3.bf16.msra.mxu0 %v8216_v47  ;;  %7283 = vmatprep.mubr.bf16.mxu0 %v8845_v57  ;;  %v8890_v47 = vld [vmem:[%s8735_s10 + $0x38] sm:$0xff] }
  0x7c   : > { %403 = vst [vmem:[#allocation3 + $0xd1] sm:$0x7f] %v8549_v0  ;;  %404 = vst [vmem:[#allocation3 + $0xe9] sm:$0x7f] %v8549_v0  ;;  %7361 = vmatprep.subr.bf16.mxu0 %v8219_v59 }
  0x7d   : > { %405 = vst [vmem:[#allocation3 + $0x101] sm:$0x7f] %v8549_v0  ;;  %406 = vst [vmem:[#allocation3 + $0x119] sm:$0x7f] %v8549_v0 }
  0x7e   : > { %407 = vst [vmem:[#allocation3 + $0x131] sm:$0x7f] %v8549_v0  ;;  %408 = vst [vmem:[#allocation3 + $0x149] sm:$0x7f] %v8549_v0 }
  0x7f   : > { %409 = vst [vmem:[#allocation3 + $0x161] sm:$0x7f] %v8549_v0  ;;  %410 = vst [vmem:[#allocation3 + $0x179] sm:$0x7f] %v8549_v0  ;;  %7362 = vmatpush3.bf16.msra.mxu0 %v8219_v59  ;;  %v8898_v59 = vld [vmem:[#allocation7 + $0x138] sm:$0xff]  }
  0x80   : > { %411 = vst [vmem:[#allocation3 + $0x191] sm:$0x7f] %v8549_v0  ;;  %352 = vst [vmem:[#allocation2 + $0x11] sm:$0x7f] %v8549_v0  ;;  %7363 = vmatprep.subr.bf16.mxu0 %v8222_v63 }
  0x81   : > { %334 = vst [vmem:[#allocation2] sm:$0x1] %v8549_v0  ;;  %351 = vst [vmem:[#allocation2 + $0x198] sm:$0x1] %v8549_v0 }
  0x82   : > { %369 = vst [vmem:[#allocation2 + $0x1a9] sm:$0x7f] %v8549_v0  ;;  %377 = vst [vmem:[#allocation3] sm:$0x1] %v8549_v0  ;;  %7284 = vmatmul.mubr.bf16.gmra.mxu0 %v8855_v2 }
  0x83   : > { %394 = vst [vmem:[#allocation3 + $0x198] sm:$0x1] %v8549_v0  ;;  %395 = vst [vmem:[#allocation3 + $0x11] sm:$0x7f] %v8549_v0  ;;  %7287 = vmatprep.mubr.bf16.mxu0 %v8220_v9  ;;  %7364 = vmatpush3.bf16.msra.mxu0 %v8222_v63 }
  0x84   : > { %412 = vst [vmem:[#allocation3 + $0x1a9] sm:$0x7f] %v8549_v0  ;;  %478 = vst [vmem:[#allocation2 + $0x19] sm:$0xff] %v6659_v19 }
  0x85   : > { %479 = vst [vmem:[#allocation2 + $0x21] sm:$0xff] %v6660_v20  ;;  %480 = vst [vmem:[#allocation2 + $0x31] sm:$0xff] %v6663_v22 }
  0x86   : > { %481 = vst [vmem:[#allocation2 + $0x39] sm:$0xff] %v6664_v23  ;;  %482 = vst [vmem:[#allocation2 + $0x49] sm:$0xff] %v6667_v26  ;;  %v6813_v26 = vld [vmem:[%s8735_s10 + $0x68] sm:$0xff]  }
  0x87   : > { %483 = vst [vmem:[#allocation2 + $0x51] sm:$0xff] %v6668_v27  ;;  %484 = vst [vmem:[#allocation2 + $0x61] sm:$0xff] %v6671_v31  ;;  %v8870_v27 = vld [vmem:[%s8735_s10 + $0x20] sm:$0xff]  ;;  %v6711_v29 = vunpack.c.l.bf16 %v6813_v26  ;;  %v6712_v30 = vunpack.c.h.bf16 %v6813_v26  ;;  %v6814_v31 = vld [vmem:[%s8735_s10 + $0x70] sm:$0xff]  }
  0x88   : > { %v510_v14 = vld [vmem:[#allocation2] sm:$0xff]  ;;  %485 = vst [vmem:[#allocation2 + $0x69] sm:$0xff] %v6672_v32  ;;  %486 = vst [vmem:[#allocation2 + $0x79] sm:$0xff] %v6675_v33  ;;  %v8876_v33 = vld [vmem:[%s8735_s10 + $0x28] sm:$0xff]  ;;  %v6716_v35 = vunpack.c.h.bf16 %v6814_v31 }
  0x89   : > { %v542_v17 = vpack.c.bf16 %v8549_v0, %v510_v14  ;;  %487 = vst [vmem:[#allocation2 + $0x81] sm:$0xff] %v6676_v34  ;;  %488 = vst [vmem:[#allocation2 + $0x91] sm:$0xff] %v6679_v37  ;;  %v6695_v0 = vunpack.c.l.bf16 %v6809_v61  ;;  %v8225_v14 = vld [vmem:[#allocation7 + $0xa0] sm:$0xff]   ;;  %v6715_v34 = vunpack.c.l.bf16 %v6814_v31  ;;  %v8233_v37 = vld [vmem:[#allocation7 + $0x90] sm:$0xff]  }
  0x8a   : > { %489 = vst [vmem:[#allocation2 + $0x99] sm:$0xff] %v6680_v38  ;;  %490 = vst [vmem:[#allocation2 + $0xa9] sm:$0xff] %v6683_v41  ;;  %7365 = vmatprep.subr.bf16.mxu0 %v8225_v14  ;;  %7288 = vmatmul.mubr.bf16.gmra.mxu0 %v8870_v27  ;;  %v8240_v38 = vld [vmem:[#allocation7 + $0xd0] sm:$0xff]  }
  0x8b   : > { %7327 = vmatprep.mubr.bf16.mxu1 %v542_v17  ;;  %491 = vst [vmem:[#allocation2 + $0xb1] sm:$0xff] %v6684_v42  ;;  %v512_v50 = vld [vmem:[#allocation2 + $0x18] sm:$0xff]  ;;  %492 = vst [vmem:[#allocation2 + $0xc1] sm:$0xff] %v6687_v44  ;;  %v6812_v17 = vld [vmem:[%s8735_s10 + $0x60] sm:$0xff]   ;;  %7366 = vmatpush3.bf16.msra.mxu0 %v8225_v14 }
  0x8c   : > { %v513_v51 = vld [vmem:[#allocation2 + $0x20] sm:$0xff]  ;;  %493 = vst [vmem:[#allocation2 + $0xc9] sm:$0xff] %v6688_v45  ;;  %v514_v53 = vld [vmem:[#allocation2 + $0x30] sm:$0xff]  ;;  %494 = vst [vmem:[#allocation2 + $0xd9] sm:$0xff] %v6691_v48  ;;  %v6707_v19 = vunpack.c.l.bf16 %v6812_v17  ;;  %v6708_v20 = vunpack.c.h.bf16 %v6812_v17  ;;  %7367 = vmatprep.subr.bf16.mxu0 %v8228_v21  ;;  %7291 = vmatprep.mubr.bf16.mxu0 %v8876_v33 }
  0x8d   : > { %v515_v54 = vld [vmem:[#allocation2 + $0x38] sm:$0xff]  ;;  %495 = vst [vmem:[#allocation2 + $0xe1] sm:$0xff] %v6692_v49  ;;  %v8842_v56 = vpack.c.bf16 %v513_v51, %v512_v50  ;;  %v516_v62 = vld [vmem:[#allocation2 + $0x48] sm:$0xff]  ;;  %496 = vst [vmem:[#allocation2 + $0xf1] sm:$0xff] %v6695_v0 }
  0x8e   : > { %v8847_v58 = vpack.c.bf16 %v515_v54, %v514_v53  ;;  %v517_v3 = vld [vmem:[#allocation2 + $0x50] sm:$0xff]  ;;  %v518_v4 = vld [vmem:[#allocation2 + $0x60] sm:$0xff]  ;;  %497 = vst [vmem:[#allocation2 + $0xf9] sm:$0xff] %v6696_v1  ;;  %498 = vst [vmem:[#allocation2 + $0x109] sm:$0xff] %v6699_v7 }
  0x8f   : > { %7328 = vmatmul.mubr.bf16.vlgmr.msra.gmra.mxu1 %v8842_v56  ;;  %v519_v6 = vld [vmem:[#allocation2 + $0x68] sm:$0xff]  ;;  %v8859_v10 = vpack.c.bf16 %v517_v3, %v516_v62  ;;  %499 = vst [vmem:[#allocation2 + $0x111] sm:$0xff] %v6700_v8  ;;  %500 = vst [vmem:[#allocation2 + $0x121] sm:$0xff] %v6703_v15  ;;  %v520_v22 = vld [vmem:[#allocation2 + $0x78] sm:$0xff]  ;;  %7368 = vmatpush3.bf16.msra.mxu0 %v8228_v21 }
  0x90   : > { %7331 = vmatprep.mubr.bf16.mxu1 %v8847_v58  ;;  %7408 = vmatpush3.bf16.msra.mxu1 %v8229_v55  ;;  %v8861_v12 = vpack.c.bf16 %v519_v6, %v518_v4  ;;  %501 = vst [vmem:[#allocation2 + $0x129] sm:$0xff] %v6704_v16  ;;  %v521_v23 = vld [vmem:[#allocation2 + $0x80] sm:$0xff]  ;;  %502 = vst [vmem:[#allocation2 + $0x139] sm:$0xff] %v6707_v19  ;;  %v522_v24 = vld [vmem:[#allocation2 + $0x90] sm:$0xff] }
  0x91   : > { %7409 = vmatprep.subr.bf16.mxu1 %v8230_v60  ;;  %503 = vst [vmem:[#allocation2 + $0x141] sm:$0xff] %v6708_v20  ;;  %v523_v25 = vld [vmem:[#allocation2 + $0x98] sm:$0xff]  ;;  %v8873_v32 = vpack.c.bf16 %v521_v23, %v520_v22  ;;  %504 = vst [vmem:[#allocation2 + $0x151] sm:$0xff] %v6711_v29  ;;  %v524_v39 = vld [vmem:[#allocation2 + $0xa8] sm:$0xff]  ;;  %7369 = vmatprep.subr.bf16.mxu0 %v8233_v37 }
  0x92   : > { %v8878_v36 = vpack.c.bf16 %v523_v25, %v522_v24  ;;  %505 = vst [vmem:[#allocation2 + $0x159] sm:$0xff] %v6712_v30  ;;  %506 = vst [vmem:[#allocation2 + $0x169] sm:$0xff] %v6715_v34  ;;  %v525_v40 = vld [vmem:[#allocation2 + $0xb0] sm:$0xff]  ;;  %v526_v41 = vld [vmem:[#allocation2 + $0xc0] sm:$0xff] }
  0x93   : > { %507 = vst [vmem:[#allocation2 + $0x171] sm:$0xff] %v6716_v35  ;;  %v527_v42 = vld [vmem:[#allocation2 + $0xc8] sm:$0xff]  ;;  %v8885_v44 = vld [vmem:[%s8735_s10 + $0x30] sm:$0xff]  ;;  %v8887_v46 = vpack.c.bf16 %v525_v40, %v524_v39  ;;  %7370 = vmatpush3.bf16.msra.mxu0 %v8233_v37  ;;  %v8243_v49 = vld [vmem:[#allocation7 + $0x80] sm:$0xff]  }
  0x94   : > { %7410 = vmatpush3.bf16.msra.mxu1 %v8230_v60  ;;  %v8244_v45 = vld [vmem:[#allocation7 + $0xc8] sm:$0xff]   ;;  %v8892_v48 = vpack.c.bf16 %v527_v42, %v526_v41  ;;  %7371 = vmatprep.subr.bf16.mxu0 %v8238_v43  ;;  %v8245_v50 = vld [vmem:[#allocation7 + $0xc0] sm:$0xff]   ;;  %v528_v51 = vld [vmem:[#allocation2 + $0xd8] sm:$0xff] }
  0x95   : > { %7411 = vmatprep.subr.bf16.mxu1 %v8234_v11  ;;  %7292 = vmatmul.mubr.bf16.gmra.mxu0 %v8885_v44  ;;  %v529_v53 = vld [vmem:[#allocation2 + $0xe0] sm:$0xff]  ;;  %v530_v54 = vld [vmem:[#allocation2 + $0xf0] sm:$0xff]  ;;  %v531_v55 = vld [vmem:[#allocation2 + $0xf8] sm:$0xff] }
  0x96   : > { %7295 = vmatprep.mubr.bf16.mxu0 %v8890_v47  ;;  %v8901_v60 = vld [vmem:[%s8735_s10 + $0x40] sm:$0xff]  ;;  %v8903_v61 = vpack.c.bf16 %v529_v53, %v528_v51  ;;  %v8906_v62 = vld [vmem:[%s8735_s10 + $0x48] sm:$0xff]  ;;  %v8908_v63 = vpack.c.bf16 %v531_v55, %v530_v54  ;;  %v8911_v0 = vld [vmem:[#allocation7 + $0x178] sm:$0xff]  }
  0x97   : > { %7332 = vmatmul.mubr.bf16.gmra.mxu1 %v8859_v10  ;;  %7372 = vmatpush3.bf16.msra.mxu0 %v8238_v43  ;;  %v532_v1 = vld [vmem:[#allocation2 + $0x108] sm:$0xff]  ;;  %v533_v3 = vld [vmem:[#allocation2 + $0x110] sm:$0xff]  ;;  %v534_v4 = vld [vmem:[#allocation2 + $0x120] sm:$0xff] }
  0x98   : > { %7335 = vmatprep.mubr.bf16.mxu1 %v8861_v12  ;;  %7412 = vmatpush3.bf16.msra.mxu1 %v8234_v11  ;;  %v535_v5 = vld [vmem:[#allocation2 + $0x128] sm:$0xff]  ;;  %v8919_v6 = vld [vmem:[%s8735_s10 + $0x50] sm:$0xff]  ;;  %v8921_v7 = vpack.c.bf16 %v533_v3, %v532_v1  ;;  %v8924_v8 = vld [vmem:[%s8735_s10 + $0x58] sm:$0xff] }
  0x99   : > { %7413 = vmatprep.subr.bf16.mxu1 %v8235_v18  ;;  %7373 = vmatprep.subr.bf16.mxu0 %v8243_v49  ;;  %v8926_v9 = vpack.c.bf16 %v535_v5, %v534_v4  ;;  %v536_v11 = vld [vmem:[#allocation2 + $0x138] sm:$0xff]  ;;  %v537_v13 = vld [vmem:[#allocation2 + $0x140] sm:$0xff]  ;;  %v538_v14 = vld [vmem:[#allocation2 + $0x150] sm:$0xff] }
  0x9a   : > { %v539_v15 = vld [vmem:[#allocation2 + $0x158] sm:$0xff]  ;;  %v8934_v17 = vld [vmem:[%s8735_s10 + $0x60] sm:$0xff]  ;;  %v8936_v20 = vpack.c.bf16 %v537_v13, %v536_v11  ;;  %v8939_v21 = vld [vmem:[%s8735_s10 + $0x68] sm:$0xff] }
  0x9b   : > { %7374 = vmatpush3.bf16.msra.mxu0 %v8243_v49  ;;  %v6815_v16 = vld [vmem:[%s8735_s10 + $0x78] sm:$0xff]   ;;  %v8941_v22 = vpack.c.bf16 %v539_v15, %v538_v14  ;;  %v1056_v23 = vld [vmem:[#allocation2 + $0x2] sm:$0xff]  ;;  %v1057_v24 = vld [vmem:[#allocation2 + $0xa] sm:$0xff] }
  0x9c   : > { %7414 = vmatpush3.bf16.msra.mxu1 %v8235_v18  ;;  %7455 = vmatprep.subr.bf16.mxu0 %v8898_v59  ;;  %v6719_v18 = vunpack.c.l.bf16 %v6815_v16  ;;  %v6720_v19 = vunpack.c.h.bf16 %v6815_v16  ;;  %v540_v25 = vld [vmem:[#allocation2 + $0x168] sm:$0xff]  ;;  %v541_v26 = vld [vmem:[#allocation2 + $0x170] sm:$0xff]  ;;  %v1088_v30 = vpack.c.bf16 %v1057_v24, %v1056_v23  ;;  %v1058_v31 = vld [vmem:[#allocation2 + $0x1a] sm:$0xff] }
  0x9d   : > { %7415 = vmatprep.subr.bf16.mxu1 %v8239_v28  ;;  %7296 = vmatmul.mubr.bf16.gmra.mxu0 %v8901_v60  ;;  %v8950_v29 = vpack.c.bf16 %v541_v26, %v540_v25  ;;  %v1059_v34 = vld [vmem:[#allocation2 + $0x22] sm:$0xff]  ;;  %v1060_v35 = vld [vmem:[#allocation2 + $0x32] sm:$0xff]  ;;  %v1061_v37 = vld [vmem:[#allocation2 + $0x3a] sm:$0xff] }
  0x9e   : > { %7299 = vmatprep.mubr.bf16.mxu0 %v8906_v62  ;;  %508 = vst [vmem:[#allocation2 + $0x181] sm:$0xff] %v6719_v18  ;;  %509 = vst [vmem:[#allocation2 + $0x189] sm:$0xff] %v6720_v19  ;;  %v8957_v39 = vpack.c.bf16 %v1061_v37, %v1060_v35  ;;  %v8247_v40 = vld [vmem:[#allocation7 + $0x130] sm:$0xff]   ;;  %v8248_v49 = vld [vmem:[#allocation7 + $0x128] sm:$0xff]  }
  0x9f   : > { %7336 = vmatmul.mubr.bf16.gmra.mxu1 %v8873_v32  ;;  %v1062_v41 = vld [vmem:[#allocation2 + $0x4a] sm:$0xff]  ;;  %v1063_v43 = vld [vmem:[#allocation2 + $0x52] sm:$0xff]  ;;  %v1067_v54 = vld [vmem:[#allocation2 + $0x82] sm:$0xff] }
  0xa0   : > { %7339 = vmatprep.mubr.bf16.mxu1 %v8878_v36  ;;  %7416 = vmatpush3.bf16.msra.mxu1 %v8239_v28  ;;  %v8948_v28 = vld [vmem:[%s8735_s10 + $0x70] sm:$0xff]  ;;  %v8965_v51 = vpack.c.bf16 %v1063_v43, %v1062_v41  ;;  %v8249_v55 = vld [vmem:[#allocation7 + $0x120] sm:$0xff]   ;;  %v8257_v3 = vld [vmem:[#allocation7 + $0x158] sm:$0xff]  }
  0xa1   : > { %7417 = vmatprep.subr.bf16.mxu1 %v8240_v38  ;;  %v8252_v42 = vld [vmem:[#allocation7 + $0x170] sm:$0xff]   ;;  %v1069_v1 = vld [vmem:[#allocation2 + $0x9a] sm:$0xff]  ;;  %v8256_v16 = vld [vmem:[#allocation7 + $0x108] sm:$0xff]  }
  0xa2   : > { %v1070_v11 = vld [vmem:[#allocation2 + $0xaa] sm:$0xff]  ;;  %v1071_v13 = vld [vmem:[#allocation2 + $0xb2] sm:$0xff]  ;;  %v1074_v24 = vld [vmem:[#allocation2 + $0xda] sm:$0xff] }
  0xa3   : > { %v8253_v14 = vld [vmem:[#allocation7 + $0x110] sm:$0xff]   ;;  %v8260_v18 = vld [vmem:[#allocation7 + $0x148] sm:$0xff]   ;;  %v8981_v19 = vpack.c.bf16 %v1071_v13, %v1070_v11 }
  0xa4   : > { %7418 = vmatpush3.bf16.msra.mxu1 %v8240_v38  ;;  %v8955_v38 = vpack.c.bf16 %v1059_v34, %v1058_v31  ;;  %v1073_v15 = vld [vmem:[#allocation2 + $0xca] sm:$0xff]  ;;  %v1075_v25 = vld [vmem:[#allocation2 + $0xe2] sm:$0xff]  ;;  %v1076_v26 = vld [vmem:[#allocation2 + $0xf2] sm:$0xff] }
  0xa5   : > { %7419 = vmatprep.subr.bf16.mxu1 %v8244_v45  ;;  %7300 = vmatmul.mubr.bf16.gmra.mxu0 %v8919_v6  ;;  %v8262_v31 = vld [vmem:[#allocation7 + $0x1b8] sm:$0xff]   ;;  %v8989_v35 = vpack.c.bf16 %v1075_v25, %v1074_v24  ;;  %v1080_v41 = vld [vmem:[#allocation2 + $0x122] sm:$0xff]  ;;  %v8280_v25 = vld [vmem:[#allocation7 + $0x230] sm:$0xff]  }
  0xa6   : > { %7303 = vmatprep.mubr.bf16.mxu0 %v8924_v8  ;;  %v8267_v34 = vld [vmem:[#allocation7 + $0x1f8] sm:$0xff]  }
  0xa7   : > { %7340 = vmatmul.mubr.bf16.gmra.mxu1 %v8887_v46 }
  0xa8   : > { %7343 = vmatprep.mubr.bf16.mxu1 %v8892_v48  ;;  %7420 = vmatpush3.bf16.msra.mxu1 %v8244_v45  ;;  %v1065_v45 = vld [vmem:[#allocation2 + $0x6a] sm:$0xff] }
  0xa9   : > { %7421 = vmatprep.subr.bf16.mxu1 %v8245_v50 }
  0xac   : > { %7422 = vmatpush3.bf16.msra.mxu1 %v8245_v50  ;;  %v8254_v50 = vld [vmem:[#allocation7 + $0x168] sm:$0xff]  }
  0xad   : > { %7503 = vmatprep.subr.bf16.mxu1 %v8911_v0  ;;  %7304 = vmatmul.mubr.bf16.gmra.mxu0 %v8934_v17 }
  0xae   : > { %7307 = vmatprep.mubr.bf16.mxu0 %v8939_v21 }
  0xaf   : > { %7344 = vmatmul.mubr.bf16.gmra.mxu1 %v8903_v61 }
  0xb0   : > { %7347 = vmatprep.mubr.bf16.mxu1 %v8908_v63 }
  0xb5   : > { %7308 = vmatmul.mubr.bf16.gmra.mxu0 %v8948_v28 }
  0xb6   : > { %7375 = vmatprep.mubr.bf16.mxu0 %v1088_v30  ;;  %v1077_v30 = vld [vmem:[#allocation2 + $0xfa] sm:$0xff] }
  0xb7   : > { %7348 = vmatmul.mubr.bf16.gmra.mxu1 %v8921_v7  ;;  %v8991_v37 = vpack.c.bf16 %v1077_v30, %v1076_v26  ;;  %v2283_v30 = vld [vmem:[#allocation2 + $0x78] sm:$0xff] }
  0xb8   : > { %7351 = vmatprep.mubr.bf16.mxu1 %v8926_v9 }
  0xbd   : > { %7376 = vmatmul.mubr.bf16.vlgmr.msra.gmra.mxu0 %v8955_v38 }
  0xbe   : > { %7456 = vmatpush3.bf16.msra.mxu0 %v8898_v59  ;;  %7379 = vmatprep.mubr.bf16.mxu0 %v8957_v39  ;;  %v1068_v59 = vld [vmem:[#allocation2 + $0x92] sm:$0xff] }
  0xbf   : > { %7352 = vmatmul.mubr.bf16.gmra.mxu1 %v8936_v20  ;;  %7457 = vmatprep.subr.bf16.mxu0 %v8247_v40  ;;  %v8975_v5 = vpack.c.bf16 %v1069_v1, %v1068_v59  ;;  %v8263_v1 = vld [vmem:[#allocation7 + $0x1b0] sm:$0xff]  }
  0xc0   : > { %7355 = vmatprep.mubr.bf16.mxu1 %v8941_v22 }
  0xc2   : > { %7458 = vmatpush3.bf16.msra.mxu0 %v8247_v40  ;;  %v1078_v40 = vld [vmem:[#allocation2 + $0x10a] sm:$0xff] }
  0xc3   : > { %7459 = vmatprep.subr.bf16.mxu0 %v8248_v49 }
  0xc5   : > { %7380 = vmatmul.mubr.bf16.gmra.mxu0 %v8965_v51 }
  0xc6   : > { %7460 = vmatpush3.bf16.msra.mxu0 %v8248_v49  ;;  %v1084_v49 = vld [vmem:[#allocation2 + $0x152] sm:$0xff] }
  0xc7   : > { %7356 = vmatmul.mubr.bf16.gmra.mxu1 %v8950_v29  ;;  %7461 = vmatprep.subr.bf16.mxu0 %v8249_v55 }
  0xc8   : > { %7423 = vmatprep.mubr.bf16.mxu1 %v8842_v56  ;;  %v1064_v56 = vld [vmem:[#allocation2 + $0x62] sm:$0xff] }
  0xc9   : > { %v8967_v53 = vpack.c.bf16 %v1065_v45, %v1064_v56  ;;  %v1082_v56 = vld [vmem:[#allocation2 + $0x13a] sm:$0xff]  ;;  %v1083_v45 = vld [vmem:[#allocation2 + $0x142] sm:$0xff] }
  0xca   : > { %7462 = vmatpush3.bf16.msra.mxu0 %v8249_v55  ;;  %v1391_v55 = vld [vmem:[#allocation2 + $0x180] sm:$0xff] }
  0xcb   : > { %7383 = vmatprep.mubr.bf16.mxu0 %v8967_v53 }
  0xcf   : > { %7424 = vmatmul.mubr.bf16.vlgmr.msra.gmra.mxu1 %v8847_v58  ;;  %v1066_v58 = vld [vmem:[#allocation2 + $0x7a] sm:$0xff] }
  0xd0   : > { %7427 = vmatprep.mubr.bf16.mxu1 %v8859_v10  ;;  %7504 = vmatpush3.bf16.msra.mxu1 %v8911_v0  ;;  %v8255_v10 = vld [vmem:[#allocation7 + $0x160] sm:$0xff]   ;;  %v8250_v0 = vld [vmem:[#allocation7 + $0x118] sm:$0xff]   ;;  %v8973_v4 = vpack.c.bf16 %v1067_v54, %v1066_v58  ;;  %v1086_v58 = vld [vmem:[#allocation2 + $0x16a] sm:$0xff] }
  0xd1   : > { %7505 = vmatprep.subr.bf16.mxu1 %v8252_v42  ;;  %7463 = vmatprep.subr.bf16.mxu0 %v8250_v0  ;;  %v1087_v54 = vld [vmem:[#allocation2 + $0x172] sm:$0xff] }
  0xd2   : > { %7384 = vmatmul.mubr.bf16.gmra.mxu0 %v8973_v4  ;;  %v9013_v59 = vpack.c.bf16 %v1087_v54, %v1086_v58 }
  0xd3   : > { %7387 = vmatprep.mubr.bf16.mxu0 %v8975_v5  ;;  %7464 = vmatpush3.bf16.msra.mxu0 %v8250_v0  ;;  %v8359_v0 = vld [vmem:[%s8735_s10 + $0x18] sm:$0xff] }
  0xd4   : > { %7506 = vmatpush3.bf16.msra.mxu1 %v8252_v42  ;;  %7465 = vmatprep.subr.bf16.mxu0 %v8253_v14 }
  0xd5   : > { %7507 = vmatprep.subr.bf16.mxu1 %v8254_v50 }
  0xd7   : > { %7428 = vmatmul.mubr.bf16.gmra.mxu1 %v8861_v12  ;;  %v1072_v12 = vld [vmem:[#allocation2 + $0xc2] sm:$0xff]  ;;  %7466 = vmatpush3.bf16.msra.mxu0 %v8253_v14 }
  0xd8   : > { %7431 = vmatprep.mubr.bf16.mxu1 %v8873_v32  ;;  %7508 = vmatpush3.bf16.msra.mxu1 %v8254_v50  ;;  %v8258_v32 = vld [vmem:[#allocation7 + $0x150] sm:$0xff]   ;;  %v8983_v23 = vpack.c.bf16 %v1073_v15, %v1072_v12  ;;  %v9005_v50 = vpack.c.bf16 %v1083_v45, %v1082_v56  ;;  %v2281_v15 = vld [vmem:[#allocation2 + $0x60] sm:$0xff] }
  0xd9   : > { %7509 = vmatprep.subr.bf16.mxu1 %v8255_v10  ;;  %7467 = vmatprep.subr.bf16.mxu0 %v8256_v16  ;;  %v2584_v14 = vld [vmem:[#allocation2 + $0x49] sm:$0xff]  ;;  %v2585_v12 = vld [vmem:[#allocation2 + $0x51] sm:$0xff]  ;;  %v2591_v56 = vld [vmem:[#allocation2 + $0x99] sm:$0xff] }
  0xda   : > { %7388 = vmatmul.mubr.bf16.gmra.mxu0 %v8981_v19 }
  0xdb   : > { %7391 = vmatprep.mubr.bf16.mxu0 %v8983_v23  ;;  %7468 = vmatpush3.bf16.msra.mxu0 %v8256_v16 }
  0xdc   : > { %7510 = vmatpush3.bf16.msra.mxu1 %v8255_v10  ;;  %v8268_v10 = vld [vmem:[#allocation7 + $0x1f0] sm:$0xff]  }
  0xdd   : > { %7511 = vmatprep.subr.bf16.mxu1 %v8257_v3 }
  0xdf   : > { %7432 = vmatmul.mubr.bf16.gmra.mxu1 %v8878_v36  ;;  %v8259_v36 = vld [vmem:[#allocation7 + $0x100] sm:$0xff]  }
  0xe0   : > { %7435 = vmatprep.mubr.bf16.mxu1 %v8887_v46  ;;  %7512 = vmatpush3.bf16.msra.mxu1 %v8257_v3  ;;  %v8261_v46 = vld [vmem:[#allocation7 + $0x140] sm:$0xff]  }
  0xe1   : > { %7513 = vmatprep.subr.bf16.mxu1 %v8258_v32  ;;  %7469 = vmatprep.subr.bf16.mxu0 %v8259_v36  ;;  %v8276_v3 = vld [vmem:[#allocation7 + $0x180] sm:$0xff]  }
  0xe2   : > { %7470 = vmatpush3.bf16.msra.mxu0 %v8259_v36 }
  0xe3   : > { %7551 = vmatprep.subr.bf16.mxu0 %v8262_v31  ;;  %7392 = vmatmul.mubr.bf16.gmra.mxu0 %v8989_v35 }
  0xe4   : > { %7514 = vmatpush3.bf16.msra.mxu1 %v8258_v32  ;;  %7395 = vmatprep.mubr.bf16.mxu0 %v8991_v37  ;;  %v2282_v32 = vld [vmem:[#allocation2 + $0x68] sm:$0xff] }
  0xe5   : > { %7515 = vmatprep.subr.bf16.mxu1 %v8260_v18  ;;  %v2311_v24 = vpack.c.bf16 %v2282_v32, %v2281_v15 }
  0xe7   : > { %7436 = vmatmul.mubr.bf16.gmra.mxu1 %v8892_v48  ;;  %v1079_v48 = vld [vmem:[#allocation2 + $0x112] sm:$0xff] }
  0xe8   : > { %7439 = vmatprep.mubr.bf16.mxu1 %v8903_v61  ;;  %7516 = vmatpush3.bf16.msra.mxu1 %v8260_v18  ;;  %v1081_v61 = vld [vmem:[#allocation2 + $0x12a] sm:$0xff]  ;;  %v8997_v42 = vpack.c.bf16 %v1079_v48, %v1078_v40  ;;  %v2586_v18 = vld [vmem:[#allocation2 + $0x61] sm:$0xff] }
  0xe9   : > { %7517 = vmatprep.subr.bf16.mxu1 %v8261_v46  ;;  %v8999_v43 = vpack.c.bf16 %v1081_v61, %v1080_v41  ;;  %v2285_v48 = vld [vmem:[#allocation2 + $0x90] sm:$0xff]  ;;  %v2286_v41 = vld [vmem:[#allocation2 + $0x98] sm:$0xff]  ;;  %v8281_v61 = vld [vmem:[#allocation7 + $0x228] sm:$0xff]  }
  0xea   : > { %v2313_v58 = vpack.c.bf16 %v2286_v41, %v2285_v48 }
  0xeb   : > { %7396 = vmatmul.mubr.bf16.gmra.mxu0 %v8997_v42 }
  0xec   : > { %7518 = vmatpush3.bf16.msra.mxu1 %v8261_v46  ;;  %7399 = vmatprep.mubr.bf16.mxu0 %v8999_v43 }
  0xed   : > { %7599 = vmatprep.subr.bf16.mxu1 %v8267_v34 }
  0xef   : > { %7440 = vmatmul.mubr.bf16.gmra.mxu1 %v8908_v63  ;;  %v1085_v63 = vld [vmem:[#allocation2 + $0x15a] sm:$0xff] }
  0xf0   : > { %7443 = vmatprep.mubr.bf16.mxu1 %v8921_v7  ;;  %v9007_v7 = vpack.c.bf16 %v1085_v63, %v1084_v49 }
  0xf3   : > { %7400 = vmatmul.mubr.bf16.gmra.mxu0 %v9005_v50 }
  0xf4   : > { %7403 = vmatprep.mubr.bf16.mxu0 %v9007_v7 }
  0xf7   : > { %7444 = vmatmul.mubr.bf16.gmra.mxu1 %v8926_v9  ;;  %v1392_v9 = vld [vmem:[#allocation2 + $0x188] sm:$0xff] }
  0xf8   : > { %7447 = vmatprep.mubr.bf16.mxu1 %v8936_v20  ;;  %v9015_v20 = vpack.c.bf16 %v1392_v9, %v1391_v55 }
  0xfb   : > { %7404 = vmatmul.mubr.bf16.gmra.mxu0 %v9013_v59 }
  0xfc   : > { %7471 = vmatprep.mubr.bf16.mxu0 %v8840_v52  ;;  %v8265_v52 = vld [vmem:[#allocation7 + $0x1a0] sm:$0xff]  }
  0xff   : > { %7448 = vmatmul.mubr.bf16.gmra.mxu1 %v8941_v22  ;;  %v8264_v22 = vld [vmem:[#allocation7 + $0x1a8] sm:$0xff]  }
 0x100   : > { %7451 = vmatprep.mubr.bf16.mxu1 %v8950_v29  ;;  %v8270_v29 = vld [vmem:[#allocation7 + $0x1e8] sm:$0xff]  }
 0x103   : > { %7472 = vmatmul.mubr.bf16.vlgmr.msra.gmra.mxu0 %v8845_v57  ;;  %v8266_v57 = vld [vmem:[#allocation7 + $0x198] sm:$0xff]  }
 0x104   : > { %7552 = vmatpush3.bf16.msra.mxu0 %v8262_v31  ;;  %7475 = vmatprep.mubr.bf16.mxu0 %v8855_v2  ;;  %v8273_v2 = vld [vmem:[#allocation7 + $0x1d8] sm:$0xff]   ;;  %v2284_v31 = vld [vmem:[#allocation2 + $0x80] sm:$0xff] }
 0x105   : > { %7553 = vmatprep.subr.bf16.mxu0 %v8263_v1  ;;  %v2312_v63 = vpack.c.bf16 %v2284_v31, %v2283_v30  ;;  %v2599_v31 = vld [vmem:[#allocation2 + $0xf9] sm:$0xff] }
 0x107   : > { %7452 = vmatmul.mubr.bf16.gmra.mxu1 %v9015_v20 }
 0x108   : > { %7519 = vmatprep.mubr.bf16.mxu1 %v8955_v38  ;;  %7554 = vmatpush3.bf16.msra.mxu0 %v8263_v1  ;;  %v8271_v38 = vld [vmem:[#allocation7 + $0x1e0] sm:$0xff]  }
 0x109   : > { %7555 = vmatprep.subr.bf16.mxu0 %v8264_v22  ;;  %v8282_v1 = vld [vmem:[#allocation7 + $0x220] sm:$0xff]  }
 0x10b   : > { %7476 = vmatmul.mubr.bf16.gmra.mxu0 %v8359_v0  ;;  %v2592_v0 = vld [vmem:[#allocation2 + $0xa9] sm:$0xff] }
 0x10c   : > { %7479 = vmatprep.mubr.bf16.mxu0 %v8870_v27  ;;  %7556 = vmatpush3.bf16.msra.mxu0 %v8264_v22  ;;  %v8272_v27 = vld [vmem:[#allocation7 + $0x188] sm:$0xff]  }
 0x10d   : > { %7557 = vmatprep.subr.bf16.mxu0 %v8265_v52 }
 0x10f   : > { %7520 = vmatmul.mubr.bf16.vlgmr.msra.gmra.mxu1 %v8957_v39  ;;  %v8269_v39 = vld [vmem:[#allocation7 + $0x190] sm:$0xff]  }
 0x110   : > { %7523 = vmatprep.mubr.bf16.mxu1 %v8965_v51  ;;  %7600 = vmatpush3.bf16.msra.mxu1 %v8267_v34  ;;  %v8274_v51 = vld [vmem:[#allocation7 + $0x1d0] sm:$0xff]   ;;  %v2588_v34 = vld [vmem:[#allocation2 + $0x79] sm:$0xff] }
 0x111   : > { %7601 = vmatprep.subr.bf16.mxu1 %v8268_v10  ;;  %7558 = vmatpush3.bf16.msra.mxu0 %v8265_v52  ;;  %v2287_v52 = vld [vmem:[#allocation2 + $0xa8] sm:$0xff] }
 0x112   : > { %7559 = vmatprep.subr.bf16.mxu0 %v8266_v57 }
 0x113   : > { %7480 = vmatmul.mubr.bf16.gmra.mxu0 %v8876_v33  ;;  %v8278_v33 = vld [vmem:[#allocation7 + $0x1c0] sm:$0xff]  }
 0x114   : > { %7602 = vmatpush3.bf16.msra.mxu1 %v8268_v10  ;;  %7483 = vmatprep.mubr.bf16.mxu0 %v8885_v44  ;;  %v8279_v44 = vld [vmem:[#allocation7 + $0x238] sm:$0xff]  }
 0x115   : > { %7603 = vmatprep.subr.bf16.mxu1 %v8270_v29  ;;  %7560 = vmatpush3.bf16.msra.mxu0 %v8266_v57 }
 0x116   : > { %7561 = vmatprep.subr.bf16.mxu0 %v8269_v39 }
 0x117   : > { %7524 = vmatmul.mubr.bf16.gmra.mxu1 %v8967_v53  ;;  %v8277_v53 = vld [vmem:[#allocation7 + $0x1c8] sm:$0xff]  }
 0x118   : > { %7527 = vmatprep.mubr.bf16.mxu1 %v8973_v4  ;;  %7604 = vmatpush3.bf16.msra.mxu1 %v8270_v29  ;;  %v2582_v4 = vld [vmem:[#allocation2 + $0x31] sm:$0xff] }
 0x119   : > { %7605 = vmatprep.subr.bf16.mxu1 %v8271_v38  ;;  %7562 = vmatpush3.bf16.msra.mxu0 %v8269_v39  ;;  %v2593_v39 = vld [vmem:[#allocation2 + $0xb1] sm:$0xff] }
 0x11a   : > { %7563 = vmatprep.subr.bf16.mxu0 %v8272_v27 }
 0x11b   : > { %7484 = vmatmul.mubr.bf16.gmra.mxu0 %v8890_v47  ;;  %v2001_v47 = vld [vmem:[#allocation2 + $0x182] sm:$0xff] }
 0x11c   : > { %7606 = vmatpush3.bf16.msra.mxu1 %v8271_v38  ;;  %7487 = vmatprep.mubr.bf16.mxu0 %v8901_v60  ;;  %v2002_v60 = vld [vmem:[#allocation2 + $0x18a] sm:$0xff] }
 0x11d   : > { %7607 = vmatprep.subr.bf16.mxu1 %v8273_v2  ;;  %7564 = vmatpush3.bf16.msra.mxu0 %v8272_v27  ;;  %v9052_v11 = vpack.c.bf16 %v2002_v60, %v2001_v47  ;;  %v2288_v38 = vld [vmem:[#allocation2 + $0xb0] sm:$0xff]  ;;  %v2290_v27 = vld [vmem:[#allocation2 + $0xc8] sm:$0xff] }
 0x11e   : > { %7565 = vmatprep.subr.bf16.mxu0 %v8276_v3 }
 0x11f   : > { %7528 = vmatmul.mubr.bf16.gmra.mxu1 %v8975_v5  ;;  %v9050_v5 = vld [vmem:[%s8735_s10 + $0x78] sm:$0xff]  ;;  %s10644_s10 = scalar_lea.hbm %s10697_s7, %s6656_s16 }
 0x120   : > { %7531 = vmatprep.mubr.bf16.mxu1 %v8981_v19  ;;  %7608 = vmatpush3.bf16.msra.mxu1 %v8273_v2  ;;  %v2587_v19 = vld [vmem:[#allocation2 + $0x69] sm:$0xff] }
 0x121   : > { %7609 = vmatprep.subr.bf16.mxu1 %v8274_v51  ;;  %7566 = vmatpush3.bf16.msra.mxu0 %v8276_v3  ;;  %v2616_v36 = vpack.c.bf16 %v2587_v19, %v2586_v18  ;;  %v2594_v3 = vld [vmem:[#allocation2 + $0xc1] sm:$0xff]  ;;  %v2596_v19 = vld [vmem:[#allocation2 + $0xd9] sm:$0xff] }
 0x122   : > { %7647 = vmatprep.subr.bf16.mxu0 %v8279_v44  ;;  %v2292_v18 = vld [vmem:[#allocation2 + $0xe0] sm:$0xff] }
 0x123   : > { %7488 = vmatmul.mubr.bf16.gmra.mxu0 %v8906_v62  ;;  %v2277_v62 = vld [vmem:[#allocation2 + $0x30] sm:$0xff] }
 0x124   : > { %7610 = vmatpush3.bf16.msra.mxu1 %v8274_v51  ;;  %7491 = vmatprep.mubr.bf16.mxu0 %v8919_v6  ;;  %v2278_v6 = vld [vmem:[#allocation2 + $0x38] sm:$0xff]  ;;  %v2289_v51 = vld [vmem:[#allocation2 + $0xc0] sm:$0xff] }
 0x125   : > { %7611 = vmatprep.subr.bf16.mxu1 %v8277_v53 }
 0x127   : > { %7532 = vmatmul.mubr.bf16.gmra.mxu1 %v8983_v23  ;;  %v2615_v23 = vpack.c.bf16 %v2585_v12, %v2584_v14  ;;  %v8284_v14 = vld [vmem:[#allocation7 + $0x210] sm:$0xff]  }
 0x128   : > { %7535 = vmatprep.mubr.bf16.mxu1 %v8989_v35  ;;  %7612 = vmatpush3.bf16.msra.mxu1 %v8277_v53  ;;  %v2589_v35 = vld [vmem:[#allocation2 + $0x81] sm:$0xff] }
 0x129   : > { %7613 = vmatprep.subr.bf16.mxu1 %v8278_v33 }
 0x12b   : > { %7492 = vmatmul.mubr.bf16.gmra.mxu0 %v8924_v8  ;;  %v2583_v8 = vld [vmem:[#allocation2 + $0x39] sm:$0xff] }
 0x12c   : > { %7614 = vmatpush3.bf16.msra.mxu1 %v8278_v33  ;;  %7495 = vmatprep.mubr.bf16.mxu0 %v8934_v17  ;;  %v2309_v17 = vpack.c.bf16 %v2278_v6, %v2277_v62  ;;  %v2614_v13 = vpack.c.bf16 %v2583_v8, %v2582_v4  ;;  %v2595_v33 = vld [vmem:[#allocation2 + $0xc9] sm:$0xff]  ;;  %v2314_v62 = vpack.c.bf16 %v2288_v38, %v2287_v52  ;;  %v2601_v52 = vld [vmem:[#allocation2 + $0x111] sm:$0xff]  ;;  %v2297_v38 = vld [vmem:[#allocation2 + $0x120] sm:$0xff] }
 0x12d   : > { %v2619_v4 = vpack.c.bf16 %v2593_v39, %v2592_v0  ;;  %v2315_v8 = vpack.c.bf16 %v2290_v27, %v2289_v51  ;;  %v2298_v0 = vld [vmem:[#allocation2 + $0x128] sm:$0xff] }
 0x12e   : > { %v2602_v39 = vld [vmem:[#allocation2 + $0x121] sm:$0xff]  ;;  %v2603_v51 = vld [vmem:[#allocation2 + $0x129] sm:$0xff] }
 0x12f   : > { %7536 = vmatmul.mubr.bf16.gmra.mxu1 %v8991_v37 }
 0x130   : > { %7539 = vmatprep.mubr.bf16.mxu1 %v8997_v42 }
 0x133   : > { %7496 = vmatmul.mubr.bf16.gmra.mxu0 %v8939_v21  ;;  %v2279_v21 = vld [vmem:[#allocation2 + $0x48] sm:$0xff] }
 0x134   : > { %7499 = vmatprep.mubr.bf16.mxu0 %v8948_v28  ;;  %v2280_v28 = vld [vmem:[#allocation2 + $0x50] sm:$0xff] }
 0x135   : > { %v2310_v16 = vpack.c.bf16 %v2280_v28, %v2279_v21  ;;  %v2620_v21 = vpack.c.bf16 %v2595_v33, %v2594_v3 }
 0x137   : > { %7540 = vmatmul.mubr.bf16.gmra.mxu1 %v8999_v43  ;;  %v2590_v43 = vld [vmem:[#allocation2 + $0x91] sm:$0xff] }
 0x138   : > { %7543 = vmatprep.mubr.bf16.mxu1 %v9005_v50  ;;  %v2618_v9 = vpack.c.bf16 %v2591_v56, %v2590_v43 }
 0x13a   : > { %v7281_v26 = vpop.f32.mrf.mxu0 }
 0x13b   : > { %7500 = vmatmul.mubr.bf16.gmra.mxu0 %v9050_v5 }
 0x13c   : > { %7567 = vmatprep.mubr.bf16.mxu0 %v2309_v17  ;;  %v720_v40 = vpop.f32.mrf.mxu0 }
 0x13e   : > { %v7282_v49 = vpop.f32.mrf.mxu0 }
 0x13f   : > { %7544 = vmatmul.mubr.bf16.gmra.mxu1 %v9007_v7  ;;  %v2617_v7 = vpack.c.bf16 %v2589_v35, %v2588_v34  ;;  %v8285_v34 = vld [vmem:[#allocation7 + $0x208] sm:$0xff]  }
 0x140   : > { %7547 = vmatprep.mubr.bf16.mxu1 %v9013_v59  ;;  %v723_v55 = vpop.f32.mrf.mxu0 }
 0x142   : > { %v7285_v22 = vpop.f32.mrf.mxu0 }
 0x143   : > { %7568 = vmatmul.mubr.bf16.vlgmr.msra.gmra.mxu0 %v2310_v16  ;;  %v2291_v16 = vld [vmem:[#allocation2 + $0xd8] sm:$0xff] }
 0x144   : > { %7648 = vmatpush3.bf16.msra.mxu0 %v8279_v44  ;;  %7571 = vmatprep.mubr.bf16.mxu0 %v2311_v24  ;;  %v736_v2 = vpop.f32.mrf.mxu0  ;;  %v8283_v44 = vld [vmem:[#allocation7 + $0x218] sm:$0xff]   ;;  %v2316_v48 = vpack.c.bf16 %v2292_v18, %v2291_v16 }
 0x145   : > { %7649 = vmatprep.subr.bf16.mxu0 %v8280_v25 }
 0x146   : > { %v7286_v60 = vpop.f32.mrf.mxu0 }
 0x147   : > { %7548 = vmatmul.mubr.bf16.gmra.mxu1 %v9052_v11 }
 0x148   : > { %7615 = vmatprep.mubr.bf16.mxu1 %v2614_v13  ;;  %7650 = vmatpush3.bf16.msra.mxu0 %v8280_v25  ;;  %v739_v13 = vpop.f32.mrf.mxu0  ;;  %v2597_v25 = vld [vmem:[#allocation2 + $0xe1] sm:$0xff] }
 0x149   : > { %7651 = vmatprep.subr.bf16.mxu0 %v8281_v61 }
 0x14a   : > { %v7289_v15 = vpop.f32.mrf.mxu0 }
 0x14b   : > { %7572 = vmatmul.mubr.bf16.gmra.mxu0 %v2312_v63 }
 0x14c   : > { %7575 = vmatprep.mubr.bf16.mxu0 %v2313_v58  ;;  %7652 = vmatpush3.bf16.msra.mxu0 %v8281_v61  ;;  %v752_v24 = vpop.f32.mrf.mxu0  ;;  %v2621_v61 = vpack.c.bf16 %v2597_v25, %v2596_v19  ;;  %v2605_v19 = vld [vmem:[#allocation2 + $0x141] sm:$0xff]  ;;  %v2302_v25 = vld [vmem:[#allocation2 + $0x158] sm:$0xff] }
 0x14d   : > { %7653 = vmatprep.subr.bf16.mxu0 %v8282_v1 }
 0x14f   : > { %v7329_v46 = vpop.f32.mrf.mxu1  ;;  %7616 = vmatmul.mubr.bf16.vlgmr.msra.gmra.mxu1 %v2615_v23 }
 0x150   : > { %v9056_v37 = vadd.f32 %v7329_v46, %v7281_v26  ;;  %7619 = vmatprep.mubr.bf16.mxu1 %v2616_v36  ;;  %7654 = vmatpush3.bf16.msra.mxu0 %v8282_v1  ;;  %v2293_v36 = vld [vmem:[#allocation2 + $0xf0] sm:$0xff]  ;;  %v2294_v26 = vld [vmem:[#allocation2 + $0xf8] sm:$0xff] }
 0x151   : > { %v929_v42 = vpop.f32.mrf.mxu1  ;;  %7655 = vmatprep.subr.bf16.mxu0 %v8283_v44  ;;  %v2598_v46 = vld [vmem:[#allocation2 + $0xf1] sm:$0xff]  ;;  %v2600_v1 = vld [vmem:[#allocation2 + $0x109] sm:$0xff] }
 0x152   : > { %v9058_v45 = vadd.f32 %v929_v42, %v720_v40  ;;  %v7290_v40 = vpop.f32.mrf.mxu0  ;;  %v2317_v42 = vpack.c.bf16 %v2294_v26, %v2293_v36  ;;  %v2606_v26 = vld [vmem:[#allocation2 + $0x151] sm:$0xff] }
 0x153   : > { %v7330_v50 = vpop.f32.mrf.mxu1  ;;  %7576 = vmatmul.mubr.bf16.gmra.mxu0 %v2314_v62 }
 0x154   : > { %v9060_v54 = vadd.f32 %v7330_v50, %v7282_v49  ;;  %7579 = vmatprep.mubr.bf16.mxu0 %v2315_v8  ;;  %7656 = vmatpush3.bf16.msra.mxu0 %v8283_v44  ;;  %v755_v56 = vpop.f32.mrf.mxu0  ;;  %v2622_v49 = vpack.c.bf16 %v2599_v31, %v2598_v46  ;;  %v8286_v50 = vld [vmem:[#allocation7 + $0x200] sm:$0xff]   ;;  %v2623_v44 = vpack.c.bf16 %v2601_v52, %v2600_v1  ;;  %v2608_v1 = vld [vmem:[#allocation2 + $0x169] sm:$0xff] }
 0x155   : > { %v932_v59 = vpop.f32.mrf.mxu1  ;;  %7657 = vmatprep.subr.bf16.mxu0 %v8284_v14 }
 0x156   : > { %v9062_v10 = vadd.f32 %v932_v59, %v723_v55  ;;  %v7293_v58 = vpop.f32.mrf.mxu0  ;;  %v2296_v59 = vld [vmem:[#allocation2 + $0x110] sm:$0xff] }
 0x157   : > { %v7333_v29 = vpop.f32.mrf.mxu1  ;;  %7620 = vmatmul.mubr.bf16.gmra.mxu1 %v2617_v7 }
 0x158   : > { %v9064_v57 = vadd.f32 %v7333_v29, %v7285_v22  ;;  %7623 = vmatprep.mubr.bf16.mxu1 %v2618_v9  ;;  %7658 = vmatpush3.bf16.msra.mxu0 %v8284_v14  ;;  %v2295_v9 = vld [vmem:[#allocation2 + $0x108] sm:$0xff]  ;;  %v768_v29 = vpop.f32.mrf.mxu0  ;;  %v2299_v14 = vld [vmem:[#allocation2 + $0x138] sm:$0xff] }
 0x159   : > { %v945_v53 = vpop.f32.mrf.mxu1  ;;  %7659 = vmatprep.subr.bf16.mxu0 %v8285_v34  ;;  %v2318_v3 = vpack.c.bf16 %v2296_v59, %v2295_v9 }
 0x15a   : > { %v9066_v47 = vadd.f32 %v945_v53, %v736_v2  ;;  %v7294_v53 = vpop.f32.mrf.mxu0 }
 0x15b   : > { %v7334_v6 = vpop.f32.mrf.mxu1  ;;  %7580 = vmatmul.mubr.bf16.gmra.mxu0 %v2316_v48 }
 0x15c   : > { %v9068_v17 = vadd.f32 %v7334_v6, %v7286_v60  ;;  %7583 = vmatprep.mubr.bf16.mxu0 %v2317_v42  ;;  %7660 = vmatpush3.bf16.msra.mxu0 %v8285_v34  ;;  %v2319_v60 = vpack.c.bf16 %v2298_v0, %v2297_v38  ;;  %v771_v6 = vpop.f32.mrf.mxu0 }
 0x15d   : > { %v948_v28 = vpop.f32.mrf.mxu1  ;;  %7661 = vmatprep.subr.bf16.mxu0 %v8286_v50 }
 0x15e   : > { %v9070_v12 = vadd.f32 %v948_v28, %v739_v13 }
 0x15f   : > { %v7337_v32 = vpop.f32.mrf.mxu1  ;;  %7624 = vmatmul.mubr.bf16.gmra.mxu1 %v2619_v4  ;;  %v2624_v4 = vpack.c.bf16 %v2603_v51, %v2602_v39 }
 0x160   : > { %v9072_v23 = vadd.f32 %v7337_v32, %v7289_v15  ;;  %7627 = vmatprep.mubr.bf16.mxu1 %v2620_v21  ;;  %7662 = vmatpush3.bf16.msra.mxu0 %v8286_v50  ;;  %v7297_v21 = vpop.f32.mrf.mxu0  ;;  %v2300_v15 = vld [vmem:[#allocation2 + $0x140] sm:$0xff] }
 0x161   : > { %v961_v30 = vpop.f32.mrf.mxu1  ;;  %v2604_v32 = vld [vmem:[#allocation2 + $0x139] sm:$0xff]  ;;  %v2320_v34 = vpack.c.bf16 %v2300_v15, %v2299_v14 }
 0x162   : > { %v9074_v35 = vadd.f32 %v961_v30, %v752_v24  ;;  %v784_v18 = vpop.f32.mrf.mxu0  ;;  %v2301_v24 = vld [vmem:[#allocation2 + $0x150] sm:$0xff]  ;;  %v2607_v30 = vld [vmem:[#allocation2 + $0x159] sm:$0xff]  ;;  %v2625_v48 = vpack.c.bf16 %v2605_v19, %v2604_v32 }
 0x163   : > { %v7338_v41 = vpop.f32.mrf.mxu1  ;;  %7584 = vmatmul.mubr.bf16.gmra.mxu0 %v2318_v3  ;;  %v2887_v14 = vld [vmem:[#allocation2 + $0x32] sm:$0xff]  ;;  %v2888_v15 = vld [vmem:[#allocation2 + $0x3a] sm:$0xff] }
 0x164   : > { %v9076_v43 = vadd.f32 %v7338_v41, %v7290_v40  ;;  %7587 = vmatprep.mubr.bf16.mxu0 %v2319_v60  ;;  %v7298_v31 = vpop.f32.mrf.mxu0  ;;  %v2321_v41 = vpack.c.bf16 %v2302_v25, %v2301_v24  ;;  %v9114_v24 = vld [vmem:[#allocation2 + $0x8] sm:$0xff] }
 0x165   : > { %v964_v63 = vpop.f32.mrf.mxu1 }
 0x166   : > { %v9078_v7 = vadd.f32 %v964_v63, %v755_v56  ;;  %v9094_v42 = vpop.f32.mrf.mxu0  ;;  %v2626_v56 = vpack.c.bf16 %v2607_v30, %v2606_v26  ;;  %v2919_v26 = vpack.c.bf16 %v2888_v15, %v2887_v14  ;;  %v2895_v14 = vld [vmem:[#allocation2 + $0x92] sm:$0xff]  ;;  %v2896_v15 = vld [vmem:[#allocation2 + $0x9a] sm:$0xff] }
 0x167   : > { %v7341_v55 = vpop.f32.mrf.mxu1  ;;  %7628 = vmatmul.mubr.bf16.gmra.mxu1 %v2621_v61 }
 0x168   : > { %v9080_v22 = vadd.f32 %v7341_v55, %v7293_v58  ;;  %7631 = vmatprep.mubr.bf16.mxu1 %v2622_v49  ;;  %v7301_v63 = vpop.f32.mrf.mxu0  ;;  %v2303_v58 = vld [vmem:[#allocation2 + $0x168] sm:$0xff]  ;;  %v2304_v55 = vld [vmem:[#allocation2 + $0x170] sm:$0xff] }
 0x169   : > { %v977_v2 = vpop.f32.mrf.mxu1 }
 0x16a   : > { %v9082_v27 = vadd.f32 %v977_v2, %v768_v29  ;;  %v800_v59 = vpop.f32.mrf.mxu0  ;;  %v2609_v29 = vld [vmem:[#allocation2 + $0x171] sm:$0xff]  ;;  %v2322_v2 = vpack.c.bf16 %v2304_v55, %v2303_v58 }
 0x16b   : > { %v7342_v33 = vpop.f32.mrf.mxu1  ;;  %7588 = vmatmul.mubr.bf16.gmra.mxu0 %v2320_v34  ;;  %v2627_v51 = vpack.c.bf16 %v2609_v29, %v2608_v1  ;;  %v2892_v58 = vld [vmem:[#allocation2 + $0x6a] sm:$0xff] }
 0x16c   : > { %v9084_v62 = vadd.f32 %v7342_v33, %v7294_v53  ;;  %7591 = vmatprep.mubr.bf16.mxu0 %v2321_v41  ;;  %v7302_v0 = vpop.f32.mrf.mxu0  ;;  %v2890_v41 = vld [vmem:[#allocation2 + $0x52] sm:$0xff] }
 0x16d   : > { %v980_v8 = vpop.f32.mrf.mxu1 }
 0x16e   : > { %v9086_v13 = vadd.f32 %v980_v8, %v771_v6  ;;  %v9104_v3 = vpop.f32.mrf.mxu0  ;;  %v2307_v6 = vld [vmem:[#allocation2 + $0x198] sm:$0xff] }
 0x16f   : > { %v7345_v28 = vpop.f32.mrf.mxu1  ;;  %7632 = vmatmul.mubr.bf16.gmra.mxu1 %v2623_v44  ;;  %v2324_v25 = vpack.c.bf16 %v9114_v24, %v2307_v6 }
 0x170   : > { %v9088_v16 = vadd.f32 %v7345_v28, %v7297_v21  ;;  %7635 = vmatprep.mubr.bf16.mxu1 %v2624_v4  ;;  %v7305_v44 = vpop.f32.mrf.mxu0  ;;  %v2612_v4 = vld [vmem:[#allocation2 + $0x199] sm:$0xff]  ;;  %v2613_v28 = vld [vmem:[#allocation2 + $0x1a1] sm:$0xff] }
 0x171   : > { %v993_v36 = vpop.f32.mrf.mxu1 }
 0x172   : > { %v9090_v46 = vadd.f32 %v993_v36, %v784_v18  ;;  %v816_v21 = vpop.f32.mrf.mxu0 }
 0x173   : > { %v7346_v40 = vpop.f32.mrf.mxu1  ;;  %7592 = vmatmul.mubr.bf16.gmra.mxu0 %v2322_v2 }
 0x174   : > { %v9092_v61 = vadd.f32 %v7346_v40, %v7298_v31  ;;  %7595 = vmatprep.mubr.bf16.mxu0 %v9015_v20  ;;  %v7306_v19 = vpop.f32.mrf.mxu0  ;;  %v2629_v20 = vpack.c.bf16 %v2613_v28, %v2612_v4  ;;  %v2893_v4 = vld [vmem:[#allocation2 + $0x7a] sm:$0xff] }
 0x175   : > { %v9096_v49 = vpop.f32.mrf.mxu1 }
 0x176   : > { %v9119_v31 = vpop.f32.mrf.mxu0 }
 0x177   : > { %v7349_v50 = vpop.f32.mrf.mxu1  ;;  %7636 = vmatmul.mubr.bf16.gmra.mxu1 %v2625_v48  ;;  %v2889_v48 = vld [vmem:[#allocation2 + $0x4a] sm:$0xff] }
 0x178   : > { %v9098_v9 = vadd.f32 %v7349_v50, %v7301_v63  ;;  %7639 = vmatprep.mubr.bf16.mxu1 %v2626_v56  ;;  %v2891_v50 = vld [vmem:[#allocation2 + $0x62] sm:$0xff]  ;;  %v2920_v29 = vpack.c.bf16 %v2890_v41, %v2889_v48 }
 0x179   : > { %v1009_v52 = vpop.f32.mrf.mxu1 }
 0x17a   : > { %v9100_v38 = vadd.f32 %v1009_v52, %v800_v59 }
 0x17b   : > { %v7350_v39 = vpop.f32.mrf.mxu1  ;;  %7596 = vmatmul.mubr.bf16.gmra.mxu0 %v2324_v25 }
 0x17c   : > { %v9102_v53 = vadd.f32 %v7350_v39, %v7302_v0  ;;  %7663 = vmatprep.mubr.bf16.mxu0 %v2919_v26  ;;  %v2921_v0 = vpack.c.bf16 %v2892_v58, %v2891_v50 }
 0x17d   : > { %v9106_v33 = vpop.f32.mrf.mxu1 }
 0x17f   : > { %v7353_v60 = vpop.f32.mrf.mxu1  ;;  %7640 = vmatmul.mubr.bf16.gmra.mxu1 %v2627_v51 }
 0x180   : > { %v9109_v8 = vadd.f32 %v7353_v60, %v7305_v44  ;;  %7643 = vmatprep.mubr.bf16.mxu1 %v9050_v5  ;;  %v7309_v5 = vpop.f32.mrf.mxu0 }
 0x181   : > { %v1025_v32 = vpop.f32.mrf.mxu1 }
 0x182   : > { %v9112_v18 = vadd.f32 %v1025_v32, %v816_v21  ;;  %v832_v63 = vpop.f32.mrf.mxu0  ;;  %v2894_v21 = vld [vmem:[#allocation2 + $0x82] sm:$0xff] }
 0x183   : > { %v7354_v36 = vpop.f32.mrf.mxu1  ;;  %7664 = vmatmul.mubr.bf16.vlgmr.msra.gmra.mxu0 %v2920_v29 }
 0x184   : > { %v9117_v30 = vadd.f32 %v7354_v36, %v7306_v19  ;;  %v7310_v1 = vpop.f32.mrf.mxu0  ;;  %7667 = vmatprep.mubr.bf16.mxu0 %v2921_v0  ;;  %v2900_v0 = vld [vmem:[#allocation2 + $0xca] sm:$0xff] }
 0x185   : > { %v9121_v34 = vpop.f32.mrf.mxu1 }
 0x186   : > { %v9129_v39 = vpop.f32.mrf.mxu0 }
 0x187   : > { %v7357_v40 = vpop.f32.mrf.mxu1  ;;  %7644 = vmatmul.mubr.bf16.gmra.mxu1 %v2629_v20  ;;  %v2922_v20 = vpack.c.bf16 %v2894_v21, %v2893_v4 }
 0x188   : > { %v9123_v56 = vadd.f32 %v7357_v40, %v7309_v5  ;;  %v7377_v44 = vpop.f32.mrf.mxu0 }
 0x189   : > { %v1041_v55 = vpop.f32.mrf.mxu1  ;;  %v1331_v60 = vadd.f32 %v7377_v44, %v9056_v37  ;;  %v2923_v37 = vpack.c.bf16 %v2896_v15, %v2895_v14 }
 0x18a   : > { %v9125_v59 = vadd.f32 %v1041_v55, %v832_v63  ;;  %v1202_v28 = vpop.f32.mrf.mxu0 }
 0x18b   : > { %v7358_v52 = vpop.f32.mrf.mxu1  ;;  %v1329_v32 = vadd.f32 %v1202_v28, %v9058_v45  ;;  %7668 = vmatmul.mubr.bf16.gmra.mxu0 %v2922_v20 }
 0x18c   : > { %v9127_v2 = vadd.f32 %v7358_v52, %v7310_v1  ;;  %v7378_v36 = vpop.f32.mrf.mxu0  ;;  %7671 = vmatprep.mubr.bf16.mxu0 %v2923_v37  ;;  %v2897_v1 = vld [vmem:[#allocation2 + $0xaa] sm:$0xff]  ;;  %v2899_v52 = vld [vmem:[#allocation2 + $0xc2] sm:$0xff] }
 0x18d   : > { %v9131_v51 = vpop.f32.mrf.mxu1  ;;  %v1332_v26 = vadd.f32 %v7378_v36, %v9060_v54  ;;  %v2898_v54 = vld [vmem:[#allocation2 + $0xb2] sm:$0xff] }
 0x18e   : > { %v1205_v48 = vpop.f32.mrf.mxu0  ;;  %v2924_v4 = vpack.c.bf16 %v2898_v54, %v2897_v1 }
 0x18f   : > { %v7425_v6 = vpop.f32.mrf.mxu1  ;;  %v9141_v41 = vadd.f32 %v1205_v48, %v9062_v10  ;;  %v2903_v48 = vld [vmem:[#allocation2 + $0xf2] sm:$0xff] }
 0x190   : > { %v9135_v19 = vadd.f32 %v7425_v6, %v1331_v60  ;;  %v7381_v45 = vpop.f32.mrf.mxu0 }
 0x191   : > { %v1507_v25 = vpop.f32.mrf.mxu1  ;;  %v1335_v58 = vadd.f32 %v7381_v45, %v9064_v57  ;;  %v2925_v57 = vpack.c.bf16 %v2900_v0, %v2899_v52  ;;  %v2904_v45 = vld [vmem:[#allocation2 + $0xfa] sm:$0xff] }
 0x192   : > { %v9138_v5 = vadd.f32 %v1507_v25, %v1329_v32  ;;  %v1218_v29 = vpop.f32.mrf.mxu0 }
 0x193   : > { %v7426_v40 = vpop.f32.mrf.mxu1  ;;  %v1333_v44 = vadd.f32 %v1218_v29, %v9066_v47  ;;  %7672 = vmatmul.mubr.bf16.gmra.mxu0 %v2924_v4 }
 0x194   : > { %v9143_v63 = vadd.f32 %v7426_v40, %v1332_v26  ;;  %v7382_v6 = vpop.f32.mrf.mxu0  ;;  %7675 = vmatprep.mubr.bf16.mxu0 %v2925_v57  ;;  %v2901_v40 = vld [vmem:[#allocation2 + $0xda] sm:$0xff]  ;;  %v2905_v57 = vld [vmem:[#allocation2 + $0x10a] sm:$0xff] }
 0x195   : > { %v9145_v50 = vpop.f32.mrf.mxu1  ;;  %v1336_v21 = vadd.f32 %v7382_v6, %v9068_v17  ;;  %v2902_v17 = vld [vmem:[#allocation2 + $0xe2] sm:$0xff] }
 0x196   : > { %v1221_v15 = vpop.f32.mrf.mxu0  ;;  %v2926_v54 = vpack.c.bf16 %v2902_v17, %v2901_v40 }
 0x197   : > { %v7429_v55 = vpop.f32.mrf.mxu1  ;;  %v9155_v32 = vadd.f32 %v1221_v15, %v9070_v12  ;;  %v8287_v15 = vld [vmem:[#allocation9 + $0x78] sm:$0xff]  }
 0x198   : > { %v9149_v60 = vadd.f32 %v7429_v55, %v1335_v58  ;;  %v7385_v47 = vpop.f32.mrf.mxu0  ;;  %7695 = vmatprep.subr.bf16.mxu1 %v8287_v15 }
 0x199   : > { %v1523_v10 = vpop.f32.mrf.mxu1  ;;  %v1339_v20 = vadd.f32 %v7385_v47, %v9072_v23  ;;  %v2927_v23 = vpack.c.bf16 %v2904_v45, %v2903_v48  ;;  %7696 = vmatpush3.bf16.msra.mxu1 %v8287_v15 }
 0x19a   : > { %v9152_v28 = vadd.f32 %v1523_v10, %v1333_v44  ;;  %v1234_v37 = vpop.f32.mrf.mxu0 }
 0x19b   : > { %v7430_v14 = vpop.f32.mrf.mxu1  ;;  %v1337_v58 = vadd.f32 %v1234_v37, %v9074_v35  ;;  %7676 = vmatmul.mubr.bf16.gmra.mxu0 %v2926_v54 }
 0x19c   : > { %v9157_v25 = vadd.f32 %v7430_v14, %v1336_v21  ;;  %v7386_v1 = vpop.f32.mrf.mxu0  ;;  %7679 = vmatprep.mubr.bf16.mxu0 %v2927_v23 }
 0x19d   : > { %v9159_v36 = vpop.f32.mrf.mxu1  ;;  %v1340_v29 = vadd.f32 %v7386_v1, %v9076_v43  ;;  %v2906_v43 = vld [vmem:[#allocation2 + $0x112] sm:$0xff] }
 0x19e   : > { %v1237_v44 = vpop.f32.mrf.mxu0  ;;  %v2928_v48 = vpack.c.bf16 %v2906_v43, %v2905_v57  ;;  %v2911_v57 = vld [vmem:[#allocation2 + $0x152] sm:$0xff]  ;;  %v2912_v43 = vld [vmem:[#allocation2 + $0x15a] sm:$0xff] }
 0x19f   : > { %v7433_v26 = vpop.f32.mrf.mxu1  ;;  %v9169_v10 = vadd.f32 %v1237_v44, %v9078_v7 }
 0x1a0   : > { %v9163_v55 = vadd.f32 %v7433_v26, %v1339_v20  ;;  %v7389_v35 = vpop.f32.mrf.mxu0  ;;  %v2907_v20 = vld [vmem:[#allocation2 + $0x122] sm:$0xff]  ;;  %v2908_v26 = vld [vmem:[#allocation2 + $0x12a] sm:$0xff] }
 0x1a1   : > { %v1539_v12 = vpop.f32.mrf.mxu1  ;;  %v1343_v21 = vadd.f32 %v7389_v35, %v9080_v22  ;;  %v2909_v35 = vld [vmem:[#allocation2 + $0x13a] sm:$0xff] }
 0x1a2   : > { %v9166_v52 = vadd.f32 %v1539_v12, %v1337_v58  ;;  %v1250_v47 = vpop.f32.mrf.mxu0  ;;  %v2929_v12 = vpack.c.bf16 %v2908_v26, %v2907_v20 }
 0x1a3   : > { %v7434_v0 = vpop.f32.mrf.mxu1  ;;  %v1341_v40 = vadd.f32 %v1250_v47, %v9082_v27  ;;  %7680 = vmatmul.mubr.bf16.gmra.mxu0 %v2928_v48 }
 0x1a4   : > { %v9171_v6 = vadd.f32 %v7434_v0, %v1340_v29  ;;  %v7390_v37 = vpop.f32.mrf.mxu0  ;;  %7683 = vmatprep.mubr.bf16.mxu0 %v2929_v12 }
 0x1a5   : > { %v9173_v4 = vpop.f32.mrf.mxu1  ;;  %v1344_v45 = vadd.f32 %v7390_v37, %v9084_v62  ;;  %v2910_v62 = vld [vmem:[#allocation2 + $0x142] sm:$0xff]  ;;  %v2931_v37 = vpack.c.bf16 %v2912_v43, %v2911_v57 }
 0x1a6   : > { %v1253_v1 = vpop.f32.mrf.mxu0  ;;  %v2930_v26 = vpack.c.bf16 %v2910_v62, %v2909_v35 }
 0x1a7   : > { %v7437_v14 = vpop.f32.mrf.mxu1  ;;  %v9183_v54 = vadd.f32 %v1253_v1, %v9086_v13 }
 0x1a8   : > { %v9177_v7 = vadd.f32 %v7437_v14, %v1343_v21  ;;  %v7393_v0 = vpop.f32.mrf.mxu0  ;;  %v8288_v21 = vld [vmem:[#allocation9 + $0x70] sm:$0xff]  }
 0x1a9   : > { %v1555_v17 = vpop.f32.mrf.mxu1  ;;  %v1347_v23 = vadd.f32 %v7393_v0, %v9088_v16  ;;  %7697 = vmatprep.subr.bf16.mxu1 %v8288_v21  ;;  %v2913_v0 = vld [vmem:[#allocation2 + $0x16a] sm:$0xff] }
 0x1aa   : > { %v9180_v22 = vadd.f32 %v1555_v17, %v1341_v40  ;;  %v1266_v14 = vpop.f32.mrf.mxu0  ;;  %7698 = vmatpush3.bf16.msra.mxu1 %v8288_v21 }
 0x1ab   : > { %v7438_v58 = vpop.f32.mrf.mxu1  ;;  %v1345_v15 = vadd.f32 %v1266_v14, %v9090_v46  ;;  %7684 = vmatmul.mubr.bf16.gmra.mxu0 %v2930_v26 }
 0x1ac   : > { %v9185_v29 = vadd.f32 %v7438_v58, %v1344_v45  ;;  %v7394_v20 = vpop.f32.mrf.mxu0  ;;  %7687 = vmatprep.mubr.bf16.mxu0 %v2931_v37  ;;  %v2917_v37 = vld [vmem:[#allocation2 + $0x19a] sm:$0xff] }
 0x1ad   : > { %v9187_v27 = vpop.f32.mrf.mxu1  ;;  %v1348_v40 = vadd.f32 %v7394_v20, %v9092_v61 }
 0x1ae   : > { %v9196_v48 = vpop.f32.mrf.mxu0 }
 0x1af   : > { %v7441_v44 = vpop.f32.mrf.mxu1 }
 0x1b0   : > { %v9191_v13 = vadd.f32 %v7441_v44, %v1347_v23  ;;  %v7397_v46 = vpop.f32.mrf.mxu0  ;;  %v2914_v23 = vld [vmem:[#allocation2 + $0x172] sm:$0xff]  ;;  %v8289_v44 = vld [vmem:[#allocation9 + $0x68] sm:$0xff]  }
 0x1b1   : > { %v1571_v47 = vpop.f32.mrf.mxu1  ;;  %v1351_v12 = vadd.f32 %v7397_v46, %v9098_v9  ;;  %7699 = vmatprep.subr.bf16.mxu1 %v8289_v44  ;;  %v2932_v57 = vpack.c.bf16 %v2914_v23, %v2913_v0  ;;  %v2918_v46 = vld [vmem:[#allocation2 + $0x1a2] sm:$0xff] }
 0x1b2   : > { %v9194_v16 = vadd.f32 %v1571_v47, %v1345_v15  ;;  %v1282_v61 = vpop.f32.mrf.mxu0  ;;  %7700 = vmatpush3.bf16.msra.mxu1 %v8289_v44 }
 0x1b3   : > { %v7442_v17 = vpop.f32.mrf.mxu1  ;;  %v1349_v35 = vadd.f32 %v1282_v61, %v9100_v38  ;;  %7688 = vmatmul.mubr.bf16.gmra.mxu0 %v2932_v57  ;;  %v2934_v61 = vpack.c.bf16 %v2918_v46, %v2917_v37 }
 0x1b4   : > { %v9198_v45 = vadd.f32 %v7442_v17, %v1348_v40  ;;  %v7398_v14 = vpop.f32.mrf.mxu0  ;;  %7691 = vmatprep.mubr.bf16.mxu0 %v9052_v11 }
 0x1b5   : > { %v9200_v58 = vpop.f32.mrf.mxu1  ;;  %v1352_v43 = vadd.f32 %v7398_v14, %v9102_v53 }
 0x1b6   : > { %v9209_v47 = vpop.f32.mrf.mxu0 }
 0x1b7   : > { %v7445_v1 = vpop.f32.mrf.mxu1 }
 0x1b8   : > { %v9204_v62 = vadd.f32 %v7445_v1, %v1351_v12  ;;  %v7401_v40 = vpop.f32.mrf.mxu0  ;;  %v8290_v12 = vld [vmem:[#allocation9 + $0x60] sm:$0xff]  }
 0x1b9   : > { %v1587_v21 = vpop.f32.mrf.mxu1  ;;  %v1355_v38 = vadd.f32 %v7401_v40, %v9109_v8  ;;  %7701 = vmatprep.subr.bf16.mxu1 %v8290_v12 }
 0x1ba   : > { %v9207_v15 = vadd.f32 %v1587_v21, %v1349_v35  ;;  %v1298_v53 = vpop.f32.mrf.mxu0  ;;  %7702 = vmatpush3.bf16.msra.mxu1 %v8290_v12 }
 0x1bb   : > { %v7446_v9 = vpop.f32.mrf.mxu1  ;;  %v1353_v1 = vadd.f32 %v1298_v53, %v9112_v18  ;;  %7692 = vmatmul.mubr.bf16.gmra.mxu0 %v2934_v61  ;;  %v8292_v18 = vld [vmem:[#allocation9 + $0x38] sm:$0xff]   ;;  %v8293_v53 = vld [vmem:[#allocation9 + $0x30] sm:$0xff]  }
 0x1bc   : > { %v9211_v20 = vadd.f32 %v7446_v9, %v1352_v43  ;;  %v7402_v44 = vpop.f32.mrf.mxu0  ;;  %7743 = vmatprep.subr.bf16.mxu0 %v8292_v18 }
 0x1bd   : > { %v9213_v26 = vpop.f32.mrf.mxu1  ;;  %v1356_v35 = vadd.f32 %v7402_v44, %v9117_v30  ;;  %7744 = vmatpush3.bf16.msra.mxu0 %v8292_v18 }
 0x1be   : > { %v9223_v14 = vpop.f32.mrf.mxu0  ;;  %7745 = vmatprep.subr.bf16.mxu0 %v8293_v53 }
 0x1bf   : > { %v7449_v17 = vpop.f32.mrf.mxu1 }
 0x1c0   : > { %v9218_v0 = vadd.f32 %v7449_v17, %v1355_v38  ;;  %v7405_v43 = vpop.f32.mrf.mxu0  ;;  %v8291_v38 = vld [vmem:[#allocation9 + $0x58] sm:$0xff]  }
 0x1c1   : > { %v1603_v23 = vpop.f32.mrf.mxu1  ;;  %v1359_v9 = vadd.f32 %v7405_v43, %v9123_v56  ;;  %7703 = vmatprep.subr.bf16.mxu1 %v8291_v38  ;;  %7746 = vmatpush3.bf16.msra.mxu0 %v8293_v53 }
 0x1c2   : > { %v9221_v21 = vadd.f32 %v1603_v23, %v1353_v1  ;;  %v1314_v17 = vpop.f32.mrf.mxu0  ;;  %7704 = vmatpush3.bf16.msra.mxu1 %v8291_v38 }
 0x1c3   : > { %v7450_v8 = vpop.f32.mrf.mxu1  ;;  %v1357_v30 = vadd.f32 %v1314_v17, %v9125_v59  ;;  %v8294_v17 = vld [vmem:[#allocation9 + $0x50] sm:$0xff]  }
 0x1c4   : > { %v9225_v11 = vadd.f32 %v7450_v8, %v1356_v35  ;;  %v7406_v12 = vpop.f32.mrf.mxu0  ;;  %v8295_v8 = vld [vmem:[#allocation9 + $0x28] sm:$0xff]   ;;  %7705 = vmatprep.subr.bf16.mxu1 %v8294_v17 }
 0x1c5   : > { %v9227_v57 = vpop.f32.mrf.mxu1  ;;  %v1360_v1 = vadd.f32 %v7406_v12, %v9127_v2  ;;  %7747 = vmatprep.subr.bf16.mxu0 %v8295_v8 }
 0x1c6   : > { %v9236_v56 = vpop.f32.mrf.mxu0  ;;  %7748 = vmatpush3.bf16.msra.mxu0 %v8295_v8  ;;  %7706 = vmatpush3.bf16.msra.mxu1 %v8294_v17 }
 0x1c7   : > { %v7453_v40 = vpop.f32.mrf.mxu1 }
 0x1c8   : > { %v9231_v37 = vadd.f32 %v7453_v40, %v1359_v9  ;;  %v7473_v59 = vpop.f32.mrf.mxu0 }
 0x1c9   : > { %v1619_v46 = vpop.f32.mrf.mxu1  ;;  %v9243_v43 = vadd.f32 %v7473_v59, %v9135_v19 }
 0x1ca   : > { %v9234_v23 = vadd.f32 %v1619_v46, %v1357_v30  ;;  %v1812_v9 = vpop.f32.mrf.mxu0  ;;  %v8296_v30 = vld [vmem:[#allocation9 + $0x20] sm:$0xff]  }
 0x1cb   : > { %v7454_v44 = vpop.f32.mrf.mxu1  ;;  %v9248_v2 = vadd.f32 %v1812_v9, %v9138_v5  ;;  %7749 = vmatprep.subr.bf16.mxu0 %v8296_v30 }
 0x1cc   : > { %v9238_v61 = vadd.f32 %v7454_v44, %v1360_v1  ;;  %v7474_v38 = vpop.f32.mrf.mxu0  ;;  %7750 = vmatpush3.bf16.msra.mxu0 %v8296_v30  ;;  %v8297_v1 = vld [vmem:[#allocation9 + $0x48] sm:$0xff]   ;;  %v8298_v44 = vld [vmem:[#allocation9 + $0x18] sm:$0xff]   ;;  %v8299_v30 = vld [vmem:[#allocation9 + $0x10] sm:$0xff]  }
 0x1cd   : > { %v9240_v35 = vpop.f32.mrf.mxu1  ;;  %v9253_v46 = vadd.f32 %v7474_v38, %v9143_v63  ;;  %7707 = vmatprep.subr.bf16.mxu1 %v8297_v1  ;;  %7751 = vmatprep.subr.bf16.mxu0 %v8298_v44 }
 0x1ce   : > { %10720 = vst [vmem:[#allocation14_spill] sm:$0xff] %v9240_v35  ;;  %v9257_v19 = vpop.f32.mrf.mxu0  ;;  %7708 = vmatpush3.bf16.msra.mxu1 %v8297_v1 }
 0x1cf   : > { %v9245_v18 = vpop.f32.mrf.mxu1 }
 0x1d0   : > { %v7477_v5 = vpop.f32.mrf.mxu0  ;;  %7752 = vmatpush3.bf16.msra.mxu0 %v8298_v44 }
 0x1d1   : > { %v9250_v40 = vpop.f32.mrf.mxu1  ;;  %v9262_v59 = vadd.f32 %v7477_v5, %v9149_v60  ;;  %7753 = vmatprep.subr.bf16.mxu0 %v8299_v30 }
 0x1d2   : > { %v1828_v63 = vpop.f32.mrf.mxu0 }
 0x1d3   : > { %v9255_v12 = vpop.f32.mrf.mxu1  ;;  %10722 = vst [vmem:[#allocation16_spill] sm:$0xff] %v9262_v59  ;;  %v9267_v9 = vadd.f32 %v1828_v63, %v9152_v28  ;;  %v3400_v59 = vld [vmem:[#allocation3 + $0x9] sm:$0xff]  ;;  %v8301_v63 = vld [vmem:[#allocation9 + $0x8] sm:$0xff]  }
 0x1d4   : > { %v7478_v17 = vpop.f32.mrf.mxu0  ;;  %7754 = vmatpush3.bf16.msra.mxu0 %v8299_v30  ;;  %v8302_v30 = vld [vmem:[#allocation9] sm:$0xff]  }
 0x1d5   : > { %v9259_v53 = vpop.f32.mrf.mxu1  ;;  %v9272_v35 = vadd.f32 %v7478_v17, %v9157_v25  ;;  %7755 = vmatprep.subr.bf16.mxu0 %v8301_v63 }
 0x1d6   : > { %10721 = vst [vmem:[#allocation15_spill] sm:$0xff] %v9259_v53  ;;  %v8300_v53 = vld [vmem:[#allocation9 + $0x40] sm:$0xff]   ;;  %v9276_v5 = vpop.f32.mrf.mxu0 }
 0x1d7   : > { %v9264_v8 = vpop.f32.mrf.mxu1  ;;  %10725 = vst [vmem:[#allocation19_spill] sm:$0xff] %v9272_v35  ;;  %7709 = vmatprep.subr.bf16.mxu1 %v8300_v53 }
 0x1d8   : > { %10723 = vst [vmem:[#allocation17_spill] sm:$0xff] %v9264_v8  ;;  %v3399_v8 = vld [vmem:[#allocation3 + $0x1] sm:$0xff]  ;;  %7710 = vmatpush3.bf16.msra.mxu1 %v8300_v53  ;;  %v7481_v44 = vpop.f32.mrf.mxu0  ;;  %7756 = vmatpush3.bf16.msra.mxu0 %v8301_v63 }
 0x1d9   : > { %v9269_v38 = vpop.f32.mrf.mxu1  ;;  %v3431_v1 = vpack.c.bf16 %v3400_v59, %v3399_v8  ;;  %7757 = vmatprep.subr.bf16.mxu0 %v8302_v30  ;;  %v3335_v8 = vld [vmem:[#allocation3] sm:$0xff] }
 0x1da   : > { %10724 = vst [vmem:[#allocation18_spill] sm:$0xff] %v9269_v38  ;;  %v9281_v38 = vadd.f32 %v7481_v44, %v9163_v55  ;;  %v1844_v17 = vpop.f32.mrf.mxu0 }
 0x1db   : > { %v9274_v60 = vpop.f32.mrf.mxu1  ;;  %7711 = vmatprep.mubr.bf16.mxu1 %v3431_v1 }
 0x1dc   : > { %10726 = vst [vmem:[#allocation20_spill] sm:$0xff] %v9274_v60  ;;  %v9286_v60 = vadd.f32 %v1844_v17, %v9166_v52  ;;  %7758 = vmatpush3.bf16.msra.mxu0 %v8302_v30  ;;  %v3367_v52 = vpack.c.bf16 %v9114_v24, %v3335_v8 }
 0x1dd   : > { %v9278_v28 = vpop.f32.mrf.mxu1 }
 0x1de   : > { %10727 = vst [vmem:[#allocation21_spill] sm:$0xff] %v9278_v28  ;;  %v7482_v28 = vpop.f32.mrf.mxu0  ;;  %7759 = vmatprep.mubr.bf16.mxu0 %v3367_v52 }
 0x1df   : > { %v9283_v25 = vpop.f32.mrf.mxu1  ;;  %v9291_v53 = vadd.f32 %v7482_v28, %v9171_v6 }
 0x1e0   : > { %v9295_v55 = vpop.f32.mrf.mxu0 }
 0x1e1   : > { %v9288_v35 = vpop.f32.mrf.mxu1  ;;  %10729 = vst [vmem:[#allocation23_spill] sm:$0xff] %v9291_v53 }
 0x1e2   : > { %10728 = vst [vmem:[#allocation22_spill] sm:$0xff] %v9288_v35  ;;  %v7485_v44 = vpop.f32.mrf.mxu0 }
 0x1e3   : > { %v9293_v59 = vpop.f32.mrf.mxu1  ;;  %v9301_v17 = vadd.f32 %v7485_v44, %v9177_v7 }
 0x1e4   : > { %10730 = vst [vmem:[#allocation24_spill] sm:$0xff] %v9293_v59  ;;  %v1860_v6 = vpop.f32.mrf.mxu0 }
 0x1e5   : > { %v9297_v1 = vpop.f32.mrf.mxu1  ;;  %v9306_v28 = vadd.f32 %v1860_v6, %v9180_v22  ;;  %v9324_v22 = vld [vmem:[#allocation9 + $0xb8] sm:$0xff]  }
 0x1e6   : > { %v7486_v53 = vpop.f32.mrf.mxu0  ;;  %10736 = vst [vmem:[#allocation30_spill] sm:$0xff] %v9324_v22  ;;  %7791 = vmatprep.subr.bf16.mxu1 %v9324_v22 }
 0x1e7   : > { %v9303_v63 = vpop.f32.mrf.mxu1  ;;  %v9311_v35 = vadd.f32 %v7486_v53, %v9185_v29 }
 0x1e8   : > { %v9315_v24 = vpop.f32.mrf.mxu0 }
 0x1e9   : > { %v9308_v59 = vpop.f32.mrf.mxu1 }
 0x1ea   : > { %10731 = vst [vmem:[#allocation25_spill] sm:$0xff] %v9308_v59  ;;  %v7489_v7 = vpop.f32.mrf.mxu0 }
 0x1eb   : > { %v9313_v30 = vpop.f32.mrf.mxu1  ;;  %v9320_v44 = vadd.f32 %v7489_v7, %v9191_v13 }
 0x1ec   : > { %10732 = vst [vmem:[#allocation26_spill] sm:$0xff] %v9313_v30  ;;  %v1876_v6 = vpop.f32.mrf.mxu0 }
 0x1ed   : > { %v9317_v8 = vpop.f32.mrf.mxu1  ;;  %10734 = vst [vmem:[#allocation28_spill] sm:$0xff] %v9320_v44  ;;  %v9327_v59 = vadd.f32 %v1876_v6, %v9194_v16 }
 0x1ee   : > { %10733 = vst [vmem:[#allocation27_spill] sm:$0xff] %v9317_v8  ;;  %v7490_v53 = vpop.f32.mrf.mxu0 }
 0x1ef   : > { %v9322_v52 = vpop.f32.mrf.mxu1  ;;  %10737 = vst [vmem:[#allocation31_spill] sm:$0xff] %v9327_v59  ;;  %v9333_v30 = vadd.f32 %v7490_v53, %v9198_v45 }
 0x1f0   : > { %10735 = vst [vmem:[#allocation29_spill] sm:$0xff] %v9322_v52  ;;  %v9337_v13 = vpop.f32.mrf.mxu0 }
 0x1f1   : > { %v9329_v29 = vpop.f32.mrf.mxu1  ;;  %10739 = vst [vmem:[#allocation33_spill] sm:$0xff] %v9333_v30 }
 0x1f2   : > { %10738 = vst [vmem:[#allocation32_spill] sm:$0xff] %v9329_v29  ;;  %v7493_v52 = vpop.f32.mrf.mxu0 }
 0x1f3   : > { %v9335_v8 = vpop.f32.mrf.mxu1  ;;  %v9342_v44 = vadd.f32 %v7493_v52, %v9204_v62 }
 0x1f4   : > { %10740 = vst [vmem:[#allocation34_spill] sm:$0xff] %v9335_v8  ;;  %v1892_v6 = vpop.f32.mrf.mxu0 }
 0x1f5   : > { %v9339_v7 = vpop.f32.mrf.mxu1  ;;  %10742 = vst [vmem:[#allocation36_spill] sm:$0xff] %v9342_v44  ;;  %v9347_v29 = vadd.f32 %v1892_v6, %v9207_v15 }
 0x1f6   : > { %10741 = vst [vmem:[#allocation35_spill] sm:$0xff] %v9339_v7  ;;  %v7494_v45 = vpop.f32.mrf.mxu0 }
 0x1f7   : > { %v9344_v16 = vpop.f32.mrf.mxu1  ;;  %10744 = vst [vmem:[#allocation38_spill] sm:$0xff] %v9347_v29  ;;  %v9352_v53 = vadd.f32 %v7494_v45, %v9211_v20 }
 0x1f8   : > { %10743 = vst [vmem:[#allocation37_spill] sm:$0xff] %v9344_v16  ;;  %v9356_v30 = vpop.f32.mrf.mxu0 }
 0x1f9   : > { %v9349_v22 = vpop.f32.mrf.mxu1  ;;  %10746 = vst [vmem:[#allocation40_spill] sm:$0xff] %v9352_v53  ;;  %10748 = vst [vmem:[#allocation42_spill] sm:$0xff] %v9356_v30 }
 0x1fa   : > { %10745 = vst [vmem:[#allocation39_spill] sm:$0xff] %v9349_v22  ;;  %v7497_v62 = vpop.f32.mrf.mxu0 }
 0x1fb   : > { %v9354_v8 = vpop.f32.mrf.mxu1  ;;  %v9361_v52 = vadd.f32 %v7497_v62, %v9218_v0  ;;  %v9379_v62 = vld [vmem:[#allocation9 + $0xf8] sm:$0xff]  }
 0x1fc   : > { %10747 = vst [vmem:[#allocation41_spill] sm:$0xff] %v9354_v8  ;;  %v1908_v15 = vpop.f32.mrf.mxu0  ;;  %10758 = vst [vmem:[#allocation52_spill] sm:$0xff] %v9379_v62  ;;  %7839 = vmatprep.subr.bf16.mxu0 %v9379_v62 }
 0x1fd   : > { %v9358_v7 = vpop.f32.mrf.mxu1  ;;  %10750 = vst [vmem:[#allocation44_spill] sm:$0xff] %v9361_v52  ;;  %v9366_v6 = vadd.f32 %v1908_v15, %v9221_v21 }
 0x1fe   : > { %10749 = vst [vmem:[#allocation43_spill] sm:$0xff] %v9358_v7  ;;  %v7498_v20 = vpop.f32.mrf.mxu0 }
 0x1ff   : > { %v9363_v16 = vpop.f32.mrf.mxu1  ;;  %10752 = vst [vmem:[#allocation46_spill] sm:$0xff] %v9366_v6  ;;  %v9371_v45 = vadd.f32 %v7498_v20, %v9225_v11 }
 0x200   : > { %10751 = vst [vmem:[#allocation45_spill] sm:$0xff] %v9363_v16  ;;  %v9375_v53 = vpop.f32.mrf.mxu0 }
 0x201   : > { %v9368_v22 = vpop.f32.mrf.mxu1  ;;  %10754 = vst [vmem:[#allocation48_spill] sm:$0xff] %v9371_v45  ;;  %10756 = vst [vmem:[#allocation50_spill] sm:$0xff] %v9375_v53 }
 0x202   : > { %10753 = vst [vmem:[#allocation47_spill] sm:$0xff] %v9368_v22  ;;  %v7501_v0 = vpop.f32.mrf.mxu0 }
 0x203   : > { %v9373_v8 = vpop.f32.mrf.mxu1  ;;  %v9382_v16 = vadd.f32 %v7501_v0, %v9231_v37 }
 0x204   : > { %10755 = vst [vmem:[#allocation49_spill] sm:$0xff] %v9373_v8  ;;  %v1924_v15 = vpop.f32.mrf.mxu0 }
 0x205   : > { %v9377_v7 = vpop.f32.mrf.mxu1  ;;  %10759 = vst [vmem:[#allocation53_spill] sm:$0xff] %v9382_v16  ;;  %v9388_v11 = vadd.f32 %v1924_v15, %v9234_v23 }
 0x206   : > { %10757 = vst [vmem:[#allocation51_spill] sm:$0xff] %v9377_v7  ;;  %v7502_v8 = vpop.f32.mrf.mxu0 }
 0x207   : > { %v9384_v21 = vpop.f32.mrf.mxu1  ;;  %10761 = vst [vmem:[#allocation55_spill] sm:$0xff] %v9388_v11  ;;  %v9393_v45 = vadd.f32 %v7502_v8, %v9238_v61 }
 0x208   : > { %10760 = vst [vmem:[#allocation54_spill] sm:$0xff] %v9384_v21  ;;  %v9397_v53 = vpop.f32.mrf.mxu0 }
 0x209   : > { %v9390_v20 = vpop.f32.mrf.mxu1  ;;  %10763 = vst [vmem:[#allocation57_spill] sm:$0xff] %v9393_v45  ;;  %10765 = vst [vmem:[#allocation59_spill] sm:$0xff] %v9397_v53 }
 0x20a   : > { %10762 = vst [vmem:[#allocation56_spill] sm:$0xff] %v9390_v20  ;;  %v7569_v0 = vpop.f32.mrf.mxu0 }
 0x20b   : > { %v9395_v7 = vpop.f32.mrf.mxu1 }
 0x20c   : > { %10764 = vst [vmem:[#allocation58_spill] sm:$0xff] %v9395_v7  ;;  %v9403_v16 = vpop.f32.mrf.mxu0 }
 0x20d   : > { %v9399_v37 = vpop.f32.mrf.mxu1 }
 0x20e   : > { %10766 = vst [vmem:[#allocation60_spill] sm:$0xff] %v9399_v37  ;;  %v9407_v23 = vpop.f32.mrf.mxu0 }
 0x20f   : > { %v9401_v21 = vpop.f32.mrf.mxu1 }
 0x210   : > { %v9411_v20 = vpop.f32.mrf.mxu0 }
 0x211   : > { %v9405_v62 = vpop.f32.mrf.mxu1 }
 0x212   : > { %v9413_v61 = vpop.f32.mrf.mxu0 }
 0x213   : > { %v9409_v15 = vpop.f32.mrf.mxu1 }
 0x214   : > { %v9417_v7 = vpop.f32.mrf.mxu0 }
 0x215   : > { %v9415_v8 = vpop.f32.mrf.mxu1 }
 0x216   : > { %v9419_v37 = vpop.f32.mrf.mxu0 }
 0x217   : > { %10767 = vst [vmem:[#allocation61_spill] sm:$0xff] %v9419_v37  ;;  %v9421_v45 = vpop.f32.mrf.mxu1 }
 0x218   : > { %10768 = vst [vmem:[#allocation62_spill] sm:$0xff] %v9421_v45  ;;  %v9423_v53 = vpop.f32.mrf.mxu0 }
 0x219   : > { %10769 = vst [vmem:[#allocation63_spill] sm:$0xff] %v9423_v53  ;;  %v9427_v22 = vpop.f32.mrf.mxu1 }
 0x21a   : > { %v9425_v11 = vpop.f32.mrf.mxu0  ;;  %10771 = vst [vmem:[#allocation65_spill] sm:$0xff] %v9427_v22 }
 0x21b   : > { %10770 = vst [vmem:[#allocation64_spill] sm:$0xff] %v9425_v11  ;;  %v9433_v29 = vpop.f32.mrf.mxu1 }
 0x21c   : > { %v9429_v6 = vpop.f32.mrf.mxu0  ;;  %10774 = vst [vmem:[#allocation68_spill] sm:$0xff] %v9433_v29 }
 0x21d   : > { %10772 = vst [vmem:[#allocation66_spill] sm:$0xff] %v9429_v6  ;;  %v9439_v59 = vpop.f32.mrf.mxu1 }
 0x21e   : > { %v9431_v52 = vpop.f32.mrf.mxu0  ;;  %10777 = vst [vmem:[#allocation71_spill] sm:$0xff] %v9439_v59 }
 0x21f   : > { %10773 = vst [vmem:[#allocation67_spill] sm:$0xff] %v9431_v52  ;;  %v9445_v53 = vpop.f32.mrf.mxu1 }
 0x220   : > { %v9435_v30 = vpop.f32.mrf.mxu0  ;;  %10780 = vst [vmem:[#allocation74_spill] sm:$0xff] %v9445_v53 }
 0x221   : > { %10775 = vst [vmem:[#allocation69_spill] sm:$0xff] %v9435_v30  ;;  %v9451_v6 = vpop.f32.mrf.mxu1 }
 0x222   : > { %v9437_v44 = vpop.f32.mrf.mxu0  ;;  %10783 = vst [vmem:[#allocation77_spill] sm:$0xff] %v9451_v6 }
 0x223   : > { %10776 = vst [vmem:[#allocation70_spill] sm:$0xff] %v9437_v44  ;;  %v9457_v30 = vpop.f32.mrf.mxu1 }
 0x224   : > { %v9441_v37 = vpop.f32.mrf.mxu0  ;;  %10786 = vst [vmem:[#allocation80_spill] sm:$0xff] %v9457_v30 }
 0x225   : > { %10778 = vst [vmem:[#allocation72_spill] sm:$0xff] %v9441_v37  ;;  %v9463_v37 = vpop.f32.mrf.mxu1 }
 0x226   : > { %v9443_v45 = vpop.f32.mrf.mxu0 }
 0x227   : > { %10779 = vst [vmem:[#allocation73_spill] sm:$0xff] %v9443_v45 }
 0x228   : > { %v9447_v11 = vpop.f32.mrf.mxu0 }
 0x229   : > { %10781 = vst [vmem:[#allocation75_spill] sm:$0xff] %v9447_v11  ;;  %v9469_v11 = vpop.f32.mrf.mxu1 }
 0x22a   : > { %v9449_v22 = vpop.f32.mrf.mxu0 }
 0x22b   : > { %10782 = vst [vmem:[#allocation76_spill] sm:$0xff] %v9449_v22 }
 0x22c   : > { %v9453_v52 = vpop.f32.mrf.mxu0 }
 0x22d   : > { %10784 = vst [vmem:[#allocation78_spill] sm:$0xff] %v9453_v52  ;;  %v9475_v52 = vpop.f32.mrf.mxu1 }
 0x22e   : > { %v9455_v29 = vpop.f32.mrf.mxu0 }
 0x22f   : > { %10785 = vst [vmem:[#allocation79_spill] sm:$0xff] %v9455_v29 }
 0x230   : > { %v9459_v44 = vpop.f32.mrf.mxu0 }
 0x231   : > { %10787 = vst [vmem:[#allocation81_spill] sm:$0xff] %v9459_v44  ;;  %v9481_v44 = vpop.f32.mrf.mxu1 }
 0x232   : > { %v9461_v59 = vpop.f32.mrf.mxu0  ;;  %10795 = vst [vmem:[#allocation89_spill] sm:$0xff] %v9481_v44 }
 0x233   : > { %10788 = vst [vmem:[#allocation82_spill] sm:$0xff] %v9461_v59 }
 0x234   : > { %v9465_v45 = vpop.f32.mrf.mxu0 }
 0x235   : > { %10789 = vst [vmem:[#allocation83_spill] sm:$0xff] %v9465_v45  ;;  %v997_v45 = vadd.f32 %v9096_v49, %v9094_v42  ;;  %v2246_v42 = vadd.f32 %v9245_v18, %v9243_v43  ;;  %v9501_v49 = vpop.f32.mrf.mxu1 }
 0x236   : > { %v9467_v53 = vpop.f32.mrf.mxu0 }
 0x237   : > { %10790 = vst [vmem:[#allocation84_spill] sm:$0xff] %v9467_v53  ;;  %v1013_v53 = vadd.f32 %v9106_v33, %v9104_v3  ;;  %v1346_v44 = vadd.f32 %v9196_v48, %v997_v45  ;;  %v1639_v3 = vadd.f32 %v9159_v36, %v9155_v32  ;;  %v1647_v48 = vadd.f32 %v9187_v27, %v9183_v54  ;;  %v9526_v18 = vpop.f32.mrf.mxu1  ;;  %v10798_v27 = vld [vmem:[#allocation15_spill] sm:$0xff] }
 0x238   : > { %v9471_v22 = vpop.f32.mrf.mxu0 }
 0x239   : > { %10791 = vst [vmem:[#allocation85_spill] sm:$0xff] %v9471_v22  ;;  %v1029_v22 = vadd.f32 %v9121_v34, %v9119_v31  ;;  %v1944_v32 = vadd.f32 %v9276_v5, %v1639_v3  ;;  %v9559_v3 = vpop.f32.mrf.mxu1 }
 0x23a   : > { %v9473_v6 = vpop.f32.mrf.mxu0 }
 0x23b   : > { %10792 = vst [vmem:[#allocation86_spill] sm:$0xff] %v9473_v6  ;;  %v1045_v6 = vadd.f32 %v9131_v51, %v9129_v39  ;;  %v1354_v33 = vadd.f32 %v9223_v14, %v1029_v22  ;;  %v2244_v51 = vadd.f32 %v9250_v40, %v9248_v2  ;;  %v10803_v22 = vld [vmem:[#allocation20_spill] sm:$0xff] }
 0x23c   : > { %v9477_v29 = vpop.f32.mrf.mxu0 }
 0x23d   : > { %10793 = vst [vmem:[#allocation87_spill] sm:$0xff] %v9477_v29  ;;  %v1635_v29 = vadd.f32 %v9145_v50, %v9141_v41  ;;  %v1358_v31 = vadd.f32 %v9236_v56, %v1045_v6  ;;  %v2552_v41 = vadd.f32 %v7569_v0, %v2246_v42  ;;  %v1643_v50 = vadd.f32 %v9173_v4, %v9169_v10  ;;  %v10797_v4 = vld [vmem:[#allocation14_spill] sm:$0xff] }
 0x23e   : > { %v9479_v30 = vpop.f32.mrf.mxu0  ;;  %v2247_v56 = vadd.f32 %v9255_v12, %v9253_v46  ;;  %v2550_v43 = vadd.f32 %v9403_v16, %v2244_v51  ;;  %v9529_v10 = vadd.f32 %v9227_v57, %v1354_v33  ;;  %v10801_v46 = vld [vmem:[#allocation18_spill] sm:$0xff]  ;;  %v10804_v16 = vld [vmem:[#allocation21_spill] sm:$0xff]  ;;  %v1952_v6 = vadd.f32 %v9315_v24, %v1647_v48 }
 0x23f   : > { %10794 = vst [vmem:[#allocation88_spill] sm:$0xff] %v9479_v30  ;;  %v1940_v34 = vadd.f32 %v9257_v19, %v1635_v29  ;;  %v9532_v54 = vadd.f32 %v10797_v4, %v1358_v31  ;;  %v10800_v19 = vld [vmem:[#allocation17_spill] sm:$0xff]  ;;  %v2248_v12 = vadd.f32 %v10801_v46, %v9267_v9  ;;  %v9553_v0 = vld [vmem:[%s10693_s3] ss:$0 sm:$0xff]  ;;  %v10806_v31 = vld [vmem:[#allocation23_spill] sm:$0xff] }
 0x240   : > { %v9483_v59 = vpop.f32.mrf.mxu0  ;;  %v2553_v57 = vadd.f32 %v9407_v23, %v2247_v56  ;;  %v10805_v9 = vld [vmem:[#allocation22_spill] sm:$0xff]  ;;  %v2855_v23 = vadd.f32 %v9405_v62, %v2550_v43  ;;  %v10808_v51 = vld [vmem:[#allocation25_spill] sm:$0xff]  ;;  %v10814_v46 = vld [vmem:[#allocation32_spill] sm:$0xff] }
 0x241   : > { %10796 = vst [vmem:[#allocation90_spill] sm:$0xff] %v9483_v59  ;;  %v1350_v59 = vadd.f32 %v9209_v47, %v1013_v53  ;;  %v1651_v47 = vadd.f32 %v9200_v58, %v1346_v44  ;;  %v2245_v2 = vadd.f32 %v10798_v27, %v1940_v34  ;;  %v1948_v58 = vadd.f32 %v9295_v55, %v1643_v50  ;;  %v10802_v44 = vld [vmem:[#allocation19_spill] sm:$0xff]  ;;  %v9576_v62 = vld [vmem:[%s10694_s4] ss:$0 sm:$0xff]  ;;  %v9594_v27 = vpop.f32.mrf.mxu1 }
 0x242   : > { %v9495_v30 = vpop.f32.mrf.mxu0  ;;  %v2251_v29 = vadd.f32 %v10803_v22, %v10802_v44  ;;  %v2249_v53 = vadd.f32 %v10804_v16, %v1944_v32  ;;  %v2254_v55 = vadd.f32 %v9283_v25, %v9281_v38  ;;  %v10807_v38 = vld [vmem:[#allocation24_spill] sm:$0xff]  ;;  %v9570_v34 = vadd.f32 %v9303_v63, %v9301_v17  ;;  %v10809_v17 = vld [vmem:[#allocation26_spill] sm:$0xff] }
 0x243   : > { %v9521_v14 = vadd.f32 %v9213_v26, %v1350_v59  ;;  %v10799_v26 = vld [vmem:[#allocation16_spill] sm:$0xff]  ;;  %v2857_v59 = vadd.f32 %v9401_v21, %v2552_v41  ;;  %v2252_v21 = vadd.f32 %v10805_v9, %v9286_v60  ;;  %v2551_v42 = vadd.f32 %v9411_v20, %v2245_v2 }
 0x244   : > { %v9508_v39 = vpop.f32.mrf.mxu0  ;;  %v2250_v5 = vadd.f32 %v10800_v19, %v10799_v26  ;;  %v9563_v25 = vadd.f32 %v10807_v38, %v10806_v31  ;;  %v9566_v24 = vadd.f32 %v9297_v1, %v1948_v58  ;;  %v9580_v41 = vadd.f32 %v10808_v51, %v9306_v28  ;;  %v10811_v26 = vld [vmem:[#allocation28_spill] sm:$0xff]  ;;  %v10821_v38 = vld [vmem:[#allocation63_spill] sm:$0xff] }
 0x245   : > { %v2858_v50 = vadd.f32 %v9409_v15, %v2553_v57  ;;  %v9586_v63 = vadd.f32 %v10809_v17, %v9311_v35  ;;  %v1956_v56 = vadd.f32 %v9337_v13, %v1651_v47  ;;  %v2554_v43 = vadd.f32 %v9417_v7, %v2248_v12  ;;  %v10812_v35 = vld [vmem:[#allocation29_spill] sm:$0xff]  ;;  %v10815_v13 = vld [vmem:[#allocation62_spill] sm:$0xff]  ;;  %v10822_v17 = vld [vmem:[#allocation36_spill] sm:$0xff] }
 0x246   : > { %v9517_v36 = vpop.f32.mrf.mxu0  ;;  %v2556_v60 = vadd.f32 %v9413_v61, %v2250_v5  ;;  %v10810_v61 = vld [vmem:[#allocation27_spill] sm:$0xff]  ;;  %v2856_v28 = vadd.f32 %v9415_v8, %v2551_v42  ;;  %v9600_v19 = vadd.f32 %v10812_v35, %v10811_v26  ;;  %v10816_v47 = vld [vmem:[#allocation61_spill] sm:$0xff] }
 0x247   : > { %v9589_v32 = vadd.f32 %v10810_v61, %v1952_v6  ;;  %v10813_v5 = vld [vmem:[#allocation31_spill] sm:$0xff]  ;;  %v2557_v12 = vadd.f32 %v10816_v47, %v2251_v29  ;;  %v10817_v6 = vld [vmem:[#allocation33_spill] sm:$0xff]  ;;  %v9619_v29 = vpop.f32.mrf.mxu1 }
 0x248   : > { %v9536_v40 = vpop.f32.mrf.mxu0  ;;  %v2861_v7 = vadd.f32 %v10815_v13, %v2556_v60  ;;  %v2555_v60 = vadd.f32 %v10821_v38, %v2249_v53  ;;  %v10823_v61 = vld [vmem:[#allocation37_spill] sm:$0xff]  ;;  %v10826_v53 = vld [vmem:[#allocation64_spill] sm:$0xff]  ;;  %v10827_v13 = vld [vmem:[#allocation38_spill] sm:$0xff] }
 0x24a   : > { %v7665_v45 = vpop.f32.mrf.mxu0 }
 0x24b   : > { %v3162_v33 = vadd.f32 %v7665_v45, %v2857_v59  ;;  %v9604_v59 = vadd.f32 %v10814_v46, %v10813_v5  ;;  %v10818_v45 = vld [vmem:[#allocation34_spill] sm:$0xff] }
 0x24c   : > { %v3033_v20 = vpop.f32.mrf.mxu0  ;;  %v9612_v9 = vadd.f32 %v10818_v45, %v10817_v6  ;;  %v9643_v45 = vpop.f32.mrf.mxu1 }
 0x24d   : > { %v3201_v1 = vmul.f32 %v9553_v0, %v3162_v33  ;;  %v3160_v48 = vadd.f32 %v3033_v20, %v2855_v23  ;;  %v10819_v23 = vld [vmem:[#allocation35_spill] sm:$0xff]  ;;  %v10820_v33 = vld [vmem:[#allocation65_spill] sm:$0xff] }
 0x24e   : > { %v7666_v4 = vpop.f32.mrf.mxu0  ;;  %v9615_v42 = vadd.f32 %v10819_v23, %v1956_v56  ;;  %v2859_v31 = vadd.f32 %v10820_v33, %v2554_v43  ;;  %v10824_v56 = vld [vmem:[#allocation42_spill] sm:$0xff]  ;;  %v10825_v43 = vld [vmem:[#allocation68_spill] sm:$0xff] }
 0x24f   : > { %v3240_v15 = vadd.f32 %v9576_v62, %v3201_v1  ;;  %v3199_v2 = vmul.f32 %v9553_v0, %v3160_v48  ;;  %v3163_v58 = vadd.f32 %v7666_v4, %v2858_v50  ;;  %v9625_v4 = vadd.f32 %v10823_v61, %v10822_v17  ;;  %v10835_v17 = vld [vmem:[#allocation67_spill] sm:$0xff] }
 0x250   : > { %v3036_v8 = vpop.f32.mrf.mxu0 }
 0x251   : > { %v3272_v57 = vmax.f32 %v3240_v15, 0.0  ;;  %v3238_v44 = vadd.f32 %v9576_v62, %v3199_v2  ;;  %v3202_v22 = vmul.f32 %v9553_v0, %v3163_v58  ;;  %v3161_v16 = vadd.f32 %v3036_v8, %v2856_v28  ;;  %v10829_v8 = vld [vmem:[#allocation40_spill] sm:$0xff] }
 0x252   : > { %v7669_v20 = vpop.f32.mrf.mxu0  ;;  %v1960_v28 = vadd.f32 %v10824_v56, %v9521_v14  ;;  %v2862_v15 = vadd.f32 %v10825_v43, %v2557_v12  ;;  %v2560_v2 = vadd.f32 %v10826_v53, %v2254_v55  ;;  %v10831_v14 = vld [vmem:[#allocation71_spill] sm:$0xff] }
 0x253   : > { %3305 = vst [vmem:[#allocation3 + $0x31] sm:$0xff] %v3272_v57  ;;  %v3270_v51 = vmax.f32 %v3238_v44, 0.0  ;;  %v3241_v50 = vadd.f32 %v9576_v62, %v3202_v22  ;;  %v3200_v1 = vmul.f32 %v9553_v0, %v3161_v16  ;;  %v3166_v48 = vadd.f32 %v7669_v20, %v2861_v7  ;;  %v10828_v7 = vld [vmem:[#allocation39_spill] sm:$0xff]  ;;  %v10830_v44 = vld [vmem:[#allocation41_spill] sm:$0xff]  ;;  %v10832_v16 = vld [vmem:[#allocation66_spill] sm:$0xff] }
 0x254   : > { %v3049_v58 = vpop.f32.mrf.mxu0  ;;  %v9635_v47 = vadd.f32 %v10828_v7, %v10827_v13  ;;  %v9639_v22 = vadd.f32 %v10830_v44, %v10829_v8  ;;  %v2860_v12 = vadd.f32 %v10831_v14, %v2555_v60  ;;  %v2558_v55 = vadd.f32 %v10832_v16, %v2252_v21  ;;  %v10833_v20 = vld [vmem:[#allocation43_spill] sm:$0xff]  ;;  %v9660_v8 = vpop.f32.mrf.mxu1  ;;  %v10840_v16 = vld [vmem:[#allocation45_spill] sm:$0xff] }
 0x255   : > { %3303 = vst [vmem:[#allocation3 + $0x19] sm:$0xff] %v3270_v51  ;;  %v3273_v26 = vmax.f32 %v3241_v50, 0.0  ;;  %v3239_v35 = vadd.f32 %v9576_v62, %v3200_v1  ;;  %v3205_v5 = vmul.f32 %v9553_v0, %v3166_v48  ;;  %v3164_v46 = vadd.f32 %v3049_v58, %v2859_v31  ;;  %v10834_v1 = vld [vmem:[#allocation74_spill] sm:$0xff] }
 0x256   : > { %v7670_v6 = vpop.f32.mrf.mxu0  ;;  %v9648_v50 = vadd.f32 %v10833_v20, %v1960_v28  ;;  %v2865_v48 = vadd.f32 %v10834_v1, %v2560_v2  ;;  %v2561_v60 = vadd.f32 %v10835_v17, %v9563_v25  ;;  %v8304_v25 = vld [vmem:[#allocation9 + $0xb0] sm:$0xff]  }
 0x257   : > { %3306 = vst [vmem:[#allocation3 + $0x39] sm:$0xff] %v3273_v26  ;;  %v3271_v23 = vmax.f32 %v3239_v35, 0.0  ;;  %v3244_v33 = vadd.f32 %v9576_v62, %v3205_v5  ;;  %v3203_v31 = vmul.f32 %v9553_v0, %v3164_v46  ;;  %v3167_v38 = vadd.f32 %v7670_v6, %v2862_v15  ;;  %v10836_v35 = vld [vmem:[#allocation77_spill] sm:$0xff]  ;;  %v10838_v46 = vld [vmem:[#allocation70_spill] sm:$0xff]  ;;  %v10842_v6 = vld [vmem:[#allocation47_spill] sm:$0xff] }
 0x258   : > { %v3052_v61 = vpop.f32.mrf.mxu0  ;;  %v3433_v21 = vpack.c.bf16 %v3273_v26, %v3272_v57  ;;  %v2863_v5 = vadd.f32 %v10836_v35, %v2558_v55  ;;  %v10837_v15 = vld [vmem:[#allocation69_spill] sm:$0xff]  ;;  %v2564_v2 = vadd.f32 %v10838_v46, %v9570_v34  ;;  %v10843_v34 = vld [vmem:[#allocation80_spill] sm:$0xff] }
 0x259   : > { %3304 = vst [vmem:[#allocation3 + $0x21] sm:$0xff] %v3271_v23  ;;  %v3276_v56 = vmax.f32 %v3244_v33, 0.0  ;;  %v3242_v43 = vadd.f32 %v9576_v62, %v3203_v31  ;;  %v3206_v53 = vmul.f32 %v9553_v0, %v3167_v38  ;;  %v3165_v58 = vadd.f32 %v3052_v61, %v2860_v12  ;;  %v10839_v12 = vld [vmem:[#allocation44_spill] sm:$0xff]  ;;  %v10845_v61 = vld [vmem:[#allocation30_spill] sm:$0xff] }
 0x25a   : > { %v2559_v28 = vadd.f32 %v10837_v15, %v9566_v24  ;;  %v7673_v13 = vpop.f32.mrf.mxu0  ;;  %v3432_v7 = vpack.c.bf16 %v3271_v23, %v3270_v51  ;;  %v9666_v55 = vadd.f32 %v10840_v16, %v10839_v12  ;;  %v10841_v24 = vld [vmem:[#allocation46_spill] sm:$0xff]  ;;  %v2866_v51 = vadd.f32 %v10843_v34, %v2561_v60  ;;  %v10844_v23 = vld [vmem:[#allocation72_spill] sm:$0xff]  ;;  %v10848_v60 = vld [vmem:[#allocation49_spill] sm:$0xff] }
 0x25b   : > { %3309 = vst [vmem:[#allocation3 + $0x61] sm:$0xff] %v3276_v56  ;;  %v3274_v57 = vmax.f32 %v3242_v43, 0.0  ;;  %v3245_v26 = vadd.f32 %v9576_v62, %v3206_v53  ;;  %v3204_v44 = vmul.f32 %v9553_v0, %v3165_v58  ;;  %v3170_v14 = vadd.f32 %v7673_v13, %v2865_v48  ;;  %v10846_v43 = vld [vmem:[#allocation50_spill] sm:$0xff]  ;;  %v10847_v58 = vld [vmem:[#allocation48_spill] sm:$0xff]  ;;  %v8305_v13 = vld [vmem:[#allocation9 + $0xa8] sm:$0xff]  }
 0x25c   : > { %v9670_v33 = vadd.f32 %v10842_v6, %v10841_v24  ;;  %v2562_v31 = vadd.f32 %v10844_v23, %v9580_v41  ;;  %v3065_v38 = vpop.f32.mrf.mxu0  ;;  %7712 = vmatmul.mubr.bf16.vlgmr.msra.gmra.mxu1 %v3432_v7  ;;  %v1964_v53 = vadd.f32 %v10846_v43, %v9529_v10  ;;  %v9682_v35 = vadd.f32 %v10848_v60, %v10847_v58  ;;  %v9686_v7 = vpop.f32.mrf.mxu1  ;;  %v8306_v58 = vld [vmem:[#allocation9 + $0xa0] sm:$0xff]   ;;  %v8309_v60 = vld [vmem:[#allocation9 + $0xf0] sm:$0xff]  }
 0x25d   : > { %3307 = vst [vmem:[#allocation3 + $0x49] sm:$0xff] %v3274_v57  ;;  %v3277_v20 = vmax.f32 %v3245_v26, 0.0  ;;  %v3243_v1 = vadd.f32 %v9576_v62, %v3204_v44  ;;  %v3209_v48 = vmul.f32 %v9553_v0, %v3170_v14  ;;  %v3168_v17 = vadd.f32 %v3065_v38, %v2863_v5  ;;  %7715 = vmatprep.mubr.bf16.mxu1 %v3433_v21  ;;  %v10849_v14 = vld [vmem:[#allocation73_spill] sm:$0xff]  ;;  %v3337_v38 = vld [vmem:[#allocation3 + $0x18] sm:$0xff] }
 0x25e   : > { %7792 = vmatpush3.bf16.msra.mxu1 %v10845_v61  ;;  %v2864_v41 = vadd.f32 %v9463_v37, %v2559_v28  ;;  %v2869_v15 = vadd.f32 %v9469_v11, %v2564_v2  ;;  %v7674_v46 = vpop.f32.mrf.mxu0  ;;  %v3340_v44 = vld [vmem:[#allocation3 + $0x38] sm:$0xff]  ;;  %v2565_v12 = vadd.f32 %v10849_v14, %v9586_v63  ;;  %v2867_v37 = vadd.f32 %v9475_v52, %v2562_v31  ;;  %v10851_v52 = vld [vmem:[#allocation76_spill] sm:$0xff] }
 0x25f   : > { %7793 = vmatprep.subr.bf16.mxu1 %v8304_v25  ;;  %3310 = vst [vmem:[#allocation3 + $0x69] sm:$0xff] %v3277_v20  ;;  %v3275_v21 = vmax.f32 %v3243_v1, 0.0  ;;  %v9689_v5 = vadd.f32 %v9576_v62, %v3209_v48  ;;  %v3207_v10 = vmul.f32 %v9553_v0, %v3168_v17  ;;  %v3171_v26 = vadd.f32 %v7674_v46, %v2866_v51  ;;  %v10850_v11 = vld [vmem:[#allocation75_spill] sm:$0xff]  ;;  %v3339_v1 = vld [vmem:[#allocation3 + $0x30] sm:$0xff]  ;;  %v10853_v46 = vld [vmem:[#allocation89_spill] sm:$0xff] }
 0x260   : > { %v2563_v28 = vadd.f32 %v10850_v11, %v9589_v32  ;;  %v3068_v2 = vpop.f32.mrf.mxu0  ;;  %v3338_v16 = vld [vmem:[#allocation3 + $0x20] sm:$0xff]  ;;  %v3435_v24 = vpack.c.bf16 %v3277_v20, %v3276_v56  ;;  %v2568_v63 = vadd.f32 %v10851_v52, %v9600_v19  ;;  %v9706_v48 = vpack.c.bf16 %v3340_v44, %v3339_v1  ;;  %v9708_v20 = vpop.f32.mrf.mxu1  ;;  %v10852_v19 = vld [vmem:[#allocation51_spill] sm:$0xff]  ;;  %v10858_v1 = vld [vmem:[#allocation82_spill] sm:$0xff] }
 0x261   : > { %3308 = vst [vmem:[#allocation3 + $0x51] sm:$0xff] %v3275_v21  ;;  %v3280_v6 = vmax.f32 %v9689_v5, 0.0  ;;  %v9699_v34 = vadd.f32 %v9576_v62, %v3207_v10  ;;  %v3210_v51 = vmul.f32 %v9553_v0, %v3171_v26  ;;  %v3169_v23 = vadd.f32 %v3068_v2, %v2864_v41 }
 0x262   : > { %7794 = vmatpush3.bf16.msra.mxu1 %v8304_v25  ;;  %v7677_v31 = vpop.f32.mrf.mxu0  ;;  %v9704_v32 = vpack.c.bf16 %v3338_v16, %v3337_v38  ;;  %v3434_v56 = vpack.c.bf16 %v3275_v21, %v3274_v57  ;;  %v9714_v41 = vadd.f32 %v10852_v19, %v1964_v53  ;;  %v2870_v5 = vadd.f32 %v10853_v46, %v2565_v12  ;;  %v10854_v57 = vld [vmem:[#allocation78_spill] sm:$0xff]  ;;  %v10856_v16 = vld [vmem:[#allocation52_spill] sm:$0xff] }
 0x263   : > { %7795 = vmatprep.subr.bf16.mxu1 %v8305_v13  ;;  %3313 = vst [vmem:[#allocation3 + $0x91] sm:$0xff] %v3280_v6  ;;  %v3278_v17 = vmax.f32 %v9699_v34, 0.0  ;;  %v3249_v61 = vadd.f32 %v9576_v62, %v3210_v51  ;;  %v3208_v43 = vmul.f32 %v9553_v0, %v3169_v23  ;;  %v3174_v25 = vadd.f32 %v7677_v31, %v2869_v15  ;;  %v9728_v34 = vpop.f32.mrf.mxu1 }
 0x264   : > { %v2566_v21 = vadd.f32 %v10854_v57, %v9604_v59  ;;  %7760 = vmatmul.mubr.bf16.vlgmr.msra.gmra.mxu0 %v9704_v32  ;;  %v3081_v10 = vpop.f32.mrf.mxu0  ;;  %7716 = vmatmul.mubr.bf16.gmra.mxu1 %v3434_v56  ;;  %v2868_v53 = vadd.f32 %v9501_v49, %v2563_v28  ;;  %v2873_v12 = vadd.f32 %v9526_v18, %v2568_v63  ;;  %v10855_v59 = vld [vmem:[#allocation79_spill] sm:$0xff]  ;;  %v8307_v18 = vld [vmem:[#allocation9 + $0x98] sm:$0xff]  }
 0x265   : > { %3311 = vst [vmem:[#allocation3 + $0x79] sm:$0xff] %v3278_v17  ;;  %v3281_v26 = vmax.f32 %v3249_v61, 0.0  ;;  %v3247_v44 = vadd.f32 %v9576_v62, %v3208_v43  ;;  %v3213_v15 = vmul.f32 %v9553_v0, %v3174_v25  ;;  %v3172_v14 = vadd.f32 %v3081_v10, %v2867_v37  ;;  %7763 = vmatprep.mubr.bf16.mxu0 %v9706_v48  ;;  %v8311_v28 = vld [vmem:[#allocation9 + $0xe8] sm:$0xff]   ;;  %v3341_v46 = vld [vmem:[#allocation3 + $0x48] sm:$0xff] }
 0x266   : > { %7719 = vmatprep.mubr.bf16.mxu1 %v3435_v24  ;;  %v2569_v11 = vadd.f32 %v10855_v59, %v9612_v9  ;;  %v7678_v2 = vpop.f32.mrf.mxu0  ;;  %7796 = vmatpush3.bf16.msra.mxu1 %v8305_v13  ;;  %v3344_v49 = vld [vmem:[#allocation3 + $0x68] sm:$0xff]  ;;  %v2871_v9 = vadd.f32 %v9559_v3, %v2566_v21  ;;  %v2572_v52 = vadd.f32 %v10858_v1, %v9625_v4  ;;  %v3343_v3 = vld [vmem:[#allocation3 + $0x60] sm:$0xff]  ;;  %v10860_v59 = vld [vmem:[#allocation54_spill] sm:$0xff] }
 0x267   : > { %7840 = vmatpush3.bf16.msra.mxu0 %v10856_v16  ;;  %3314 = vst [vmem:[#allocation3 + $0x99] sm:$0xff] %v3281_v26  ;;  %v3279_v51 = vmax.f32 %v3247_v44, 0.0  ;;  %v9731_v37 = vadd.f32 %v9576_v62, %v3213_v15  ;;  %v3211_v24 = vmul.f32 %v9553_v0, %v3172_v14  ;;  %v3175_v23 = vadd.f32 %v7678_v2, %v2870_v5  ;;  %v10857_v13 = vld [vmem:[#allocation81_spill] sm:$0xff]  ;;  %v8310_v15 = vld [vmem:[#allocation9 + $0x90] sm:$0xff]   ;;  %v8312_v14 = vld [vmem:[#allocation9 + $0xe0] sm:$0xff]  }
 0x268   : > { %7797 = vmatprep.subr.bf16.mxu1 %v8306_v58  ;;  %7841 = vmatprep.subr.bf16.mxu0 %v8309_v60  ;;  %v2567_v38 = vadd.f32 %v10857_v13, %v9615_v42  ;;  %v3084_v63 = vpop.f32.mrf.mxu0  ;;  %v3342_v31 = vld [vmem:[#allocation3 + $0x50] sm:$0xff]  ;;  %v3437_v56 = vpack.c.bf16 %v3281_v26, %v3280_v6  ;;  %v9746_v42 = vpack.c.bf16 %v3344_v49, %v3343_v3  ;;  %v9748_v6 = vpop.f32.mrf.mxu1 }
 0x269   : > { %3312 = vst [vmem:[#allocation3 + $0x81] sm:$0xff] %v3279_v51  ;;  %v3284_v61 = vmax.f32 %v9731_v37, 0.0  ;;  %v9741_v43 = vadd.f32 %v9576_v62, %v3211_v24  ;;  %v3214_v25 = vmul.f32 %v9553_v0, %v3175_v23  ;;  %v3173_v19 = vadd.f32 %v3084_v63, %v2868_v53  ;;  %v10859_v53 = vld [vmem:[#allocation53_spill] sm:$0xff] }
 0x26a   : > { %v7681_v5 = vpop.f32.mrf.mxu0  ;;  %v9744_v57 = vpack.c.bf16 %v3342_v31, %v3341_v46  ;;  %v3436_v4 = vpack.c.bf16 %v3279_v51, %v3278_v17  ;;  %7798 = vmatpush3.bf16.msra.mxu1 %v8306_v58  ;;  %v9755_v2 = vadd.f32 %v10860_v59, %v10859_v53  ;;  %v2874_v17 = vadd.f32 %v9594_v27, %v2569_v11  ;;  %v10861_v58 = vld [vmem:[#allocation83_spill] sm:$0xff]  ;;  %v9768_v13 = vpop.f32.mrf.mxu1 }
 0x26b   : > { %7842 = vmatpush3.bf16.msra.mxu0 %v8309_v60  ;;  %3317 = vst [vmem:[#allocation3 + $0xc1] sm:$0xff] %v3284_v61  ;;  %v3282_v21 = vmax.f32 %v9741_v43, 0.0  ;;  %v3253_v10 = vadd.f32 %v9576_v62, %v3214_v25  ;;  %v3212_v26 = vmul.f32 %v9553_v0, %v3173_v19  ;;  %v3178_v44 = vadd.f32 %v7681_v5, %v2873_v12 }
 0x26c   : > { %7799 = vmatprep.subr.bf16.mxu1 %v8307_v18  ;;  %7843 = vmatprep.subr.bf16.mxu0 %v8311_v28  ;;  %v2570_v60 = vadd.f32 %v10861_v58, %v9635_v47  ;;  %v3097_v16 = vpop.f32.mrf.mxu0  ;;  %v2872_v23 = vadd.f32 %v9619_v29, %v2567_v38  ;;  %v2877_v27 = vadd.f32 %v9643_v45, %v2572_v52  ;;  %v10862_v47 = vld [vmem:[#allocation84_spill] sm:$0xff]  ;;  %v8313_v29 = vld [vmem:[#allocation9 + $0x88] sm:$0xff]   ;;  %v8314_v45 = vld [vmem:[#allocation9 + $0xd8] sm:$0xff]  }
 0x26d   : > { %7764 = vmatmul.mubr.bf16.gmra.mxu0 %v9744_v57  ;;  %7720 = vmatmul.mubr.bf16.gmra.mxu1 %v3436_v4  ;;  %3315 = vst [vmem:[#allocation3 + $0xa9] sm:$0xff] %v3282_v21  ;;  %v3285_v51 = vmax.f32 %v3253_v10, 0.0  ;;  %v3251_v12 = vadd.f32 %v9576_v62, %v3212_v26  ;;  %v3217_v37 = vmul.f32 %v9553_v0, %v3178_v44  ;;  %v10864_v38 = vld [vmem:[#allocation86_spill] sm:$0xff]  ;;  %v3345_v10 = vld [vmem:[#allocation3 + $0x78] sm:$0xff] }
 0x26e   : > { %v3176_v24 = vadd.f32 %v3097_v16, %v2871_v9  ;;  %7767 = vmatprep.mubr.bf16.mxu0 %v9746_v42  ;;  %7723 = vmatprep.mubr.bf16.mxu1 %v3437_v56  ;;  %v2573_v11 = vadd.f32 %v10862_v47, %v9639_v22  ;;  %v7682_v49 = vpop.f32.mrf.mxu0  ;;  %v3348_v56 = vld [vmem:[#allocation3 + $0x98] sm:$0xff]  ;;  %v2875_v22 = vadd.f32 %v9660_v8, %v2570_v60  ;;  %v3347_v8 = vld [vmem:[#allocation3 + $0x90] sm:$0xff]  ;;  %v8315_v60 = vld [vmem:[#allocation9 + $0xd0] sm:$0xff]  }
 0x26f   : > { %7800 = vmatpush3.bf16.msra.mxu1 %v8307_v18  ;;  %7844 = vmatpush3.bf16.msra.mxu0 %v8311_v28  ;;  %3318 = vst [vmem:[#allocation3 + $0xc9] sm:$0xff] %v3285_v51  ;;  %v3283_v1 = vmax.f32 %v3251_v12, 0.0  ;;  %v9771_v63 = vadd.f32 %v9576_v62, %v3217_v37  ;;  %v3179_v31 = vadd.f32 %v7682_v49, %v2874_v17  ;;  %v10863_v18 = vld [vmem:[#allocation85_spill] sm:$0xff]  ;;  %v8316_v16 = vld [vmem:[#allocation9 + $0x80] sm:$0xff]   ;;  %v10866_v12 = vld [vmem:[#allocation56_spill] sm:$0xff] }
 0x270   : > { %v3215_v9 = vmul.f32 %v9553_v0, %v3176_v24  ;;  %7801 = vmatprep.subr.bf16.mxu1 %v8310_v15  ;;  %7845 = vmatprep.subr.bf16.mxu0 %v8312_v14  ;;  %v2571_v28 = vadd.f32 %v10863_v18, %v9648_v50  ;;  %v2576_v52 = vadd.f32 %v10864_v38, %v9666_v55  ;;  %v3100_v43 = vpop.f32.mrf.mxu0  ;;  %v3346_v25 = vld [vmem:[#allocation3 + $0x80] sm:$0xff] }
 0x271   : > { %v3439_v19 = vpack.c.bf16 %v3285_v51, %v3284_v61  ;;  %3316 = vst [vmem:[#allocation3 + $0xb1] sm:$0xff] %v3283_v1  ;;  %v3288_v46 = vmax.f32 %v9771_v63, 0.0  ;;  %v3218_v5 = vmul.f32 %v9553_v0, %v3179_v31  ;;  %v3177_v4 = vadd.f32 %v3100_v43, %v2872_v23  ;;  %v9788_v61 = vpop.f32.mrf.mxu1  ;;  %v10865_v51 = vld [vmem:[#allocation55_spill] sm:$0xff] }
 0x272   : > { %v9781_v3 = vadd.f32 %v9576_v62, %v3215_v9  ;;  %v7685_v26 = vpop.f32.mrf.mxu0  ;;  %v9784_v44 = vpack.c.bf16 %v3346_v25, %v3345_v10  ;;  %v9786_v50 = vpack.c.bf16 %v3348_v56, %v3347_v8  ;;  %v3438_v55 = vpack.c.bf16 %v3283_v1, %v3282_v21  ;;  %v10868_v1 = vld [vmem:[#allocation59_spill] sm:$0xff] }
 0x273   : > { %7802 = vmatpush3.bf16.msra.mxu1 %v8310_v15  ;;  %7846 = vmatpush3.bf16.msra.mxu0 %v8312_v14  ;;  %3321 = vst [vmem:[#allocation3 + $0xf1] sm:$0xff] %v3288_v46  ;;  %v3257_v59 = vadd.f32 %v9576_v62, %v3218_v5  ;;  %v3216_v17 = vmul.f32 %v9553_v0, %v3177_v4  ;;  %v10867_v15 = vld [vmem:[#allocation87_spill] sm:$0xff]  ;;  %v9806_v9 = vpop.f32.mrf.mxu1 }
 0x274   : > { %v3286_v53 = vmax.f32 %v9781_v3, 0.0  ;;  %v3182_v58 = vadd.f32 %v7685_v26, %v2877_v27  ;;  %7803 = vmatprep.subr.bf16.mxu1 %v8313_v29  ;;  %7847 = vmatprep.subr.bf16.mxu0 %v8314_v45  ;;  %v2272_v37 = vadd.f32 %v10866_v12, %v10865_v51  ;;  %v2878_v21 = vadd.f32 %v9686_v7, %v2573_v11  ;;  %v3113_v24 = vpop.f32.mrf.mxu0  ;;  %v3349_v8 = vld [vmem:[#allocation3 + $0xa8] sm:$0xff]  ;;  %v3351_v26 = vld [vmem:[#allocation3 + $0xc0] sm:$0xff]  ;;  %v8318_v12 = vld [vmem:[#allocation9 + $0xc0] sm:$0xff]  }
 0x275   : > { %v2574_v14 = vadd.f32 %v10867_v15, %v9670_v33  ;;  %7768 = vmatmul.mubr.bf16.gmra.mxu0 %v9784_v44  ;;  %7724 = vmatmul.mubr.bf16.gmra.mxu1 %v3438_v55  ;;  %v3289_v23 = vmax.f32 %v3257_v59, 0.0  ;;  %v3255_v27 = vadd.f32 %v9576_v62, %v3216_v17  ;;  %v3180_v49 = vadd.f32 %v3113_v24, %v2875_v22 }
 0x276   : > { %3319 = vst [vmem:[#allocation3 + $0xd9] sm:$0xff] %v3286_v53  ;;  %v3221_v47 = vmul.f32 %v9553_v0, %v3182_v58  ;;  %7771 = vmatprep.mubr.bf16.mxu0 %v9786_v50  ;;  %7727 = vmatprep.mubr.bf16.mxu1 %v3439_v19  ;;  %v1968_v7 = vadd.f32 %v10868_v1, %v9532_v54  ;;  %v7686_v63 = vpop.f32.mrf.mxu0  ;;  %v3352_v38 = vld [vmem:[#allocation3 + $0xc8] sm:$0xff]  ;;  %v8317_v54 = vld [vmem:[#allocation9 + $0xc8] sm:$0xff]  }
 0x277   : > { %v2876_v11 = vadd.f32 %v9708_v20, %v2571_v28  ;;  %v2881_v33 = vadd.f32 %v9728_v34, %v2576_v52  ;;  %7804 = vmatpush3.bf16.msra.mxu1 %v8313_v29  ;;  %7848 = vmatpush3.bf16.msra.mxu0 %v8314_v45  ;;  %3322 = vst [vmem:[#allocation3 + $0xf9] sm:$0xff] %v3289_v23  ;;  %v3287_v31 = vmax.f32 %v3255_v27, 0.0  ;;  %v9812_v20 = vld [vmem:[#allocation9 + $0x138] sm:$0xff]   ;;  %v10869_v34 = vld [vmem:[#allocation88_spill] sm:$0xff]  ;;  %v10870_v28 = vld [vmem:[#allocation90_spill] sm:$0xff] }
 0x278   : > { %v9809_v56 = vadd.f32 %v9576_v62, %v3221_v47  ;;  %v3219_v22 = vmul.f32 %v9553_v0, %v3180_v49  ;;  %v3183_v18 = vadd.f32 %v7686_v63, %v2878_v21  ;;  %7849 = vmatprep.subr.bf16.mxu0 %v8315_v60  ;;  %7805 = vmatprep.subr.bf16.mxu1 %v8316_v16  ;;  %v3116_v43 = vpop.f32.mrf.mxu0  ;;  %v3350_v25 = vld [vmem:[#allocation3 + $0xb0] sm:$0xff] }
 0x279   : > { %v2577_v29 = vadd.f32 %v10869_v34, %v9682_v35  ;;  %v2879_v45 = vadd.f32 %v9748_v6, %v2574_v14  ;;  %v2575_v52 = vadd.f32 %v10870_v28, %v9714_v41  ;;  %v3441_v19 = vpack.c.bf16 %v3289_v23, %v3288_v46  ;;  %3320 = vst [vmem:[#allocation3 + $0xe1] sm:$0xff] %v3287_v31  ;;  %v2840_v46 = vpop.f32.mrf.mxu1  ;;  %v10872_v27 = vld [vmem:[#allocation58_spill] sm:$0xff] }
 0x27a   : > { %v3292_v3 = vmax.f32 %v9809_v56, 0.0  ;;  %v9821_v5 = vadd.f32 %v9576_v62, %v3219_v22  ;;  %v3222_v4 = vmul.f32 %v9553_v0, %v3183_v18  ;;  %v3181_v10 = vadd.f32 %v3116_v43, %v2876_v11  ;;  %v7689_v35 = vpop.f32.mrf.mxu0  ;;  %v9848_v56 = vld [vmem:[#allocation9 + $0x178] sm:$0xff]   ;;  %v3355_v43 = vld [vmem:[#allocation3 + $0xf0] sm:$0xff] }
 0x27b   : > { %v9824_v55 = vpack.c.bf16 %v3350_v25, %v3349_v8  ;;  %v9826_v6 = vpack.c.bf16 %v3352_v38, %v3351_v26  ;;  %v3440_v41 = vpack.c.bf16 %v3287_v31, %v3286_v53  ;;  %7850 = vmatpush3.bf16.msra.mxu0 %v8315_v60  ;;  %7806 = vmatpush3.bf16.msra.mxu1 %v8316_v16  ;;  %v7646_v49 = vpop.f32.mrf.mxu1 }
 0x27c   : > { %3325 = vst [vmem:[#allocation3 + $0x121] sm:$0xff] %v3292_v3  ;;  %v3290_v59 = vmax.f32 %v9821_v5, 0.0  ;;  %v3261_v17 = vadd.f32 %v9576_v62, %v3222_v4  ;;  %v3220_v58 = vmul.f32 %v9553_v0, %v3181_v10  ;;  %v3186_v51 = vadd.f32 %v7689_v35, %v2881_v33  ;;  %7851 = vmatprep.subr.bf16.mxu0 %v8317_v54  ;;  %v3129_v16 = vpop.f32.mrf.mxu0 }
 0x27d   : > { %7887 = vmatprep.subr.bf16.mxu1 %v9812_v20  ;;  %v2882_v21 = vadd.f32 %v9768_v13, %v2577_v29  ;;  %v2580_v53 = vadd.f32 %v9495_v30, %v9755_v2  ;;  %v2578_v60 = vadd.f32 %v9508_v39, %v2272_v37  ;;  %7772 = vmatmul.mubr.bf16.gmra.mxu0 %v9824_v55  ;;  %v10871_v13 = vld [vmem:[#allocation57_spill] sm:$0xff]  ;;  %v10873_v30 = vld [vmem:[#allocation60_spill] sm:$0xff] }
 0x27e   : > { %7728 = vmatmul.mubr.bf16.gmra.mxu1 %v3440_v41  ;;  %3323 = vst [vmem:[#allocation3 + $0x109] sm:$0xff] %v3290_v59  ;;  %v3293_v15 = vmax.f32 %v3261_v17, 0.0  ;;  %v3259_v14 = vadd.f32 %v9576_v62, %v3220_v58  ;;  %v3225_v24 = vmul.f32 %v9553_v0, %v3186_v51  ;;  %v3184_v23 = vadd.f32 %v3129_v16, %v2879_v45  ;;  %v7690_v37 = vpop.f32.mrf.mxu0  ;;  %v3356_v31 = vld [vmem:[#allocation3 + $0xf8] sm:$0xff] }
 0x27f   : > { %7775 = vmatprep.mubr.bf16.mxu0 %v9826_v6  ;;  %7731 = vmatprep.mubr.bf16.mxu1 %v3441_v19  ;;  %v2275_v47 = vadd.f32 %v10872_v27, %v10871_v13  ;;  %v2273_v2 = vadd.f32 %v10873_v30, %v1968_v7  ;;  %v2880_v39 = vadd.f32 %v9788_v61, %v2575_v52  ;;  %v3353_v52 = vld [vmem:[#allocation3 + $0xd8] sm:$0xff] }
 0x280   : > { %7852 = vmatpush3.bf16.msra.mxu0 %v8317_v54  ;;  %3326 = vst [vmem:[#allocation3 + $0x129] sm:$0xff] %v3293_v15  ;;  %v9844_v1 = vmax.f32 %v3259_v14, 0.0  ;;  %v3264_v11 = vadd.f32 %v9576_v62, %v3225_v24  ;;  %v3223_v33 = vmul.f32 %v9553_v0, %v3184_v23  ;;  %v3187_v63 = vadd.f32 %v7690_v37, %v2882_v21  ;;  %v3132_v18 = vpop.f32.mrf.mxu0  ;;  %v3354_v38 = vld [vmem:[#allocation3 + $0xe0] sm:$0xff] }
 0x281   : > { %7853 = vmatprep.subr.bf16.mxu0 %v8318_v12  ;;  %v2885_v22 = vadd.f32 %v9806_v9, %v2580_v53  ;;  %v2581_v7 = vadd.f32 %v9517_v36, %v2275_v47  ;;  %v2883_v61 = vadd.f32 %v2840_v46, %v2578_v60  ;;  %v3443_v54 = vpack.c.bf16 %v3293_v15, %v3292_v3  ;;  %v2843_v3 = vpop.f32.mrf.mxu1 }
 0x282   : > { %3324 = vst [vmem:[#allocation3 + $0x111] sm:$0xff] %v9844_v1  ;;  %v3296_v34 = vmax.f32 %v3264_v11, 0.0  ;;  %v3262_v29 = vadd.f32 %v9576_v62, %v3223_v33  ;;  %v3226_v45 = vmul.f32 %v9553_v0, %v3187_v63  ;;  %v3185_v28 = vadd.f32 %v3132_v18, %v2880_v39  ;;  %v7693_v19 = vpop.f32.mrf.mxu0 }
 0x283   : > { %v2579_v25 = vadd.f32 %v9536_v40, %v2273_v2  ;;  %v9856_v9 = vpack.c.bf16 %v3354_v38, %v3353_v52  ;;  %v9858_v36 = vpack.c.bf16 %v3356_v31, %v3355_v43  ;;  %v3442_v5 = vpack.c.bf16 %v9844_v1, %v3290_v59  ;;  %v3359_v39 = vld [vmem:[#allocation3 + $0x120] sm:$0xff] }
 0x284   : > { %7854 = vmatpush3.bf16.msra.mxu0 %v8318_v12  ;;  %3329 = vst [vmem:[#allocation3 + $0x151] sm:$0xff] %v3296_v34  ;;  %v3294_v4 = vmax.f32 %v3262_v29, 0.0  ;;  %v3265_v10 = vadd.f32 %v9576_v62, %v3226_v45  ;;  %v3224_v8 = vmul.f32 %v9553_v0, %v3185_v28  ;;  %v3190_v26 = vadd.f32 %v7693_v19, %v2885_v22  ;;  %v3145_v40 = vpop.f32.mrf.mxu0  ;;  %v3883_v52 = vld [vmem:[#allocation3 + $0x1a] sm:$0xff]  ;;  %v3884_v43 = vld [vmem:[#allocation3 + $0x22] sm:$0xff] }
 0x285   : > { %7935 = vmatprep.subr.bf16.mxu0 %v9848_v56  ;;  %v2886_v35 = vadd.f32 %v7646_v49, %v2581_v7  ;;  %7776 = vmatmul.mubr.bf16.gmra.mxu0 %v9856_v9  ;;  %v3188_v17 = vadd.f32 %v3145_v40, %v2883_v61  ;;  %v2884_v58 = vadd.f32 %v2843_v3, %v2579_v25  ;;  %v3357_v30 = vld [vmem:[#allocation3 + $0x108] sm:$0xff]  ;;  %v3885_v25 = vld [vmem:[#allocation3 + $0x32] sm:$0xff]  ;;  %v3886_v3 = vld [vmem:[#allocation3 + $0x3a] sm:$0xff] }
 0x286   : > { %7732 = vmatmul.mubr.bf16.gmra.mxu1 %v3442_v5  ;;  %3327 = vst [vmem:[#allocation3 + $0x139] sm:$0xff] %v3294_v4  ;;  %v9865_v41 = vmax.f32 %v3265_v10, 0.0  ;;  %v3263_v46 = vadd.f32 %v9576_v62, %v3224_v8  ;;  %v3229_v59 = vmul.f32 %v9553_v0, %v3190_v26  ;;  %7779 = vmatprep.mubr.bf16.mxu0 %v9858_v36  ;;  %v7694_v51 = vpop.f32.mrf.mxu0  ;;  %v3881_v7 = vld [vmem:[#allocation3 + $0x2] sm:$0xff]  ;;  %v3882_v61 = vld [vmem:[#allocation3 + $0xa] sm:$0xff]  ;;  %v3888_v40 = vld [vmem:[#allocation3 + $0x52] sm:$0xff] }
 0x287   : > { %7735 = vmatprep.mubr.bf16.mxu1 %v3443_v54  ;;  %v3227_v53 = vmul.f32 %v9553_v0, %v3188_v17  ;;  %v3191_v60 = vadd.f32 %v7694_v51, %v2886_v35  ;;  %v3360_v14 = vld [vmem:[#allocation3 + $0x128] sm:$0xff]  ;;  %v3913_v45 = vpack.c.bf16 %v3882_v61, %v3881_v7  ;;  %v9904_v10 = vpack.c.bf16 %v3884_v43, %v3883_v52  ;;  %v8320_v26 = vld [vmem:[#allocation9 + $0x130] sm:$0xff]  }
 0x288   : > { %3330 = vst [vmem:[#allocation3 + $0x159] sm:$0xff] %v9865_v41  ;;  %v3295_v12 = vmax.f32 %v3263_v46, 0.0  ;;  %v3268_v21 = vadd.f32 %v9576_v62, %v3229_v59  ;;  %v3148_v16 = vpop.f32.mrf.mxu0  ;;  %v3445_v24 = vpack.c.bf16 %v9865_v41, %v3296_v34  ;;  %v9884_v63 = vpack.c.bf16 %v3360_v14, %v3359_v39  ;;  %v3887_v35 = vld [vmem:[#allocation3 + $0x4a] sm:$0xff]  ;;  %v8321_v46 = vld [vmem:[#allocation9 + $0x128] sm:$0xff]   ;;  %v3889_v59 = vld [vmem:[#allocation3 + $0x62] sm:$0xff] }
 0x289   : > { %v3358_v15 = vld [vmem:[#allocation3 + $0x110] sm:$0xff]  ;;  %v3266_v13 = vadd.f32 %v9576_v62, %v3227_v53  ;;  %v3230_v27 = vmul.f32 %v9553_v0, %v3191_v60  ;;  %v3189_v47 = vadd.f32 %v3148_v16, %v2884_v58  ;;  %v9906_v8 = vpack.c.bf16 %v3886_v3, %v3885_v25  ;;  %v3892_v53 = vld [vmem:[#allocation3 + $0x82] sm:$0xff]  ;;  %v8327_v60 = vld [vmem:[#allocation9 + $0x168] sm:$0xff]  }
 0x28a   : > { %3328 = vst [vmem:[#allocation3 + $0x141] sm:$0xff] %v3295_v12  ;;  %v3300_v23 = vmax.f32 %v3268_v21, 0.0  ;;  %v9876_v2 = vpack.c.bf16 %v3358_v15, %v3357_v30  ;;  %v9878_v37 = vpack.c.bf16 %v3295_v12, %v3294_v4  ;;  %v3890_v17 = vld [vmem:[#allocation3 + $0x6a] sm:$0xff]  ;;  %v9913_v58 = vpack.c.bf16 %v3888_v40, %v3887_v35  ;;  %v8325_v21 = vld [vmem:[#allocation9 + $0x170] sm:$0xff]   ;;  %v3893_v16 = vld [vmem:[#allocation3 + $0x92] sm:$0xff] }
 0x28b   : > { %v3298_v49 = vmax.f32 %v3266_v13, 0.0  ;;  %v9881_v11 = vadd.f32 %v9576_v62, %v3230_v27  ;;  %v3228_v33 = vmul.f32 %v9553_v0, %v3189_v47  ;;  %v3363_v28 = vld [vmem:[#allocation3 + $0x150] sm:$0xff]  ;;  %v9915_v51 = vpack.c.bf16 %v3890_v17, %v3889_v59  ;;  %v3894_v15 = vld [vmem:[#allocation3 + $0x9a] sm:$0xff]  ;;  %v8330_v27 = vld [vmem:[#allocation9 + $0x158] sm:$0xff]  }
 0x28c   : > { %3333 = vst [vmem:[#allocation3 + $0x181] sm:$0xff] %v3300_v23  ;;  %v8322_v12 = vld [vmem:[#allocation9 + $0x120] sm:$0xff]   ;;  %v3897_v47 = vld [vmem:[#allocation3 + $0xc2] sm:$0xff]  ;;  %v4491_v59 = vld [vmem:[#allocation3 + $0x19] sm:$0xff] }
 0x28d   : > { %7780 = vmatmul.mubr.bf16.gmra.mxu0 %v9876_v2  ;;  %3331 = vst [vmem:[#allocation3 + $0x169] sm:$0xff] %v3298_v49  ;;  %v3301_v31 = vmax.f32 %v9881_v11, 0.0  ;;  %v3267_v22 = vadd.f32 %v9576_v62, %v3228_v33  ;;  %v3361_v18 = vld [vmem:[#allocation3 + $0x138] sm:$0xff]  ;;  %v3895_v23 = vld [vmem:[#allocation3 + $0xaa] sm:$0xff]  ;;  %v3900_v7 = vld [vmem:[#allocation3 + $0xe2] sm:$0xff] }
 0x28e   : > { %7736 = vmatmul.mubr.bf16.gmra.mxu1 %v9878_v37  ;;  %7783 = vmatprep.mubr.bf16.mxu0 %v9884_v63  ;;  %v3896_v13 = vld [vmem:[#allocation3 + $0xb2] sm:$0xff]  ;;  %v3898_v30 = vld [vmem:[#allocation3 + $0xca] sm:$0xff]  ;;  %v3905_v52 = vld [vmem:[#allocation3 + $0x122] sm:$0xff] }
 0x28f   : > { %7739 = vmatprep.mubr.bf16.mxu1 %v3445_v24  ;;  %3334 = vst [vmem:[#allocation3 + $0x189] sm:$0xff] %v3301_v31  ;;  %v3299_v0 = vmax.f32 %v3267_v22, 0.0  ;;  %v3364_v54 = vld [vmem:[#allocation3 + $0x158] sm:$0xff]  ;;  %v8328_v24 = vld [vmem:[#allocation9 + $0x160] sm:$0xff]   ;;  %v9930_v39 = vpack.c.bf16 %v3896_v13, %v3895_v23  ;;  %v8335_v61 = vld [vmem:[#allocation9 + $0x1b8] sm:$0xff]  }
 0x290   : > { %v9897_v62 = vpack.c.bf16 %v3364_v54, %v3363_v28  ;;  %v8333_v33 = vld [vmem:[#allocation9 + $0x148] sm:$0xff]   ;;  %v3903_v54 = vld [vmem:[#allocation3 + $0x10a] sm:$0xff]  ;;  %v4492_v40 = vld [vmem:[#allocation3 + $0x21] sm:$0xff] }
 0x291   : > { %v3362_v38 = vld [vmem:[#allocation3 + $0x140] sm:$0xff]  ;;  %3332 = vst [vmem:[#allocation3 + $0x171] sm:$0xff] %v3299_v0  ;;  %v9895_v29 = vpack.c.bf16 %v3299_v0, %v3298_v49  ;;  %v8332_v49 = vld [vmem:[#allocation9 + $0x100] sm:$0xff]   ;;  %v8340_v28 = vld [vmem:[#allocation9 + $0x1f8] sm:$0xff]   ;;  %v4523_v17 = vpack.c.bf16 %v4492_v40, %v4491_v59 }
 0x292   : > { %v9893_v34 = vpack.c.bf16 %v3362_v38, %v3361_v18  ;;  %v3899_v22 = vld [vmem:[#allocation3 + $0xda] sm:$0xff]  ;;  %v3901_v0 = vld [vmem:[#allocation3 + $0xf2] sm:$0xff]  ;;  %v3906_v43 = vld [vmem:[#allocation3 + $0x12a] sm:$0xff] }
 0x293   : > { %v3902_v18 = vld [vmem:[#allocation3 + $0xfa] sm:$0xff]  ;;  %v9938_v38 = vpack.c.bf16 %v3900_v7, %v3899_v22  ;;  %v4503_v7 = vld [vmem:[#allocation3 + $0xa9] sm:$0xff] }
 0x294   : > { %v3365_v19 = vld [vmem:[#allocation3 + $0x168] sm:$0xff]  ;;  %v3910_v3 = vld [vmem:[#allocation3 + $0x15a] sm:$0xff] }
 0x295   : > { %7784 = vmatmul.mubr.bf16.gmra.mxu0 %v9893_v34  ;;  %v4499_v23 = vld [vmem:[#allocation3 + $0x79] sm:$0xff]  ;;  %v4514_v40 = vld [vmem:[#allocation3 + $0x129] sm:$0xff]  ;;  %v4513_v59 = vld [vmem:[#allocation3 + $0x121] sm:$0xff] }
 0x296   : > { %7740 = vmatmul.mubr.bf16.gmra.mxu1 %v9895_v29  ;;  %7787 = vmatprep.mubr.bf16.mxu0 %v9897_v62  ;;  %v8352_v11 = vld [vmem:[#allocation9 + $0x230] sm:$0xff]  }
 0x297   : > { %7807 = vmatprep.mubr.bf16.mxu1 %v3913_v45  ;;  %v3904_v45 = vld [vmem:[#allocation3 + $0x112] sm:$0xff] }
 0x298   : > { %v3366_v5 = vld [vmem:[#allocation3 + $0x170] sm:$0xff]  ;;  %v9946_v25 = vpack.c.bf16 %v3904_v45, %v3903_v54  ;;  %v4508_v54 = vld [vmem:[#allocation3 + $0xe1] sm:$0xff] }
 0x299   : > { %v9902_v4 = vpack.c.bf16 %v3366_v5, %v3365_v19  ;;  %v9948_v19 = vpack.c.bf16 %v3906_v43, %v3905_v52  ;;  %v3909_v5 = vld [vmem:[#allocation3 + $0x152] sm:$0xff]  ;;  %v4505_v45 = vld [vmem:[#allocation3 + $0xc1] sm:$0xff] }
 0x29a   : > { %v9956_v35 = vpack.c.bf16 %v3910_v3, %v3909_v5  ;;  %v4507_v52 = vld [vmem:[#allocation3 + $0xd9] sm:$0xff]  ;;  %v8348_v43 = vld [vmem:[#allocation9 + $0x180] sm:$0xff]   ;;  %v8351_v5 = vld [vmem:[#allocation9 + $0x238] sm:$0xff]  }
 0x29b   : > { %v10001_v3 = vld [vmem:[#allocation3 + $0x109] sm:$0xff] }
 0x29d   : > { %7788 = vmatmul.mubr.bf16.gmra.mxu0 %v9902_v4 }
 0x29e   : > { %7808 = vmatmul.mubr.bf16.vlgmr.msra.gmra.mxu1 %v9904_v10  ;;  %7855 = vmatprep.mubr.bf16.mxu0 %v9704_v32  ;;  %v8323_v32 = vld [vmem:[#allocation9 + $0x118] sm:$0xff]  }
 0x29f   : > { %7811 = vmatprep.mubr.bf16.mxu1 %v9906_v8  ;;  %7888 = vmatpush3.bf16.msra.mxu1 %v9812_v20  ;;  %v3891_v20 = vld [vmem:[#allocation3 + $0x7a] sm:$0xff] }
 0x2a0   : > { %7889 = vmatprep.subr.bf16.mxu1 %v8320_v26  ;;  %v9922_v14 = vpack.c.bf16 %v3892_v53, %v3891_v20 }
 0x2a3   : > { %7890 = vmatpush3.bf16.msra.mxu1 %v8320_v26 }
 0x2a4   : > { %7891 = vmatprep.subr.bf16.mxu1 %v8321_v46 }
 0x2a5   : > { %7856 = vmatmul.mubr.bf16.vlgmr.msra.gmra.mxu0 %v9706_v48  ;;  %v9924_v48 = vpack.c.bf16 %v3894_v15, %v3893_v16  ;;  %v8336_v15 = vld [vmem:[#allocation9 + $0x1b0] sm:$0xff]  }
 0x2a6   : > { %7812 = vmatmul.mubr.bf16.gmra.mxu1 %v9913_v58  ;;  %7859 = vmatprep.mubr.bf16.mxu0 %v9744_v57  ;;  %v8326_v57 = vld [vmem:[#allocation9 + $0x110] sm:$0xff]  }
 0x2a7   : > { %7815 = vmatprep.mubr.bf16.mxu1 %v9915_v51  ;;  %7892 = vmatpush3.bf16.msra.mxu1 %v8321_v46 }
 0x2a8   : > { %7936 = vmatpush3.bf16.msra.mxu0 %v9848_v56  ;;  %7893 = vmatprep.subr.bf16.mxu1 %v8322_v12  ;;  %v8329_v56 = vld [vmem:[#allocation9 + $0x108] sm:$0xff]  }
 0x2a9   : > { %7937 = vmatprep.subr.bf16.mxu0 %v8325_v21 }
 0x2ab   : > { %7894 = vmatpush3.bf16.msra.mxu1 %v8322_v12  ;;  %v4494_v12 = vld [vmem:[#allocation3 + $0x39] sm:$0xff] }
 0x2ac   : > { %7938 = vmatpush3.bf16.msra.mxu0 %v8325_v21  ;;  %7895 = vmatprep.subr.bf16.mxu1 %v8323_v32  ;;  %v4496_v21 = vld [vmem:[#allocation3 + $0x51] sm:$0xff] }
 0x2ad   : > { %7939 = vmatprep.subr.bf16.mxu0 %v8327_v60  ;;  %7860 = vmatmul.mubr.bf16.gmra.mxu0 %v9746_v42  ;;  %v9932_v42 = vpack.c.bf16 %v3898_v30, %v3897_v47  ;;  %v8341_v47 = vld [vmem:[#allocation9 + $0x1f0] sm:$0xff]   ;;  %v8339_v30 = vld [vmem:[#allocation9 + $0x198] sm:$0xff]  }
 0x2ae   : > { %7816 = vmatmul.mubr.bf16.gmra.mxu1 %v9922_v14  ;;  %7863 = vmatprep.mubr.bf16.mxu0 %v9784_v44  ;;  %v8331_v44 = vld [vmem:[#allocation9 + $0x150] sm:$0xff]  }
 0x2af   : > { %7819 = vmatprep.mubr.bf16.mxu1 %v9924_v48  ;;  %7896 = vmatpush3.bf16.msra.mxu1 %v8323_v32  ;;  %v4493_v32 = vld [vmem:[#allocation3 + $0x31] sm:$0xff] }
 0x2b0   : > { %7940 = vmatpush3.bf16.msra.mxu0 %v8327_v60  ;;  %7897 = vmatprep.subr.bf16.mxu1 %v8326_v57  ;;  %v9969_v53 = vpack.c.bf16 %v4494_v12, %v4493_v32  ;;  %v4495_v60 = vld [vmem:[#allocation3 + $0x49] sm:$0xff]  ;;  %v5106_v32 = vld [vmem:[#allocation3 + $0x60] sm:$0xff] }
 0x2b1   : > { %7941 = vmatprep.subr.bf16.mxu0 %v8328_v24  ;;  %v9971_v16 = vpack.c.bf16 %v4496_v21, %v4495_v60  ;;  %v5107_v12 = vld [vmem:[#allocation3 + $0x68] sm:$0xff] }
 0x2b2   : > { %v5136_v60 = vpack.c.bf16 %v5107_v12, %v5106_v32  ;;  %v8358_v32 = vld [vmem:[#allocation9 + $0x200] sm:$0xff]  }
 0x2b3   : > { %7898 = vmatpush3.bf16.msra.mxu1 %v8326_v57  ;;  %v4500_v57 = vld [vmem:[#allocation3 + $0x81] sm:$0xff] }
 0x2b4   : > { %7942 = vmatpush3.bf16.msra.mxu0 %v8328_v24  ;;  %7899 = vmatprep.subr.bf16.mxu1 %v8329_v56  ;;  %v4497_v24 = vld [vmem:[#allocation3 + $0x61] sm:$0xff]  ;;  %v9979_v13 = vpack.c.bf16 %v4500_v57, %v4499_v23  ;;  %v5108_v57 = vld [vmem:[#allocation3 + $0x78] sm:$0xff] }
 0x2b5   : > { %7943 = vmatprep.subr.bf16.mxu0 %v8330_v27  ;;  %7864 = vmatmul.mubr.bf16.gmra.mxu0 %v9786_v50  ;;  %v9940_v50 = vpack.c.bf16 %v3902_v18, %v3901_v0  ;;  %v4506_v0 = vld [vmem:[#allocation3 + $0xc9] sm:$0xff]  ;;  %v8345_v18 = vld [vmem:[#allocation9 + $0x188] sm:$0xff]  }
 0x2b6   : > { %7820 = vmatmul.mubr.bf16.gmra.mxu1 %v9930_v39  ;;  %7867 = vmatprep.mubr.bf16.mxu0 %v9824_v55  ;;  %v8334_v55 = vld [vmem:[#allocation9 + $0x140] sm:$0xff]  }
 0x2b7   : > { %7823 = vmatprep.mubr.bf16.mxu1 %v9932_v42  ;;  %7900 = vmatpush3.bf16.msra.mxu1 %v8329_v56 }
 0x2b8   : > { %7944 = vmatpush3.bf16.msra.mxu0 %v8330_v27  ;;  %7901 = vmatprep.subr.bf16.mxu1 %v8332_v49  ;;  %v8338_v27 = vld [vmem:[#allocation9 + $0x1a0] sm:$0xff]  }
 0x2b9   : > { %7945 = vmatprep.subr.bf16.mxu0 %v8331_v44 }
 0x2bb   : > { %7902 = vmatpush3.bf16.msra.mxu1 %v8332_v49  ;;  %v4504_v49 = vld [vmem:[#allocation3 + $0xb1] sm:$0xff] }
 0x2bc   : > { %7946 = vmatpush3.bf16.msra.mxu0 %v8331_v44  ;;  %7983 = vmatprep.subr.bf16.mxu1 %v8335_v61  ;;  %v8343_v44 = vld [vmem:[#allocation9 + $0x1e8] sm:$0xff]  }
 0x2bd   : > { %7947 = vmatprep.subr.bf16.mxu0 %v8333_v33  ;;  %7868 = vmatmul.mubr.bf16.gmra.mxu0 %v9826_v6  ;;  %v3907_v6 = vld [vmem:[#allocation3 + $0x13a] sm:$0xff] }
 0x2be   : > { %7824 = vmatmul.mubr.bf16.gmra.mxu1 %v9938_v38  ;;  %7871 = vmatprep.mubr.bf16.mxu0 %v9856_v9  ;;  %v3908_v9 = vld [vmem:[#allocation3 + $0x142] sm:$0xff] }
 0x2bf   : > { %7827 = vmatprep.mubr.bf16.mxu1 %v9940_v50  ;;  %v9954_v26 = vpack.c.bf16 %v3908_v9, %v3907_v6  ;;  %v4510_v6 = vld [vmem:[#allocation3 + $0xf9] sm:$0xff] }
 0x2c0   : > { %7948 = vmatpush3.bf16.msra.mxu0 %v8333_v33  ;;  %v4501_v33 = vld [vmem:[#allocation3 + $0x91] sm:$0xff] }
 0x2c1   : > { %7949 = vmatprep.subr.bf16.mxu0 %v8334_v55  ;;  %v8349_v9 = vld [vmem:[#allocation9 + $0x1c8] sm:$0xff]  }
 0x2c4   : > { %7950 = vmatpush3.bf16.msra.mxu0 %v8334_v55  ;;  %v8346_v55 = vld [vmem:[#allocation9 + $0x1d8] sm:$0xff]  }
 0x2c5   : > { %8031 = vmatprep.subr.bf16.mxu0 %v8340_v28  ;;  %7872 = vmatmul.mubr.bf16.gmra.mxu0 %v9858_v36  ;;  %v3911_v36 = vld [vmem:[#allocation3 + $0x16a] sm:$0xff] }
 0x2c6   : > { %7828 = vmatmul.mubr.bf16.gmra.mxu1 %v9946_v25  ;;  %7875 = vmatprep.mubr.bf16.mxu0 %v9876_v2  ;;  %v3912_v2 = vld [vmem:[#allocation3 + $0x172] sm:$0xff] }
 0x2c7   : > { %7831 = vmatprep.mubr.bf16.mxu1 %v9948_v19  ;;  %v9962_v46 = vpack.c.bf16 %v3912_v2, %v3911_v36  ;;  %v4509_v36 = vld [vmem:[#allocation3 + $0xf1] sm:$0xff] }
 0x2c8   : > { %v10003_v2 = vpack.c.bf16 %v4510_v6, %v4509_v36 }
 0x2cd   : > { %7876 = vmatmul.mubr.bf16.gmra.mxu0 %v9884_v63  ;;  %v4217_v63 = vld [vmem:[#allocation3 + $0x188] sm:$0xff] }
 0x2ce   : > { %7832 = vmatmul.mubr.bf16.gmra.mxu1 %v9954_v26  ;;  %7879 = vmatprep.mubr.bf16.mxu0 %v9893_v34  ;;  %v4216_v34 = vld [vmem:[#allocation3 + $0x180] sm:$0xff] }
 0x2cf   : > { %7835 = vmatprep.mubr.bf16.mxu1 %v9956_v35  ;;  %v9967_v20 = vpack.c.bf16 %v4217_v63, %v4216_v34 }
 0x2d5   : > { %7880 = vmatmul.mubr.bf16.gmra.mxu0 %v9897_v62  ;;  %v4498_v62 = vld [vmem:[#allocation3 + $0x69] sm:$0xff] }
 0x2d6   : > { %7836 = vmatmul.mubr.bf16.gmra.mxu1 %v9962_v46  ;;  %7883 = vmatprep.mubr.bf16.mxu0 %v9902_v4  ;;  %v8337_v4 = vld [vmem:[#allocation9 + $0x1a8] sm:$0xff]   ;;  %v9977_v56 = vpack.c.bf16 %v4498_v62, %v4497_v24 }
 0x2d7   : > { %7903 = vmatprep.mubr.bf16.mxu1 %v4523_v17  ;;  %v10010_v17 = vpack.c.bf16 %v4514_v40, %v4513_v59 }
 0x2dd   : > { %7884 = vmatmul.mubr.bf16.gmra.mxu0 %v9967_v20 }
 0x2de   : > { %7904 = vmatmul.mubr.bf16.vlgmr.msra.gmra.mxu1 %v9969_v53  ;;  %7951 = vmatprep.mubr.bf16.mxu0 %v9904_v10  ;;  %v4502_v10 = vld [vmem:[#allocation3 + $0x99] sm:$0xff] }
 0x2df   : > { %7907 = vmatprep.mubr.bf16.mxu1 %v9971_v16  ;;  %7984 = vmatpush3.bf16.msra.mxu1 %v8335_v61  ;;  %v9985_v22 = vpack.c.bf16 %v4502_v10, %v4501_v33  ;;  %v8344_v61 = vld [vmem:[#allocation9 + $0x1e0] sm:$0xff]  }
 0x2e0   : > { %7985 = vmatprep.subr.bf16.mxu1 %v8336_v15  ;;  %v8354_v10 = vld [vmem:[#allocation9 + $0x220] sm:$0xff]  }
 0x2e3   : > { %7986 = vmatpush3.bf16.msra.mxu1 %v8336_v15  ;;  %v8353_v15 = vld [vmem:[#allocation9 + $0x228] sm:$0xff]  }
 0x2e4   : > { %7987 = vmatprep.subr.bf16.mxu1 %v8337_v4 }
 0x2e5   : > { %7952 = vmatmul.mubr.bf16.vlgmr.msra.gmra.mxu0 %v9906_v8  ;;  %v9987_v8 = vpack.c.bf16 %v4504_v49, %v4503_v7 }
 0x2e6   : > { %7908 = vmatmul.mubr.bf16.gmra.mxu1 %v9977_v56  ;;  %7955 = vmatprep.mubr.bf16.mxu0 %v9913_v58  ;;  %v8342_v58 = vld [vmem:[#allocation9 + $0x190] sm:$0xff]  }
 0x2e7   : > { %7911 = vmatprep.mubr.bf16.mxu1 %v9979_v13  ;;  %7988 = vmatpush3.bf16.msra.mxu1 %v8337_v4  ;;  %v5111_v4 = vld [vmem:[#allocation3 + $0x98] sm:$0xff] }
 0x2e8   : > { %8032 = vmatpush3.bf16.msra.mxu0 %v8340_v28  ;;  %7989 = vmatprep.subr.bf16.mxu1 %v8338_v27  ;;  %v9993_v28 = vpack.c.bf16 %v4506_v0, %v4505_v45 }
 0x2e9   : > { %8033 = vmatprep.subr.bf16.mxu0 %v8341_v47 }
 0x2eb   : > { %7990 = vmatpush3.bf16.msra.mxu1 %v8338_v27  ;;  %v5110_v27 = vld [vmem:[#allocation3 + $0x90] sm:$0xff] }
 0x2ec   : > { %8034 = vmatpush3.bf16.msra.mxu0 %v8341_v47  ;;  %7991 = vmatprep.subr.bf16.mxu1 %v8339_v30  ;;  %v5138_v47 = vpack.c.bf16 %v5111_v4, %v5110_v27 }
 0x2ed   : > { %8035 = vmatprep.subr.bf16.mxu0 %v8343_v44  ;;  %7956 = vmatmul.mubr.bf16.gmra.mxu0 %v9915_v51  ;;  %v9995_v51 = vpack.c.bf16 %v4508_v54, %v4507_v52 }
 0x2ee   : > { %7912 = vmatmul.mubr.bf16.gmra.mxu1 %v9985_v22  ;;  %7959 = vmatprep.mubr.bf16.mxu0 %v9922_v14  ;;  %v8347_v14 = vld [vmem:[#allocation9 + $0x1d0] sm:$0xff]  }
 0x2ef   : > { %7915 = vmatprep.mubr.bf16.mxu1 %v9987_v8  ;;  %7992 = vmatpush3.bf16.msra.mxu1 %v8339_v30 }
 0x2f0   : > { %8036 = vmatpush3.bf16.msra.mxu0 %v8343_v44  ;;  %7993 = vmatprep.subr.bf16.mxu1 %v8342_v58 }
 0x2f1   : > { %8037 = vmatprep.subr.bf16.mxu0 %v8344_v61 }
 0x2f3   : > { %7994 = vmatpush3.bf16.msra.mxu1 %v8342_v58  ;;  %v5113_v58 = vld [vmem:[#allocation3 + $0xb0] sm:$0xff] }
 0x2f4   : > { %8038 = vmatpush3.bf16.msra.mxu0 %v8344_v61  ;;  %7995 = vmatprep.subr.bf16.mxu1 %v8345_v18  ;;  %v8355_v61 = vld [vmem:[#allocation9 + $0x218] sm:$0xff]  }
 0x2f5   : > { %8039 = vmatprep.subr.bf16.mxu0 %v8346_v55  ;;  %7960 = vmatmul.mubr.bf16.gmra.mxu0 %v9924_v48  ;;  %v4533_v48 = vpack.c.bf16 %v9844_v1, %v10001_v3  ;;  %v10016_v1 = vld [vmem:[#allocation3 + $0x151] sm:$0xff] }
 0x2f6   : > { %7916 = vmatmul.mubr.bf16.gmra.mxu1 %v9993_v28  ;;  %7963 = vmatprep.mubr.bf16.mxu0 %v9930_v39  ;;  %v8350_v39 = vld [vmem:[#allocation9 + $0x1c0] sm:$0xff]  }
 0x2f7   : > { %7919 = vmatprep.mubr.bf16.mxu1 %v9995_v51  ;;  %7996 = vmatpush3.bf16.msra.mxu1 %v8345_v18 }
 0x2f8   : > { %8040 = vmatpush3.bf16.msra.mxu0 %v8346_v55  ;;  %7997 = vmatprep.subr.bf16.mxu1 %v8348_v43  ;;  %v5115_v55 = vld [vmem:[#allocation3 + $0xc8] sm:$0xff] }
 0x2f9   : > { %8041 = vmatprep.subr.bf16.mxu0 %v8347_v14 }
 0x2fb   : > { %7998 = vmatpush3.bf16.msra.mxu1 %v8348_v43  ;;  %v5114_v43 = vld [vmem:[#allocation3 + $0xc0] sm:$0xff] }
 0x2fc   : > { %8042 = vmatpush3.bf16.msra.mxu0 %v8347_v14  ;;  %8079 = vmatprep.subr.bf16.mxu1 %v8351_v5  ;;  %v5140_v6 = vpack.c.bf16 %v5115_v55, %v5114_v43  ;;  %v5426_v55 = vld [vmem:[#allocation3 + $0x111] sm:$0xff] }
 0x2fd   : > { %8043 = vmatprep.subr.bf16.mxu0 %v8349_v9  ;;  %7964 = vmatmul.mubr.bf16.gmra.mxu0 %v9932_v42  ;;  %v4536_v42 = vpack.c.bf16 %v9865_v41, %v10016_v1  ;;  %v4826_v41 = vld [vmem:[#allocation3 + $0x182] sm:$0xff] }
 0x2fe   : > { %7920 = vmatmul.mubr.bf16.gmra.mxu1 %v10003_v2  ;;  %7967 = vmatprep.mubr.bf16.mxu0 %v9938_v38  ;;  %v10023_v38 = vld [vmem:[#allocation3 + $0x181] sm:$0xff] }
 0x2ff   : > { %7923 = vmatprep.mubr.bf16.mxu1 %v4533_v48 }
 0x300   : > { %8044 = vmatpush3.bf16.msra.mxu0 %v8349_v9  ;;  %v8356_v9 = vld [vmem:[#allocation9 + $0x210] sm:$0xff]  }
 0x301   : > { %8045 = vmatprep.subr.bf16.mxu0 %v8350_v39 }
 0x304   : > { %8046 = vmatpush3.bf16.msra.mxu0 %v8350_v39 }
 0x305   : > { %7968 = vmatmul.mubr.bf16.gmra.mxu0 %v9940_v50  ;;  %v5103_v50 = vld [vmem:[#allocation3 + $0x38] sm:$0xff] }
 0x306   : > { %7924 = vmatmul.mubr.bf16.gmra.mxu1 %v10010_v17  ;;  %7971 = vmatprep.mubr.bf16.mxu0 %v9946_v25  ;;  %v4538_v25 = vpack.c.bf16 %v3301_v31, %v10023_v38 }
 0x307   : > { %7927 = vmatprep.mubr.bf16.mxu1 %v9878_v37  ;;  %v5102_v37 = vld [vmem:[#allocation3 + $0x30] sm:$0xff] }
 0x308   : > { %v5134_v63 = vpack.c.bf16 %v5103_v50, %v5102_v37  ;;  %v8357_v50 = vld [vmem:[#allocation9 + $0x208] sm:$0xff]  }
 0x30d   : > { %7972 = vmatmul.mubr.bf16.gmra.mxu0 %v9948_v19  ;;  %v4827_v19 = vld [vmem:[#allocation3 + $0x18a] sm:$0xff] }
 0x30e   : > { %7928 = vmatmul.mubr.bf16.gmra.mxu1 %v4536_v42  ;;  %7975 = vmatprep.mubr.bf16.mxu0 %v9954_v26  ;;  %v5105_v26 = vld [vmem:[#allocation3 + $0x50] sm:$0xff]  ;;  %v10030_v21 = vpack.c.bf16 %v4827_v19, %v4826_v41  ;;  %v5117_v42 = vld [vmem:[#allocation3 + $0xe0] sm:$0xff] }
 0x30f   : > { %7931 = vmatprep.mubr.bf16.mxu1 %v9895_v29  ;;  %v5104_v29 = vld [vmem:[#allocation3 + $0x48] sm:$0xff] }
 0x310   : > { %v5135_v34 = vpack.c.bf16 %v5105_v26, %v5104_v29  ;;  %v5118_v29 = vld [vmem:[#allocation3 + $0xf0] sm:$0xff] }
 0x315   : > { %7976 = vmatmul.mubr.bf16.gmra.mxu0 %v9956_v35 }
 0x316   : > { %7932 = vmatmul.mubr.bf16.gmra.mxu1 %v4538_v25  ;;  %7979 = vmatprep.mubr.bf16.mxu0 %v9962_v46  ;;  %v5109_v46 = vld [vmem:[#allocation3 + $0x80] sm:$0xff] }
 0x317   : > { %7999 = vmatprep.mubr.bf16.mxu1 %v5134_v63  ;;  %v5137_v23 = vpack.c.bf16 %v5109_v46, %v5108_v57  ;;  %v5119_v63 = vld [vmem:[#allocation3 + $0xf8] sm:$0xff] }
 0x31c   : > { %v7713_v31 = vpop.f32.mrf.mxu1 }
 0x31d   : > { %7980 = vmatmul.mubr.bf16.gmra.mxu0 %v10030_v21 }
 0x31e   : > { %8000 = vmatmul.mubr.bf16.vlgmr.msra.gmra.mxu1 %v5135_v34  ;;  %8047 = vmatprep.mubr.bf16.mxu0 %v9969_v53  ;;  %v3545_v35 = vpop.f32.mrf.mxu1  ;;  %v5142_v34 = vpack.c.bf16 %v5119_v63, %v5118_v29 }
 0x31f   : > { %8003 = vmatprep.mubr.bf16.mxu1 %v5136_v60  ;;  %8080 = vmatpush3.bf16.msra.mxu1 %v8351_v5 }
 0x320   : > { %8081 = vmatprep.subr.bf16.mxu1 %v8352_v11  ;;  %v7714_v62 = vpop.f32.mrf.mxu1 }
 0x322   : > { %v3548_v24 = vpop.f32.mrf.mxu1 }
 0x323   : > { %8082 = vmatpush3.bf16.msra.mxu1 %v8352_v11 }
 0x324   : > { %8083 = vmatprep.subr.bf16.mxu1 %v8353_v15  ;;  %v7761_v30 = vpop.f32.mrf.mxu0  ;;  %v7717_v53 = vpop.f32.mrf.mxu1 }
 0x325   : > { %8048 = vmatmul.mubr.bf16.vlgmr.msra.gmra.mxu0 %v9971_v16  ;;  %v10035_v44 = vadd.f32 %v7761_v30, %v7713_v31  ;;  %v5112_v16 = vld [vmem:[#allocation3 + $0xa8] sm:$0xff]  ;;  %v5122_v30 = vld [vmem:[#allocation3 + $0x120] sm:$0xff] }
 0x326   : > { %8004 = vmatmul.mubr.bf16.gmra.mxu1 %v5137_v23  ;;  %8051 = vmatprep.mubr.bf16.mxu0 %v9977_v56  ;;  %v3754_v49 = vpop.f32.mrf.mxu0  ;;  %v3561_v33 = vpop.f32.mrf.mxu1  ;;  %v5139_v14 = vpack.c.bf16 %v5113_v58, %v5112_v16  ;;  %v5125_v16 = vld [vmem:[#allocation3 + $0x140] sm:$0xff] }
 0x327   : > { %8007 = vmatprep.mubr.bf16.mxu1 %v5138_v47  ;;  %8084 = vmatpush3.bf16.msra.mxu1 %v8353_v15  ;;  %v10038_v7 = vadd.f32 %v3754_v49, %v3545_v35 }
 0x328   : > { %8085 = vmatprep.subr.bf16.mxu1 %v8354_v10  ;;  %v7762_v0 = vpop.f32.mrf.mxu0  ;;  %v7718_v18 = vpop.f32.mrf.mxu1 }
 0x329   : > { %v10040_v54 = vadd.f32 %v7762_v0, %v7714_v62  ;;  %v5121_v62 = vld [vmem:[#allocation3 + $0x110] sm:$0xff] }
 0x32a   : > { %v3757_v45 = vpop.f32.mrf.mxu0  ;;  %v3564_v52 = vpop.f32.mrf.mxu1 }
 0x32b   : > { %8086 = vmatpush3.bf16.msra.mxu1 %v8354_v10  ;;  %v10042_v56 = vadd.f32 %v3757_v45, %v3548_v24  ;;  %v5123_v24 = vld [vmem:[#allocation3 + $0x128] sm:$0xff] }
 0x32c   : > { %8087 = vmatprep.subr.bf16.mxu1 %v8355_v61 }
 0x32d   : > { %v7765_v5 = vpop.f32.mrf.mxu0  ;;  %8052 = vmatmul.mubr.bf16.gmra.mxu0 %v9979_v13  ;;  %v7721_v36 = vpop.f32.mrf.mxu1  ;;  %v5116_v13 = vld [vmem:[#allocation3 + $0xd8] sm:$0xff] }
 0x32e   : > { %8008 = vmatmul.mubr.bf16.gmra.mxu1 %v5139_v14  ;;  %v10045_v48 = vadd.f32 %v7765_v5, %v7717_v53  ;;  %8055 = vmatprep.mubr.bf16.mxu0 %v9985_v22  ;;  %v5141_v12 = vpack.c.bf16 %v5117_v42, %v5116_v13  ;;  %v5144_v53 = vpack.c.bf16 %v5123_v24, %v5122_v30  ;;  %v5127_v14 = vld [vmem:[#allocation3 + $0x158] sm:$0xff] }
 0x32f   : > { %8011 = vmatprep.mubr.bf16.mxu1 %v5140_v6  ;;  %v3770_v39 = vpop.f32.mrf.mxu0  ;;  %v3577_v40 = vpop.f32.mrf.mxu1  ;;  %8088 = vmatpush3.bf16.msra.mxu1 %v8355_v61  ;;  %v5124_v6 = vld [vmem:[#allocation3 + $0x138] sm:$0xff] }
 0x330   : > { %v10048_v59 = vadd.f32 %v3770_v39, %v3561_v33  ;;  %8089 = vmatprep.subr.bf16.mxu1 %v8356_v9  ;;  %v5126_v39 = vld [vmem:[#allocation3 + $0x150] sm:$0xff] }
 0x331   : > { %v7766_v25 = vpop.f32.mrf.mxu0  ;;  %v7722_v37 = vpop.f32.mrf.mxu1 }
 0x332   : > { %v10050_v41 = vadd.f32 %v7766_v25, %v7718_v18 }
 0x333   : > { %v3773_v19 = vpop.f32.mrf.mxu0  ;;  %v3580_v26 = vpop.f32.mrf.mxu1  ;;  %8090 = vmatpush3.bf16.msra.mxu1 %v8356_v9  ;;  %v5448_v9 = vpack.c.bf16 %v5426_v55, %v10001_v3  ;;  %v5430_v3 = vld [vmem:[#allocation3 + $0x141] sm:$0xff]  ;;  %v5712_v55 = vld [vmem:[#allocation3 + $0x32] sm:$0xff] }
 0x334   : > { %v10052_v22 = vadd.f32 %v3773_v19, %v3564_v52  ;;  %8091 = vmatprep.subr.bf16.mxu1 %v8357_v50  ;;  %v5129_v19 = vld [vmem:[#allocation3 + $0x170] sm:$0xff] }
 0x335   : > { %v7769_v60 = vpop.f32.mrf.mxu0  ;;  %8056 = vmatmul.mubr.bf16.gmra.mxu0 %v9987_v8  ;;  %v7725_v11 = vpop.f32.mrf.mxu1  ;;  %v5120_v8 = vld [vmem:[#allocation3 + $0x108] sm:$0xff] }
 0x336   : > { %8012 = vmatmul.mubr.bf16.gmra.mxu1 %v5141_v12  ;;  %v10055_v31 = vadd.f32 %v7769_v60, %v7721_v36  ;;  %8059 = vmatprep.mubr.bf16.mxu0 %v9993_v28  ;;  %v5143_v10 = vpack.c.bf16 %v5121_v62, %v5120_v8  ;;  %v5145_v36 = vpack.c.bf16 %v5125_v16, %v5124_v6  ;;  %v5432_v12 = vld [vmem:[#allocation3 + $0x159] sm:$0xff]  ;;  %v5128_v60 = vld [vmem:[#allocation3 + $0x168] sm:$0xff] }
 0x337   : > { %8015 = vmatprep.mubr.bf16.mxu1 %v5142_v34  ;;  %v3786_v35 = vpop.f32.mrf.mxu0  ;;  %v3593_v46 = vpop.f32.mrf.mxu1  ;;  %8092 = vmatpush3.bf16.msra.mxu1 %v8357_v50  ;;  %v5147_v62 = vpack.c.bf16 %v5129_v19, %v5128_v60  ;;  %v5713_v16 = vld [vmem:[#allocation3 + $0x3a] sm:$0xff]  ;;  %v5714_v19 = vld [vmem:[#allocation3 + $0x4a] sm:$0xff] }
 0x338   : > { %v10058_v15 = vadd.f32 %v3786_v35, %v3577_v40  ;;  %8093 = vmatprep.subr.bf16.mxu1 %v8358_v32  ;;  %v5146_v40 = vpack.c.bf16 %v5127_v14, %v5126_v39  ;;  %v5717_v60 = vld [vmem:[#allocation3 + $0x6a] sm:$0xff] }
 0x339   : > { %v7770_v4 = vpop.f32.mrf.mxu0  ;;  %v7726_v57 = vpop.f32.mrf.mxu1 }
 0x33a   : > { %v10060_v23 = vadd.f32 %v7770_v4, %v7722_v37 }
 0x33b   : > { %v3789_v27 = vpop.f32.mrf.mxu0  ;;  %v3596_v47 = vpop.f32.mrf.mxu1  ;;  %8094 = vmatpush3.bf16.msra.mxu1 %v8358_v32  ;;  %v5429_v32 = vld [vmem:[#allocation3 + $0x139] sm:$0xff] }
 0x33c   : > { %v10062_v28 = vadd.f32 %v3789_v27, %v3580_v26  ;;  %v5450_v35 = vpack.c.bf16 %v5430_v3, %v5429_v32  ;;  %v5132_v27 = vld [vmem:[#allocation3 + $0x198] sm:$0xff]  ;;  %v5716_v32 = vld [vmem:[#allocation3 + $0x62] sm:$0xff] }
 0x33d   : > { %v7773_v49 = vpop.f32.mrf.mxu0  ;;  %8060 = vmatmul.mubr.bf16.gmra.mxu0 %v9995_v51 }
 0x33e   : > { %v7729_v33 = vpop.f32.mrf.mxu1  ;;  %8016 = vmatmul.mubr.bf16.gmra.mxu1 %v5143_v10  ;;  %v10065_v58 = vadd.f32 %v7773_v49, %v7725_v11  ;;  %8063 = vmatprep.mubr.bf16.mxu0 %v10003_v2 }
 0x33f   : > { %8019 = vmatprep.mubr.bf16.mxu1 %v5144_v53  ;;  %v3802_v61 = vpop.f32.mrf.mxu0  ;;  %v5434_v53 = vld [vmem:[#allocation3 + $0x171] sm:$0xff] }
 0x340   : > { %v3609_v0 = vpop.f32.mrf.mxu1  ;;  %v10068_v18 = vadd.f32 %v3802_v61, %v3593_v46 }
 0x341   : > { %v7774_v45 = vpop.f32.mrf.mxu0 }
 0x342   : > { %v7730_v52 = vpop.f32.mrf.mxu1  ;;  %v10070_v43 = vadd.f32 %v7774_v45, %v7726_v57 }
 0x343   : > { %v3805_v51 = vpop.f32.mrf.mxu0 }
 0x344   : > { %v3612_v5 = vpop.f32.mrf.mxu1  ;;  %v10073_v2 = vadd.f32 %v3805_v51, %v3596_v47 }
 0x345   : > { %v7777_v42 = vpop.f32.mrf.mxu0  ;;  %8064 = vmatmul.mubr.bf16.gmra.mxu0 %v5448_v9 }
 0x346   : > { %v7733_v50 = vpop.f32.mrf.mxu1  ;;  %8020 = vmatmul.mubr.bf16.gmra.mxu1 %v5145_v36  ;;  %v10075_v25 = vadd.f32 %v7777_v42, %v7729_v33  ;;  %8067 = vmatprep.mubr.bf16.mxu0 %v10010_v17  ;;  %v5451_v17 = vpack.c.bf16 %v5432_v12, %v10016_v1  ;;  %v5436_v33 = vld [vmem:[#allocation3 + $0x189] sm:$0xff]  ;;  %v5437_v42 = vld [vmem:[#allocation3 + $0x199] sm:$0xff] }
 0x347   : > { %8023 = vmatprep.mubr.bf16.mxu1 %v5146_v40  ;;  %v3818_v37 = vpop.f32.mrf.mxu0  ;;  %v5453_v9 = vpack.c.bf16 %v5436_v33, %v10023_v38 }
 0x348   : > { %v3625_v63 = vpop.f32.mrf.mxu1  ;;  %v10078_v13 = vadd.f32 %v3818_v37, %v3609_v0  ;;  %v8361_v0 = vld [vmem:[#allocation2 + $0x8] sm:$0xff] }
 0x349   : > { %v7778_v26 = vpop.f32.mrf.mxu0  ;;  %v5149_v1 = vpack.c.bf16 %v8361_v0, %v5132_v27  ;;  %v5718_v0 = vld [vmem:[#allocation3 + $0x7a] sm:$0xff] }
 0x34a   : > { %v7734_v29 = vpop.f32.mrf.mxu1  ;;  %v10080_v34 = vadd.f32 %v7778_v26, %v7730_v52  ;;  %v5433_v52 = vld [vmem:[#allocation3 + $0x169] sm:$0xff]  ;;  %v5715_v26 = vld [vmem:[#allocation3 + $0x52] sm:$0xff] }
 0x34b   : > { %v3821_v11 = vpop.f32.mrf.mxu0  ;;  %v5452_v6 = vpack.c.bf16 %v5434_v53, %v5433_v52  ;;  %v5720_v52 = vld [vmem:[#allocation3 + $0x92] sm:$0xff] }
 0x34c   : > { %v3628_v46 = vpop.f32.mrf.mxu1  ;;  %v10082_v4 = vadd.f32 %v3821_v11, %v3612_v5  ;;  %v5744_v5 = vpack.c.bf16 %v5713_v16, %v5712_v55 }
 0x34d   : > { %v7781_v57 = vpop.f32.mrf.mxu0  ;;  %8068 = vmatmul.mubr.bf16.gmra.mxu0 %v5450_v35 }
 0x34e   : > { %v7737_v24 = vpop.f32.mrf.mxu1  ;;  %8024 = vmatmul.mubr.bf16.gmra.mxu1 %v5147_v62  ;;  %v10085_v8 = vadd.f32 %v7781_v57, %v7733_v50  ;;  %8071 = vmatprep.mubr.bf16.mxu0 %v5451_v17  ;;  %v5438_v50 = vld [vmem:[#allocation3 + $0x1a1] sm:$0xff]  ;;  %v5745_v62 = vpack.c.bf16 %v5715_v26, %v5714_v19  ;;  %v5746_v57 = vpack.c.bf16 %v5717_v60, %v5716_v32 }
 0x34f   : > { %8027 = vmatprep.mubr.bf16.mxu1 %v9967_v20  ;;  %v3834_v47 = vpop.f32.mrf.mxu0 }
 0x350   : > { %v3641_v10 = vpop.f32.mrf.mxu1  ;;  %v10088_v30 = vadd.f32 %v3834_v47, %v3625_v63 }
 0x351   : > { %v7782_v49 = vpop.f32.mrf.mxu0 }
 0x352   : > { %v7738_v61 = vpop.f32.mrf.mxu1  ;;  %v10090_v45 = vadd.f32 %v7782_v49, %v7734_v29  ;;  %v5454_v29 = vpack.c.bf16 %v5438_v50, %v5437_v42 }
 0x353   : > { %v3837_v14 = vpop.f32.mrf.mxu0 }
 0x354   : > { %v3644_v51 = vpop.f32.mrf.mxu1  ;;  %v10092_v20 = vadd.f32 %v3837_v14, %v3628_v46  ;;  %v5721_v14 = vld [vmem:[#allocation3 + $0x9a] sm:$0xff] }
 0x355   : > { %v7785_v36 = vpop.f32.mrf.mxu0  ;;  %8072 = vmatmul.mubr.bf16.gmra.mxu0 %v5452_v6  ;;  %v5748_v42 = vpack.c.bf16 %v5721_v14, %v5720_v52  ;;  %v5726_v52 = vld [vmem:[#allocation3 + $0xda] sm:$0xff]  ;;  %v5727_v14 = vld [vmem:[#allocation3 + $0xe2] sm:$0xff] }
 0x356   : > { %v7741_v39 = vpop.f32.mrf.mxu1  ;;  %8028 = vmatmul.mubr.bf16.gmra.mxu1 %v5149_v1  ;;  %v10095_v40 = vadd.f32 %v7785_v36, %v7737_v24  ;;  %8075 = vmatprep.mubr.bf16.mxu0 %v5453_v9  ;;  %v5719_v1 = vld [vmem:[#allocation3 + $0x82] sm:$0xff] }
 0x357   : > { %8095 = vmatprep.mubr.bf16.mxu1 %v5744_v5  ;;  %v3850_v37 = vpop.f32.mrf.mxu0 }
 0x358   : > { %v3657_v63 = vpop.f32.mrf.mxu1  ;;  %v10097_v3 = vadd.f32 %v3850_v37, %v3641_v10 }
 0x359   : > { %v7786_v12 = vpop.f32.mrf.mxu0 }
 0x35a   : > { %v7742_v38 = vpop.f32.mrf.mxu1  ;;  %v10099_v11 = vadd.f32 %v7786_v12, %v7738_v61 }
 0x35b   : > { %v3853_v35 = vpop.f32.mrf.mxu0 }
 0x35c   : > { %v3660_v46 = vpop.f32.mrf.mxu1  ;;  %v10101_v17 = vadd.f32 %v3853_v35, %v3644_v51  ;;  %v5725_v35 = vld [vmem:[#allocation3 + $0xca] sm:$0xff] }
 0x35d   : > { %v7789_v24 = vpop.f32.mrf.mxu0  ;;  %8076 = vmatmul.mubr.bf16.gmra.mxu0 %v5454_v29  ;;  %v5722_v29 = vld [vmem:[#allocation3 + $0xaa] sm:$0xff] }
 0x35e   : > { %v7809_v27 = vpop.f32.mrf.mxu1  ;;  %8096 = vmatmul.mubr.bf16.vlgmr.msra.gmra.mxu1 %v5745_v62  ;;  %v10103_v47 = vadd.f32 %v7789_v24, %v7741_v39 }
 0x35f   : > { %v4156_v10 = vadd.f32 %v7809_v27, %v10035_v44  ;;  %8099 = vmatprep.mubr.bf16.mxu1 %v5746_v57  ;;  %v3866_v53 = vpop.f32.mrf.mxu0  ;;  %v5747_v44 = vpack.c.bf16 %v5719_v1, %v5718_v0 }
 0x360   : > { %v4027_v49 = vpop.f32.mrf.mxu1  ;;  %v10106_v33 = vadd.f32 %v3866_v53, %v3657_v63 }
 0x361   : > { %v4154_v61 = vadd.f32 %v4027_v49, %v10038_v7  ;;  %v7790_v55 = vpop.f32.mrf.mxu0 }
 0x362   : > { %v7810_v16 = vpop.f32.mrf.mxu1  ;;  %v10109_v6 = vadd.f32 %v7790_v55, %v7742_v38  ;;  %v5723_v38 = vld [vmem:[#allocation3 + $0xb2] sm:$0xff] }
 0x363   : > { %v4157_v51 = vadd.f32 %v7810_v16, %v10040_v54  ;;  %v3869_v9 = vpop.f32.mrf.mxu0 }
 0x364   : > { %v4030_v5 = vpop.f32.mrf.mxu1  ;;  %v10112_v36 = vadd.f32 %v3869_v9, %v3660_v46 }
 0x365   : > { %v4155_v39 = vadd.f32 %v4030_v5, %v10042_v56  ;;  %v7857_v50 = vpop.f32.mrf.mxu0  ;;  %v5724_v56 = vld [vmem:[#allocation3 + $0xc2] sm:$0xff]  ;;  %v5729_v5 = vld [vmem:[#allocation3 + $0xfa] sm:$0xff] }
 0x366   : > { %v7813_v7 = vpop.f32.mrf.mxu1  ;;  %8100 = vmatmul.mubr.bf16.gmra.mxu1 %v5747_v44  ;;  %v10115_v37 = vadd.f32 %v7857_v50, %v4156_v10  ;;  %v5750_v53 = vpack.c.bf16 %v5725_v35, %v5724_v56  ;;  %v5730_v56 = vld [vmem:[#allocation3 + $0x10a] sm:$0xff]  ;;  %v5731_v35 = vld [vmem:[#allocation3 + $0x112] sm:$0xff] }
 0x367   : > { %v4160_v63 = vadd.f32 %v7813_v7, %v10045_v48  ;;  %8103 = vmatprep.mubr.bf16.mxu1 %v5748_v42  ;;  %v4332_v19 = vpop.f32.mrf.mxu0  ;;  %v5749_v48 = vpack.c.bf16 %v5723_v38, %v5722_v29 }
 0x368   : > { %v4043_v26 = vpop.f32.mrf.mxu1  ;;  %v10118_v12 = vadd.f32 %v4332_v19, %v4154_v61 }
 0x369   : > { %v4158_v54 = vadd.f32 %v4043_v26, %v10048_v59  ;;  %v7858_v32 = vpop.f32.mrf.mxu0 }
 0x36a   : > { %v7814_v60 = vpop.f32.mrf.mxu1  ;;  %v10121_v46 = vadd.f32 %v7858_v32, %v4157_v51 }
 0x36b   : > { %v4161_v62 = vadd.f32 %v7814_v60, %v10050_v41  ;;  %v4335_v57 = vpop.f32.mrf.mxu0 }
 0x36c   : > { %v4046_v24 = vpop.f32.mrf.mxu1  ;;  %v10124_v27 = vadd.f32 %v4335_v57, %v4155_v39 }
 0x36d   : > { %v4159_v10 = vadd.f32 %v4046_v24, %v10052_v22  ;;  %v7861_v49 = vpop.f32.mrf.mxu0  ;;  %v5728_v22 = vld [vmem:[#allocation3 + $0xf2] sm:$0xff]  ;;  %v5733_v24 = vld [vmem:[#allocation3 + $0x12a] sm:$0xff] }
 0x36e   : > { %v7817_v59 = vpop.f32.mrf.mxu1  ;;  %8104 = vmatmul.mubr.bf16.gmra.mxu1 %v5749_v48  ;;  %v10127_v61 = vadd.f32 %v7861_v49, %v4160_v63  ;;  %v5752_v19 = vpack.c.bf16 %v5729_v5, %v5728_v22  ;;  %v5734_v22 = vld [vmem:[#allocation3 + $0x13a] sm:$0xff]  ;;  %v5735_v5 = vld [vmem:[#allocation3 + $0x142] sm:$0xff] }
 0x36f   : > { %v4164_v0 = vadd.f32 %v7817_v59, %v10055_v31  ;;  %8107 = vmatprep.mubr.bf16.mxu1 %v5750_v53  ;;  %v4348_v1 = vpop.f32.mrf.mxu0  ;;  %v5751_v31 = vpack.c.bf16 %v5727_v14, %v5726_v52 }
 0x370   : > { %v4059_v55 = vpop.f32.mrf.mxu1  ;;  %v10130_v16 = vadd.f32 %v4348_v1, %v4158_v54 }
 0x371   : > { %v4162_v41 = vadd.f32 %v4059_v55, %v10058_v15  ;;  %v7862_v51 = vpop.f32.mrf.mxu0 }
 0x372   : > { %v7818_v9 = vpop.f32.mrf.mxu1  ;;  %v10133_v44 = vadd.f32 %v7862_v51, %v4161_v62 }
 0x373   : > { %v4165_v39 = vadd.f32 %v7818_v9, %v10060_v23  ;;  %v4351_v42 = vpop.f32.mrf.mxu0 }
 0x374   : > { %v4062_v50 = vpop.f32.mrf.mxu1  ;;  %v10136_v7 = vadd.f32 %v4351_v42, %v4159_v10 }
 0x375   : > { %v4163_v63 = vadd.f32 %v4062_v50, %v10062_v28  ;;  %v7865_v26 = vpop.f32.mrf.mxu0  ;;  %v5732_v28 = vld [vmem:[#allocation3 + $0x122] sm:$0xff]  ;;  %v5737_v50 = vld [vmem:[#allocation3 + $0x15a] sm:$0xff] }
 0x376   : > { %v7821_v15 = vpop.f32.mrf.mxu1  ;;  %8108 = vmatmul.mubr.bf16.gmra.mxu1 %v5751_v31  ;;  %v10139_v54 = vadd.f32 %v7865_v26, %v4164_v0  ;;  %v5754_v1 = vpack.c.bf16 %v5733_v24, %v5732_v28  ;;  %v5738_v28 = vld [vmem:[#allocation3 + $0x16a] sm:$0xff]  ;;  %v5739_v24 = vld [vmem:[#allocation3 + $0x172] sm:$0xff] }
 0x377   : > { %v4168_v29 = vadd.f32 %v7821_v15, %v10065_v58  ;;  %8111 = vmatprep.mubr.bf16.mxu1 %v5752_v19  ;;  %v4364_v38 = vpop.f32.mrf.mxu0  ;;  %v5753_v58 = vpack.c.bf16 %v5731_v35, %v5730_v56 }
 0x378   : > { %v4075_v32 = vpop.f32.mrf.mxu1  ;;  %v10142_v60 = vadd.f32 %v4364_v38, %v4162_v41 }
 0x379   : > { %v4166_v23 = vadd.f32 %v4075_v32, %v10068_v18  ;;  %v7866_v62 = vpop.f32.mrf.mxu0 }
 0x37a   : > { %v7822_v57 = vpop.f32.mrf.mxu1  ;;  %v10145_v48 = vadd.f32 %v7866_v62, %v4165_v39 }
 0x37b   : > { %v4169_v10 = vadd.f32 %v7822_v57, %v10070_v43  ;;  %v4367_v53 = vpop.f32.mrf.mxu0 }
 0x37c   : > { %v4078_v49 = vpop.f32.mrf.mxu1  ;;  %v10148_v59 = vadd.f32 %v4367_v53, %v4163_v63 }
 0x37d   : > { %v4167_v0 = vadd.f32 %v4078_v49, %v10073_v2  ;;  %v7869_v55 = vpop.f32.mrf.mxu0  ;;  %v5736_v2 = vld [vmem:[#allocation3 + $0x152] sm:$0xff] }
 0x37e   : > { %v7825_v18 = vpop.f32.mrf.mxu1  ;;  %8112 = vmatmul.mubr.bf16.gmra.mxu1 %v5753_v58  ;;  %v10151_v41 = vadd.f32 %v7869_v55, %v4168_v29  ;;  %v5756_v38 = vpack.c.bf16 %v5737_v50, %v5736_v2 }
 0x37f   : > { %v4172_v52 = vadd.f32 %v7825_v18, %v10075_v25  ;;  %8115 = vmatprep.mubr.bf16.mxu1 %v5754_v1  ;;  %v4380_v14 = vpop.f32.mrf.mxu0  ;;  %v5755_v25 = vpack.c.bf16 %v5735_v5, %v5734_v22  ;;  %v5757_v1 = vpack.c.bf16 %v5739_v24, %v5738_v28 }
 0x380   : > { %v4091_v51 = vpop.f32.mrf.mxu1  ;;  %v10154_v9 = vadd.f32 %v4380_v14, %v4166_v23 }
 0x381   : > { %v4170_v43 = vadd.f32 %v4091_v51, %v10078_v13  ;;  %v7870_v39 = vpop.f32.mrf.mxu0  ;;  %v5742_v51 = vld [vmem:[#allocation3 + $0x19a] sm:$0xff] }
 0x382   : > { %v7826_v42 = vpop.f32.mrf.mxu1  ;;  %v10157_v31 = vadd.f32 %v7870_v39, %v4169_v10 }
 0x383   : > { %v4173_v63 = vadd.f32 %v7826_v42, %v10080_v34  ;;  %v4383_v19 = vpop.f32.mrf.mxu0 }
 0x384   : > { %v4094_v26 = vpop.f32.mrf.mxu1  ;;  %v10160_v15 = vadd.f32 %v4383_v19, %v4167_v0 }
 0x385   : > { %v4171_v29 = vadd.f32 %v4094_v26, %v10082_v4  ;;  %v7873_v32 = vpop.f32.mrf.mxu0 }
 0x386   : > { %v7829_v13 = vpop.f32.mrf.mxu1  ;;  %8116 = vmatmul.mubr.bf16.gmra.mxu1 %v5755_v25  ;;  %v10163_v23 = vadd.f32 %v7873_v32, %v4172_v52 }
 0x387   : > { %v4176_v56 = vadd.f32 %v7829_v13, %v10085_v8  ;;  %8119 = vmatprep.mubr.bf16.mxu1 %v5756_v38  ;;  %v4396_v35 = vpop.f32.mrf.mxu0 }
 0x388   : > { %v4107_v62 = vpop.f32.mrf.mxu1  ;;  %v10166_v57 = vadd.f32 %v4396_v35, %v4170_v43  ;;  %v5743_v43 = vld [vmem:[#allocation3 + $0x1a2] sm:$0xff] }
 0x389   : > { %v4174_v34 = vadd.f32 %v4107_v62, %v10088_v30  ;;  %v7874_v10 = vpop.f32.mrf.mxu0 }
 0x38a   : > { %v7830_v53 = vpop.f32.mrf.mxu1  ;;  %v10169_v4 = vadd.f32 %v7874_v10, %v4173_v63 }
 0x38b   : > { %v4177_v49 = vadd.f32 %v7830_v53, %v10090_v45  ;;  %v4399_v58 = vpop.f32.mrf.mxu0 }
 0x38c   : > { %v4110_v0 = vpop.f32.mrf.mxu1  ;;  %v10172_v55 = vadd.f32 %v4399_v58, %v4171_v29 }
 0x38d   : > { %v4175_v8 = vadd.f32 %v4110_v0, %v10092_v20  ;;  %v7877_v18 = vpop.f32.mrf.mxu0  ;;  %v5759_v20 = vpack.c.bf16 %v5743_v43, %v5742_v51 }
 0x38e   : > { %v7833_v52 = vpop.f32.mrf.mxu1  ;;  %8120 = vmatmul.mubr.bf16.gmra.mxu1 %v5757_v1  ;;  %v10175_v14 = vadd.f32 %v7877_v18, %v4176_v56 }
 0x38f   : > { %v4180_v30 = vadd.f32 %v7833_v52, %v10095_v40  ;;  %8123 = vmatprep.mubr.bf16.mxu1 %v10030_v21  ;;  %v4412_v22 = vpop.f32.mrf.mxu0 }
 0x390   : > { %v4123_v45 = vpop.f32.mrf.mxu1  ;;  %v10179_v5 = vadd.f32 %v4412_v22, %v4174_v34 }
 0x391   : > { %v4178_v39 = vadd.f32 %v4123_v45, %v10097_v3  ;;  %v7878_v42 = vpop.f32.mrf.mxu0 }
 0x392   : > { %v7834_v2 = vpop.f32.mrf.mxu1  ;;  %v10182_v50 = vadd.f32 %v7878_v42, %v4177_v49 }
 0x393   : > { %v4181_v63 = vadd.f32 %v7834_v2, %v10099_v11  ;;  %v4415_v19 = vpop.f32.mrf.mxu0 }
 0x394   : > { %v4126_v26 = vpop.f32.mrf.mxu1  ;;  %v10185_v40 = vadd.f32 %v4415_v19, %v4175_v8 }
 0x395   : > { %v4179_v21 = vadd.f32 %v4126_v26, %v10101_v17  ;;  %v7881_v25 = vpop.f32.mrf.mxu0 }
 0x396   : > { %v7837_v29 = vpop.f32.mrf.mxu1  ;;  %8124 = vmatmul.mubr.bf16.gmra.mxu1 %v5759_v20  ;;  %v10188_v38 = vadd.f32 %v7881_v25, %v4180_v30 }
 0x397   : > { %v4184_v3 = vadd.f32 %v7837_v29, %v10103_v47  ;;  %v4428_v32 = vpop.f32.mrf.mxu0 }
 0x398   : > { %v4139_v13 = vpop.f32.mrf.mxu1  ;;  %v10191_v56 = vadd.f32 %v4428_v32, %v4178_v39 }
 0x399   : > { %v4182_v35 = vadd.f32 %v4139_v13, %v10106_v33  ;;  %v7882_v11 = vpop.f32.mrf.mxu0 }
 0x39a   : > { %v7838_v62 = vpop.f32.mrf.mxu1  ;;  %v10194_v34 = vadd.f32 %v7882_v11, %v4181_v63 }
 0x39b   : > { %v4185_v28 = vadd.f32 %v7838_v62, %v10109_v6  ;;  %v4431_v17 = vpop.f32.mrf.mxu0 }
 0x39c   : > { %v4142_v24 = vpop.f32.mrf.mxu1  ;;  %v10197_v10 = vadd.f32 %v4431_v17, %v4179_v21 }
 0x39d   : > { %v4183_v53 = vadd.f32 %v4142_v24, %v10112_v36  ;;  %v7885_v49 = vpop.f32.mrf.mxu0 }
 0x39e   : > { %v7905_v47 = vpop.f32.mrf.mxu1  ;;  %v10200_v58 = vadd.f32 %v7885_v49, %v4184_v3 }
 0x39f   : > { %v4766_v0 = vadd.f32 %v7905_v47, %v10115_v37  ;;  %v4444_v1 = vpop.f32.mrf.mxu0 }
 0x3a0   : > { %v4637_v33 = vpop.f32.mrf.mxu1  ;;  %v10203_v8 = vadd.f32 %v4444_v1, %v4182_v35 }
 0x3a1   : > { %v4764_v18 = vadd.f32 %v4637_v33, %v10118_v12  ;;  %v7886_v52 = vpop.f32.mrf.mxu0 }
 0x3a2   : > { %v7906_v6 = vpop.f32.mrf.mxu1  ;;  %v10206_v30 = vadd.f32 %v7886_v52, %v4185_v28 }
 0x3a3   : > { %v10209_v51 = vadd.f32 %v7906_v6, %v10121_v46  ;;  %v4447_v36 = vpop.f32.mrf.mxu0 }
 0x3a4   : > { %v4640_v43 = vpop.f32.mrf.mxu1  ;;  %v10211_v22 = vadd.f32 %v4447_v36, %v4183_v53 }
 0x3a5   : > { %v10214_v45 = vadd.f32 %v4640_v43, %v10124_v27  ;;  %v7953_v37 = vpop.f32.mrf.mxu0 }
 0x3a6   : > { %v7909_v39 = vpop.f32.mrf.mxu1  ;;  %v10216_v42 = vadd.f32 %v7953_v37, %v4766_v0 }
 0x3a7   : > { %v4770_v12 = vadd.f32 %v7909_v39, %v10127_v61  ;;  %v4942_v2 = vpop.f32.mrf.mxu0 }
 0x3a8   : > { %v4653_v20 = vpop.f32.mrf.mxu1  ;;  %v10219_v63 = vadd.f32 %v4942_v2, %v4764_v18 }
 0x3a9   : > { %v4768_v46 = vadd.f32 %v4653_v20, %v10130_v16  ;;  %v10222_v19 = vpop.f32.mrf.mxu0 }
 0x3aa   : > { %v7910_v26 = vpop.f32.mrf.mxu1 }
 0x3ab   : > { %v10225_v21 = vadd.f32 %v7910_v26, %v10133_v44  ;;  %v10227_v27 = vpop.f32.mrf.mxu0 }
 0x3ac   : > { %v4656_v25 = vpop.f32.mrf.mxu1 }
 0x3ad   : > { %v10230_v29 = vadd.f32 %v4656_v25, %v10136_v7  ;;  %v7957_v3 = vpop.f32.mrf.mxu0 }
 0x3ae   : > { %v7913_v61 = vpop.f32.mrf.mxu1  ;;  %v10232_v32 = vadd.f32 %v7957_v3, %v4770_v12 }
 0x3af   : > { %v4774_v13 = vadd.f32 %v7913_v61, %v10139_v54  ;;  %v4958_v35 = vpop.f32.mrf.mxu0 }
 0x3b0   : > { %v4669_v16 = vpop.f32.mrf.mxu1  ;;  %v10235_v11 = vadd.f32 %v4958_v35, %v4768_v46 }
 0x3b1   : > { %v4772_v62 = vadd.f32 %v4669_v16, %v10142_v60  ;;  %v10238_v44 = vpop.f32.mrf.mxu0 }
 0x3b2   : > { %v7914_v28 = vpop.f32.mrf.mxu1 }
 0x3b3   : > { %v10241_v17 = vadd.f32 %v7914_v28, %v10145_v48  ;;  %v10243_v7 = vpop.f32.mrf.mxu0 }
 0x3b4   : > { %v4672_v24 = vpop.f32.mrf.mxu1 }
 0x3b5   : > { %v10246_v53 = vadd.f32 %v4672_v24, %v10148_v59  ;;  %v7961_v49 = vpop.f32.mrf.mxu0 }
 0x3b6   : > { %v7917_v54 = vpop.f32.mrf.mxu1  ;;  %v10248_v47 = vadd.f32 %v7961_v49, %v4774_v13 }
 0x3b7   : > { %v4778_v0 = vadd.f32 %v7917_v54, %v10151_v41  ;;  %v4974_v1 = vpop.f32.mrf.mxu0 }
 0x3b8   : > { %v4685_v60 = vpop.f32.mrf.mxu1  ;;  %v10251_v33 = vadd.f32 %v4974_v1, %v4772_v62 }
 0x3b9   : > { %v4776_v18 = vadd.f32 %v4685_v60, %v10154_v9  ;;  %v10254_v48 = vpop.f32.mrf.mxu0 }
 0x3ba   : > { %v7918_v52 = vpop.f32.mrf.mxu1 }
 0x3bb   : > { %v10257_v6 = vadd.f32 %v7918_v52, %v10157_v31  ;;  %v10259_v59 = vpop.f32.mrf.mxu0 }
 0x3bc   : > { %v4688_v36 = vpop.f32.mrf.mxu1 }
 0x3bd   : > { %v10262_v43 = vadd.f32 %v4688_v36, %v10160_v15  ;;  %v7965_v37 = vpop.f32.mrf.mxu0 }
 0x3be   : > { %v7921_v41 = vpop.f32.mrf.mxu1  ;;  %v10264_v39 = vadd.f32 %v7965_v37, %v4778_v0 }
 0x3bf   : > { %v4782_v12 = vadd.f32 %v7921_v41, %v10163_v23  ;;  %v4990_v2 = vpop.f32.mrf.mxu0 }
 0x3c0   : > { %v4701_v9 = vpop.f32.mrf.mxu1  ;;  %v10267_v20 = vadd.f32 %v4990_v2, %v4776_v18 }
 0x3c1   : > { %v4780_v46 = vadd.f32 %v4701_v9, %v10166_v57  ;;  %v10270_v31 = vpop.f32.mrf.mxu0 }
 0x3c2   : > { %v7922_v26 = vpop.f32.mrf.mxu1 }
 0x3c3   : > { %v10273_v25 = vadd.f32 %v7922_v26, %v10169_v4  ;;  %v10275_v15 = vpop.f32.mrf.mxu0 }
 0x3c4   : > { %v4704_v3 = vpop.f32.mrf.mxu1 }
 0x3c5   : > { %v10278_v61 = vadd.f32 %v4704_v3, %v10172_v55  ;;  %v7969_v13 = vpop.f32.mrf.mxu0 }
 0x3c6   : > { %v7925_v23 = vpop.f32.mrf.mxu1  ;;  %v10280_v35 = vadd.f32 %v7969_v13, %v4782_v12 }
 0x3c7   : > { %10874 = vst [vmem:[#allocation14_spill] sm:$0xff] %v10278_v61  ;;  %v4786_v16 = vadd.f32 %v7925_v23, %v10175_v14  ;;  %v5006_v62 = vpop.f32.mrf.mxu0 }
 0x3c8   : > { %v4717_v57 = vpop.f32.mrf.mxu1  ;;  %v10283_v28 = vadd.f32 %v5006_v62, %v4780_v46 }
 0x3c9   : > { %v4784_v24 = vadd.f32 %v4717_v57, %v10179_v5  ;;  %v10286_v4 = vpop.f32.mrf.mxu0 }
 0x3ca   : > { %v7926_v49 = vpop.f32.mrf.mxu1 }
 0x3cb   : > { %v10289_v54 = vadd.f32 %v7926_v49, %v10182_v50  ;;  %v10291_v55 = vpop.f32.mrf.mxu0 }
 0x3cc   : > { %10876 = vst [vmem:[#allocation16_spill] sm:$0xff] %v10291_v55  ;;  %v4720_v0 = vpop.f32.mrf.mxu1 }
 0x3cd   : > { %10875 = vst [vmem:[#allocation15_spill] sm:$0xff] %v10289_v54  ;;  %v10294_v1 = vadd.f32 %v4720_v0, %v10185_v40  ;;  %v7973_v60 = vpop.f32.mrf.mxu0 }
 0x3ce   : > { %v7929_v14 = vpop.f32.mrf.mxu1  ;;  %v10296_v18 = vadd.f32 %v7973_v60, %v4786_v16 }
 0x3cf   : > { %10877 = vst [vmem:[#allocation17_spill] sm:$0xff] %v10294_v1  ;;  %v4790_v52 = vadd.f32 %v7929_v14, %v10188_v38  ;;  %v5022_v36 = vpop.f32.mrf.mxu0 }
 0x3d0   : > { %v4733_v5 = vpop.f32.mrf.mxu1  ;;  %v10299_v37 = vadd.f32 %v5022_v36, %v4784_v24 }
 0x3d1   : > { %v4788_v41 = vadd.f32 %v4733_v5, %v10191_v56  ;;  %v10302_v50 = vpop.f32.mrf.mxu0 }
 0x3d2   : > { %10878 = vst [vmem:[#allocation18_spill] sm:$0xff] %v10302_v50  ;;  %v7930_v12 = vpop.f32.mrf.mxu1 }
 0x3d3   : > { %v10305_v2 = vadd.f32 %v7930_v12, %v10194_v34  ;;  %v10307_v40 = vpop.f32.mrf.mxu0 }
 0x3d4   : > { %10880 = vst [vmem:[#allocation20_spill] sm:$0xff] %v10307_v40  ;;  %v4736_v9 = vpop.f32.mrf.mxu1 }
 0x3d5   : > { %10879 = vst [vmem:[#allocation19_spill] sm:$0xff] %v10305_v2  ;;  %v10310_v46 = vadd.f32 %v4736_v9, %v10197_v10  ;;  %v7977_v26 = vpop.f32.mrf.mxu0 }
 0x3d6   : > { %v7933_v38 = vpop.f32.mrf.mxu1  ;;  %v10312_v3 = vadd.f32 %v7977_v26, %v4790_v52 }
 0x3d7   : > { %10881 = vst [vmem:[#allocation21_spill] sm:$0xff] %v10310_v46  ;;  %v4794_v13 = vadd.f32 %v7933_v38, %v10200_v58  ;;  %v5038_v23 = vpop.f32.mrf.mxu0 }
 0x3d8   : > { %v4749_v56 = vpop.f32.mrf.mxu1  ;;  %v10315_v16 = vadd.f32 %v5038_v23, %v4788_v41 }
 0x3d9   : > { %v4792_v62 = vadd.f32 %v4749_v56, %v10203_v8  ;;  %v10318_v34 = vpop.f32.mrf.mxu0 }
 0x3da   : > { %10882 = vst [vmem:[#allocation22_spill] sm:$0xff] %v10318_v34  ;;  %v7934_v57 = vpop.f32.mrf.mxu1 }
 0x3db   : > { %v10321_v24 = vadd.f32 %v7934_v57, %v10206_v30  ;;  %v10323_v10 = vpop.f32.mrf.mxu0 }
 0x3dc   : > { %10884 = vst [vmem:[#allocation24_spill] sm:$0xff] %v10323_v10  ;;  %v4752_v49 = vpop.f32.mrf.mxu1 }
 0x3dd   : > { %10883 = vst [vmem:[#allocation23_spill] sm:$0xff] %v10321_v24  ;;  %v10326_v0 = vadd.f32 %v4752_v49, %v10211_v22  ;;  %v7981_v60 = vpop.f32.mrf.mxu0 }
 0x3de   : > { %v8001_v58 = vpop.f32.mrf.mxu1  ;;  %v5099_v14 = vadd.f32 %v7981_v60, %v4794_v13 }
 0x3df   : > { %10885 = vst [vmem:[#allocation25_spill] sm:$0xff] %v10326_v0  ;;  %v10329_v52 = vadd.f32 %v8001_v58, %v10216_v42  ;;  %v5054_v36 = vpop.f32.mrf.mxu0 }
 0x3e0   : > { %v5248_v8 = vpop.f32.mrf.mxu1  ;;  %v5097_v5 = vadd.f32 %v5054_v36, %v4792_v62 }
 0x3e1   : > { %v10332_v41 = vadd.f32 %v5248_v8, %v10219_v63  ;;  %v10334_v30 = vpop.f32.mrf.mxu0 }
 0x3e2   : > { %10886 = vst [vmem:[#allocation26_spill] sm:$0xff] %v10334_v30  ;;  %v10336_v12 = vpop.f32.mrf.mxu1 }
 0x3e3   : > { %v10338_v9 = vpop.f32.mrf.mxu0 }
 0x3e4   : > { %10887 = vst [vmem:[#allocation27_spill] sm:$0xff] %v10338_v9  ;;  %v10340_v22 = vpop.f32.mrf.mxu1 }
 0x3e5   : > { %v8049_v26 = vpop.f32.mrf.mxu0 }
 0x3e6   : > { %v8005_v38 = vpop.f32.mrf.mxu1 }
 0x3e7   : > { %v10343_v13 = vadd.f32 %v8005_v38, %v10232_v32  ;;  %v5553_v42 = vpop.f32.mrf.mxu0 }
 0x3e8   : > { %v5264_v23 = vpop.f32.mrf.mxu1 }
 0x3e9   : > { %v10346_v56 = vadd.f32 %v5264_v23, %v10235_v11  ;;  %v10348_v63 = vpop.f32.mrf.mxu0 }
 0x3ea   : > { %v10350_v62 = vpop.f32.mrf.mxu1 }
 0x3eb   : > { %v10352_v57 = vpop.f32.mrf.mxu0 }
 0x3ec   : > { %v10354_v49 = vpop.f32.mrf.mxu1 }
 0x3ed   : > { %v10356_v60 = vpop.f32.mrf.mxu0 }
 0x3ee   : > { %v8009_v58 = vpop.f32.mrf.mxu1 }
 0x3ef   : > { %v10359_v36 = vadd.f32 %v8009_v58, %v10248_v47  ;;  %v10361_v8 = vpop.f32.mrf.mxu0 }
 0x3f0   : > { %v5280_v32 = vpop.f32.mrf.mxu1 }
 0x3f1   : > { %v10364_v11 = vadd.f32 %v5280_v32, %v10251_v33  ;;  %v10370_v9 = vpop.f32.mrf.mxu0 }
 0x3f2   : > { %v10366_v38 = vpop.f32.mrf.mxu1 }
 0x3f3   : > { %v10375_v10 = vpop.f32.mrf.mxu0 }
 0x3f4   : > { %v10368_v23 = vpop.f32.mrf.mxu1 }
 0x3f5   : > { %v10384_v32 = vpop.f32.mrf.mxu0 }
 0x3f6   : > { %v8013_v0 = vpop.f32.mrf.mxu1 }
 0x3f7   : > { %v10373_v30 = vadd.f32 %v8013_v0, %v10264_v39  ;;  %v10389_v40 = vpop.f32.mrf.mxu0 }
 0x3f8   : > { %v5296_v24 = vpop.f32.mrf.mxu1 }
 0x3f9   : > { %v10378_v47 = vadd.f32 %v5296_v24, %v10267_v20  ;;  %v10398_v24 = vpop.f32.mrf.mxu0 }
 0x3fa   : > { %v10380_v58 = vpop.f32.mrf.mxu1 }
 0x3fb   : > { %v10403_v55 = vpop.f32.mrf.mxu0 }
 0x3fc   : > { %v10382_v33 = vpop.f32.mrf.mxu1 }
 0x3fe   : > { %v8017_v46 = vpop.f32.mrf.mxu1 }
 0x3ff   : > { %v10387_v34 = vadd.f32 %v8017_v46, %v10280_v35 }
 0x400   : > { %v5312_v2 = vpop.f32.mrf.mxu1 }
 0x401   : > { %10888 = vst [vmem:[#allocation28_spill] sm:$0xff] %v10387_v34  ;;  %v10392_v39 = vadd.f32 %v5312_v2, %v10283_v28  ;;  %v10412_v2 = vpop.f32.mrf.mxu0 }
 0x402   : > { %v10394_v0 = vpop.f32.mrf.mxu1 }
 0x403   : > { %10889 = vst [vmem:[#allocation29_spill] sm:$0xff] %v10392_v39  ;;  %v10417_v34 = vpop.f32.mrf.mxu0 }
 0x404   : > { %v10396_v20 = vpop.f32.mrf.mxu1 }
 0x405   : > { %10890 = vst [vmem:[#allocation31_spill] sm:$0xff] %v10396_v20 }
 0x406   : > { %v8021_v1 = vpop.f32.mrf.mxu1 }
 0x407   : > { %v10401_v50 = vadd.f32 %v8021_v1, %v10296_v18 }
 0x408   : > { %v5328_v54 = vpop.f32.mrf.mxu1 }
 0x409   : > { %10891 = vst [vmem:[#allocation32_spill] sm:$0xff] %v10401_v50  ;;  %v10406_v35 = vadd.f32 %v5328_v54, %v10299_v37  ;;  %v10426_v37 = vpop.f32.mrf.mxu0 }
 0x40a   : > { %v10408_v46 = vpop.f32.mrf.mxu1 }
 0x40b   : > { %10892 = vst [vmem:[#allocation62_spill] sm:$0xff] %v10406_v35  ;;  %10893 = vst [vmem:[#allocation61_spill] sm:$0xff] %v10408_v46  ;;  %v10430_v50 = vpop.f32.mrf.mxu0 }
 0x40c   : > { %v10410_v28 = vpop.f32.mrf.mxu1 }
 0x40d   : > { %10894 = vst [vmem:[#allocation33_spill] sm:$0xff] %v10410_v28 }
 0x40e   : > { %v8025_v61 = vpop.f32.mrf.mxu1 }
 0x40f   : > { %v10415_v20 = vadd.f32 %v8025_v61, %v10312_v3 }
 0x410   : > { %v5344_v39 = vpop.f32.mrf.mxu1 }
 0x411   : > { %10895 = vst [vmem:[#allocation34_spill] sm:$0xff] %v10415_v20  ;;  %v10420_v1 = vadd.f32 %v5344_v39, %v10315_v16  ;;  %v5072_v16 = vadd.f32 %v10222_v19, %v10209_v51  ;;  %v5682_v39 = vadd.f32 %v8049_v26, %v10329_v52  ;;  %v10455_v51 = vld [vmem:[%s10696_s6] ss:$0 sm:$0xff] }
 0x412   : > { %v10422_v18 = vpop.f32.mrf.mxu1 }
 0x413   : > { %10896 = vst [vmem:[#allocation35_spill] sm:$0xff] %v10420_v1 }
 0x414   : > { %v10424_v54 = vpop.f32.mrf.mxu1 }
 0x415   : > { %10897 = vst [vmem:[#allocation65_spill] sm:$0xff] %v10424_v54  ;;  %v10441_v54 = vpop.f32.mrf.mxu0 }
 0x416   : > { %v8029_v46 = vpop.f32.mrf.mxu1 }
 0x417   : > { %v10428_v28 = vadd.f32 %v8029_v46, %v5099_v14  ;;  %v10446_v14 = vld [vmem:[%s10695_s5] ss:$0 sm:$0xff]  ;;  %v10458_v26 = vpop.f32.mrf.mxu0 }
 0x418   : > { %v5360_v35 = vpop.f32.mrf.mxu1 }
 0x419   : > { %v10432_v61 = vadd.f32 %v5360_v35, %v5097_v5  ;;  %v5680_v5 = vadd.f32 %v5553_v42, %v10332_v41  ;;  %v5378_v35 = vadd.f32 %v10336_v12, %v5072_v16 }
 0x41a   : > { %v10434_v3 = vpop.f32.mrf.mxu1 }
 0x41b   : > { %10898 = vst [vmem:[#allocation63_spill] sm:$0xff] %v10432_v61  ;;  %10899 = vst [vmem:[#allocation36_spill] sm:$0xff] %v10434_v3  ;;  %v5683_v52 = vadd.f32 %v10348_v63, %v5378_v35  ;;  %v5686_v63 = vadd.f32 %v10356_v60, %v10343_v13  ;;  %v10469_v35 = vpop.f32.mrf.mxu0  ;;  %v5074_v13 = vadd.f32 %v10243_v7, %v10230_v29 }
 0x41c   : > { %v10436_v20 = vpop.f32.mrf.mxu1  ;;  %v5080_v60 = vadd.f32 %v10254_v48, %v10241_v17 }
 0x41d   : > { %10900 = vst [vmem:[#allocation37_spill] sm:$0xff] %v10436_v20  ;;  %v5070_v20 = vadd.f32 %v10227_v27, %v10214_v45 }
 0x41e   : > { %v8097_v1 = vpop.f32.mrf.mxu1 }
 0x41f   : > { %v5987_v46 = vadd.f32 %v8097_v1, %v5682_v39  ;;  %v5376_v41 = vadd.f32 %v10340_v22, %v5070_v20  ;;  %v5076_v39 = vadd.f32 %v10238_v44, %v10225_v21  ;;  %v8362_v22 = vld [vmem:[#allocation2 + $0x31] sm:$0xff] }
 0x420   : > { %v5858_v19 = vpop.f32.mrf.mxu1 }
 0x421   : > { %v6026_v61 = vmul.f32 %v10446_v14, %v5987_v46  ;;  %v5985_v3 = vadd.f32 %v5858_v19, %v5680_v5  ;;  %v5681_v1 = vadd.f32 %v10352_v57, %v5376_v41  ;;  %v5684_v57 = vadd.f32 %v10361_v8, %v10346_v56 }
 0x422   : > { %v8098_v12 = vpop.f32.mrf.mxu1  ;;  %v5382_v19 = vadd.f32 %v10350_v62, %v5076_v39 }
 0x423   : > { %v6065_v42 = vadd.f32 %v10455_v51, %v6026_v61  ;;  %v6024_v45 = vmul.f32 %v10446_v14, %v5985_v3  ;;  %v5988_v27 = vadd.f32 %v8098_v12, %v5683_v52 }
 0x424   : > { %v5861_v16 = vpop.f32.mrf.mxu1  ;;  %v5687_v12 = vadd.f32 %v10370_v9, %v5382_v19 }
 0x425   : > { %v6027_v5 = vmul.f32 %v10446_v14, %v5988_v27  ;;  %v6097_v20 = vadd.f32 %v8362_v22, %v6065_v42  ;;  %v6063_v61 = vadd.f32 %v10455_v51, %v6024_v45  ;;  %v5986_v46 = vadd.f32 %v5861_v16, %v5681_v1  ;;  %v10483_v42 = vpop.f32.mrf.mxu0  ;;  %v8363_v45 = vld [vmem:[#allocation2 + $0x39] sm:$0xff] }
 0x426   : > { %v8101_v3 = vpop.f32.mrf.mxu1  ;;  %v5380_v27 = vadd.f32 %v10354_v49, %v5074_v13  ;;  %v8364_v16 = vld [vmem:[#allocation2 + $0x19] sm:$0xff]  ;;  %v5386_v22 = vadd.f32 %v10366_v38, %v5080_v60  ;;  %v5688_v60 = vadd.f32 %v10389_v40, %v10364_v11  ;;  %v8367_v40 = vld [vmem:[#allocation2 + $0x49] sm:$0xff] }
 0x427   : > { %v6066_v21 = vadd.f32 %v10455_v51, %v6027_v5  ;;  %v5991_v44 = vadd.f32 %v8101_v3, %v5686_v63  ;;  %v6025_v52 = vmul.f32 %v10446_v14, %v5986_v46  ;;  %v6129_v1 = vmax.f32 %v6097_v20, 0.0  ;;  %v8365_v46 = vld [vmem:[#allocation2 + $0x21] sm:$0xff] }
 0x428   : > { %v5874_v41 = vpop.f32.mrf.mxu1  ;;  %v6095_v29 = vadd.f32 %v8364_v16, %v6063_v61  ;;  %v5685_v5 = vadd.f32 %v10375_v10, %v5380_v27  ;;  %v5690_v20 = vadd.f32 %v10384_v32, %v10359_v36  ;;  %v10494_v61 = vpop.f32.mrf.mxu0 }
 0x429   : > { %v6098_v56 = vadd.f32 %v8363_v45, %v6066_v21  ;;  %v6030_v62 = vmul.f32 %v10446_v14, %v5991_v44  ;;  %v5989_v8 = vadd.f32 %v5874_v41, %v5684_v57  ;;  %v6064_v7 = vadd.f32 %v10455_v51, %v6025_v52  ;;  %v8366_v52 = vld [vmem:[#allocation2 + $0x61] sm:$0xff] }
 0x42a   : > { %v8102_v17 = vpop.f32.mrf.mxu1  ;;  %v6127_v44 = vmax.f32 %v6095_v29, 0.0  ;;  %v5691_v45 = vadd.f32 %v10398_v24, %v5386_v22  ;;  %v10510_v27 = vpop.f32.mrf.mxu0 }
 0x42b   : > { %v6130_v48 = vmax.f32 %v6098_v56, 0.0  ;;  %v6069_v39 = vadd.f32 %v10455_v51, %v6030_v62  ;;  %v6028_v9 = vmul.f32 %v10446_v14, %v5989_v8  ;;  %v5992_v63 = vadd.f32 %v8102_v17, %v5687_v12 }
 0x42c   : > { %v6096_v3 = vadd.f32 %v8365_v46, %v6064_v7  ;;  %v5877_v49 = vpop.f32.mrf.mxu1  ;;  %v5078_v12 = vadd.f32 %v10259_v59, %v10246_v53  ;;  %v8369_v46 = vld [vmem:[#allocation2 + $0x51] sm:$0xff] }
 0x42d   : > { %v6729_v57 = vpack.c.bf16 %v6130_v48, %v6129_v1  ;;  %v6067_v19 = vadd.f32 %v10455_v51, %v6028_v9  ;;  %v6031_v21 = vmul.f32 %v10446_v14, %v5992_v63  ;;  %v6101_v10 = vadd.f32 %v8366_v52, %v6069_v39  ;;  %v8368_v1 = vld [vmem:[#allocation2 + $0x69] sm:$0xff] }
 0x42e   : > { %v6128_v13 = vmax.f32 %v6096_v3, 0.0  ;;  %v5990_v41 = vadd.f32 %v5877_v49, %v5685_v5  ;;  %v8105_v38 = vpop.f32.mrf.mxu1  ;;  %v5384_v17 = vadd.f32 %v10368_v23, %v5078_v12  ;;  %v5084_v5 = vadd.f32 %v10270_v31, %v10257_v6 }
 0x42f   : > { %6816 = vst [vmem:[%s10502_s14 + $0x8] sm:$0xff] %v6729_v57   ;;  %v6070_v36 = vadd.f32 %v10455_v51, %v6031_v21  ;;  %v5995_v32 = vadd.f32 %v8105_v38, %v5690_v20  ;;  %v6099_v11 = vadd.f32 %v8367_v40, %v6067_v19  ;;  %v6133_v48 = vmax.f32 %v6101_v10, 0.0  ;;  %v10523_v20 = vpop.f32.mrf.mxu0 }
 0x430   : > { %v6724_v56 = vpack.c.bf16 %v6128_v13, %v6127_v44  ;;  %v6029_v62 = vmul.f32 %v10446_v14, %v5990_v41  ;;  %v5890_v8 = vpop.f32.mrf.mxu1  ;;  %v5689_v22 = vadd.f32 %v10403_v55, %v5384_v17  ;;  %v5694_v49 = vadd.f32 %v10412_v2, %v10373_v30  ;;  %v8370_v13 = vld [vmem:[#allocation2 + $0x91] sm:$0xff]  ;;  %v8373_v17 = vld [vmem:[#allocation2 + $0x81] sm:$0xff] }
 0x431   : > { %v6102_v16 = vadd.f32 %v8368_v1, %v6070_v36  ;;  %v6034_v29 = vmul.f32 %v10446_v14, %v5995_v32  ;;  %v5993_v7 = vadd.f32 %v5890_v8, %v5688_v60  ;;  %v6131_v57 = vmax.f32 %v6099_v11, 0.0 }
 0x432   : > { %6725 = vst [vmem:[%s10502_s14] sm:$0xff] %v6724_v56   ;;  %v6068_v53 = vadd.f32 %v10455_v51, %v6029_v62  ;;  %v8106_v59 = vpop.f32.mrf.mxu1  ;;  %v5692_v10 = vadd.f32 %v10417_v34, %v10378_v47  ;;  %v5390_v41 = vadd.f32 %v10380_v58, %v5084_v5  ;;  %v5082_v38 = vadd.f32 %v10275_v15, %v10262_v43  ;;  %v10538_v34 = vpop.f32.mrf.mxu0  ;;  %v8371_v47 = vld [vmem:[#allocation2 + $0x99] sm:$0xff] }
 0x433   : > { %v6134_v24 = vmax.f32 %v6102_v16, 0.0  ;;  %v6073_v39 = vadd.f32 %v10455_v51, %v6034_v29  ;;  %v6032_v9 = vmul.f32 %v10446_v14, %v5993_v7  ;;  %v5996_v63 = vadd.f32 %v8106_v59, %v5691_v45  ;;  %v8372_v15 = vld [vmem:[#allocation2 + $0x79] sm:$0xff] }
 0x434   : > { %v6100_v3 = vadd.f32 %v8369_v46, %v6068_v53  ;;  %v5893_v23 = vpop.f32.mrf.mxu1  ;;  %v5088_v60 = vadd.f32 %v10286_v4, %v10273_v25  ;;  %v5695_v45 = vadd.f32 %v10426_v37, %v5390_v41  ;;  %v5388_v8 = vadd.f32 %v10382_v33, %v5082_v38  ;;  %v10901_v53 = vld [vmem:[#allocation28_spill] sm:$0xff]  ;;  %v8374_v46 = vld [vmem:[#allocation2 + $0xc1] sm:$0xff] }
 0x435   : > { %v6739_v19 = vpack.c.bf16 %v6134_v24, %v6133_v48  ;;  %v6035_v21 = vmul.f32 %v10446_v14, %v5996_v63  ;;  %v6105_v52 = vadd.f32 %v8370_v13, %v6073_v39  ;;  %v6071_v6 = vadd.f32 %v10455_v51, %v6032_v9  ;;  %v10550_v24 = vpop.f32.mrf.mxu0 }
 0x436   : > { %v6132_v44 = vmax.f32 %v6100_v3, 0.0  ;;  %v5994_v31 = vadd.f32 %v5893_v23, %v5689_v22  ;;  %v8109_v55 = vpop.f32.mrf.mxu1  ;;  %v5693_v29 = vadd.f32 %v10430_v50, %v5388_v8  ;;  %v5394_v7 = vadd.f32 %v10394_v0, %v5088_v60  ;;  %v10902_v23 = vld [vmem:[#allocation29_spill] sm:$0xff]  ;;  %v10905_v60 = vld [vmem:[#allocation31_spill] sm:$0xff]  ;;  %v10907_v8 = vld [vmem:[#allocation18_spill] sm:$0xff] }
 0x437   : > { %6818 = vst [vmem:[%s10502_s14 + $0x18] sm:$0xff] %v6739_v19   ;;  %v6074_v30 = vadd.f32 %v10455_v51, %v6035_v21  ;;  %v5999_v2 = vadd.f32 %v8109_v55, %v5694_v49  ;;  %v6137_v43 = vmax.f32 %v6105_v52, 0.0  ;;  %v6103_v40 = vadd.f32 %v8372_v15, %v6071_v6  ;;  %v10903_v19 = vld [vmem:[#allocation14_spill] sm:$0xff]  ;;  %v10904_v21 = vld [vmem:[#allocation16_spill] sm:$0xff]  ;;  %v10562_v55 = vpop.f32.mrf.mxu0 }
 0x438   : > { %v6734_v36 = vpack.c.bf16 %v6132_v44, %v6131_v57  ;;  %v6033_v32 = vmul.f32 %v10446_v14, %v5994_v31  ;;  %v5906_v12 = vpop.f32.mrf.mxu1  ;;  %v5698_v59 = vadd.f32 %v10441_v54, %v10901_v53  ;;  %v5696_v49 = vadd.f32 %v10458_v26, %v10902_v23  ;;  %v10914_v23 = vld [vmem:[#allocation22_spill] sm:$0xff] }
 0x439   : > { %v6106_v58 = vadd.f32 %v8371_v47, %v6074_v30  ;;  %v6038_v56 = vmul.f32 %v10446_v14, %v5999_v2  ;;  %v5997_v62 = vadd.f32 %v5906_v12, %v5692_v10  ;;  %v6135_v5 = vmax.f32 %v6103_v40, 0.0  ;;  %v8375_v10 = vld [vmem:[#allocation2 + $0xa9] sm:$0xff]  ;;  %v8377_v40 = vld [vmem:[#allocation2 + $0xb1] sm:$0xff] }
 0x43a   : > { %6817 = vst [vmem:[%s10502_s14 + $0x10] sm:$0xff] %v6734_v36   ;;  %v6072_v25 = vadd.f32 %v10455_v51, %v6033_v32  ;;  %v8110_v4 = vpop.f32.mrf.mxu1  ;;  %v5086_v44 = vadd.f32 %v10904_v21, %v10903_v19  ;;  %v5699_v13 = vadd.f32 %v10469_v35, %v5394_v7  ;;  %v8376_v30 = vld [vmem:[#allocation2 + $0xc9] sm:$0xff] }
 0x43b   : > { %v6138_v11 = vmax.f32 %v6106_v58, 0.0  ;;  %v6077_v1 = vadd.f32 %v10455_v51, %v6038_v56  ;;  %v6036_v37 = vmul.f32 %v10446_v14, %v5997_v62  ;;  %v6000_v16 = vadd.f32 %v8110_v4, %v5695_v45  ;;  %v10906_v62 = vld [vmem:[#allocation15_spill] sm:$0xff] }
 0x43c   : > { %v6104_v33 = vadd.f32 %v8373_v17, %v6072_v25  ;;  %v5909_v48 = vpop.f32.mrf.mxu1  ;;  %v5392_v36 = vadd.f32 %v10905_v60, %v5086_v44  ;;  %v8379_v44 = vld [vmem:[#allocation2 + $0xf9] sm:$0xff] }
 0x43d   : > { %v6749_v39 = vpack.c.bf16 %v6138_v11, %v6137_v43  ;;  %v6075_v9 = vadd.f32 %v10455_v51, %v6036_v37  ;;  %v6039_v63 = vmul.f32 %v10446_v14, %v6000_v16  ;;  %v6109_v50 = vadd.f32 %v8374_v46, %v6077_v1  ;;  %v10908_v11 = vld [vmem:[#allocation32_spill] sm:$0xff]  ;;  %v8074_v37 = vpop.f32.mrf.mxu0  ;;  %v10911_v46 = vld [vmem:[#allocation17_spill] sm:$0xff] }
 0x43e   : > { %v6136_v22 = vmax.f32 %v6104_v33, 0.0  ;;  %v5998_v3 = vadd.f32 %v5909_v48, %v5693_v29  ;;  %v8113_v0 = vpop.f32.mrf.mxu1  ;;  %v5092_v43 = vadd.f32 %v10907_v8, %v10906_v62  ;;  %v5697_v15 = vadd.f32 %v10483_v42, %v5392_v36  ;;  %v8378_v33 = vld [vmem:[#allocation2 + $0xf1] sm:$0xff]  ;;  %v10909_v42 = vld [vmem:[#allocation62_spill] sm:$0xff] }
 0x43f   : > { %6820 = vst [vmem:[%s10502_s14 + $0x28] sm:$0xff] %v6749_v39   ;;  %v6078_v54 = vadd.f32 %v10455_v51, %v6039_v63  ;;  %v6003_v57 = vadd.f32 %v8113_v0, %v5698_v59  ;;  %v6107_v41 = vadd.f32 %v8375_v10, %v6075_v9  ;;  %v6141_v32 = vmax.f32 %v6109_v50, 0.0  ;;  %v10910_v63 = vld [vmem:[#allocation61_spill] sm:$0xff]  ;;  %v10912_v50 = vld [vmem:[#allocation20_spill] sm:$0xff]  ;;  %v10913_v0 = vld [vmem:[#allocation19_spill] sm:$0xff] }
 0x440   : > { %v6744_v52 = vpack.c.bf16 %v6136_v22, %v6135_v5  ;;  %v6037_v6 = vmul.f32 %v10446_v14, %v5998_v3  ;;  %v5922_v31 = vpop.f32.mrf.mxu1  ;;  %v5702_v1 = vadd.f32 %v10494_v61, %v10908_v11  ;;  %v5700_v9 = vadd.f32 %v10510_v27, %v10909_v42  ;;  %v5652_v27 = vpop.f32.mrf.mxu0  ;;  %v8382_v11 = vld [vmem:[#allocation2 + $0x121] sm:$0xff] }
 0x441   : > { %v6110_v26 = vadd.f32 %v8376_v30, %v6078_v54  ;;  %v6042_v2 = vmul.f32 %v10446_v14, %v6003_v57  ;;  %v6001_v38 = vadd.f32 %v5922_v31, %v5696_v49  ;;  %v6139_v16 = vmax.f32 %v6107_v41, 0.0  ;;  %v10915_v31 = vld [vmem:[#allocation33_spill] sm:$0xff] }
 0x442   : > { %6819 = vst [vmem:[%s10502_s14 + $0x20] sm:$0xff] %v6744_v52   ;;  %v6076_v12 = vadd.f32 %v10455_v51, %v6037_v6  ;;  %v8114_v35 = vpop.f32.mrf.mxu1  ;;  %v5398_v5 = vadd.f32 %v10910_v63, %v5092_v43  ;;  %v5090_v3 = vadd.f32 %v10912_v50, %v10911_v46  ;;  %v5096_v49 = vadd.f32 %v10914_v23, %v10913_v0  ;;  %v8380_v30 = vld [vmem:[#allocation2 + $0xd9] sm:$0xff]  ;;  %v8077_v8 = vpop.f32.mrf.mxu0  ;;  %v8383_v63 = vld [vmem:[#allocation2 + $0x109] sm:$0xff] }
 0x443   : > { %v6142_v45 = vmax.f32 %v6110_v26, 0.0  ;;  %v6081_v47 = vadd.f32 %v10455_v51, %v6042_v2  ;;  %v6040_v58 = vmul.f32 %v10446_v14, %v6001_v38  ;;  %v6004_v56 = vadd.f32 %v8114_v35, %v5699_v13  ;;  %v10920_v50 = vld [vmem:[#allocation65_spill] sm:$0xff] }
 0x444   : > { %v6108_v25 = vadd.f32 %v8377_v40, %v6076_v12  ;;  %v5925_v4 = vpop.f32.mrf.mxu1  ;;  %v5703_v21 = vadd.f32 %v10523_v20, %v5398_v5  ;;  %v5396_v10 = vadd.f32 %v10915_v31, %v5090_v3  ;;  %v5402_v35 = vadd.f32 %v10422_v18, %v5096_v49  ;;  %v10917_v18 = vld [vmem:[#allocation35_spill] sm:$0xff] }
 0x445   : > { %v6759_v29 = vpack.c.bf16 %v6142_v45, %v6141_v32  ;;  %v6043_v7 = vmul.f32 %v10446_v14, %v6004_v56  ;;  %v6113_v48 = vadd.f32 %v8378_v33, %v6081_v47  ;;  %v6079_v53 = vadd.f32 %v10455_v51, %v6040_v58  ;;  %v8381_v45 = vld [vmem:[#allocation2 + $0xe1] sm:$0xff]  ;;  %v10919_v33 = vld [vmem:[#allocation24_spill] sm:$0xff] }
 0x446   : > { %v6140_v17 = vmax.f32 %v6108_v25, 0.0  ;;  %v6002_v59 = vadd.f32 %v5925_v4, %v5697_v15  ;;  %v8117_v39 = vpop.f32.mrf.mxu1  ;;  %v5701_v12 = vadd.f32 %v10538_v34, %v5396_v10  ;;  %v10916_v56 = vld [vmem:[#allocation34_spill] sm:$0xff] }
 0x447   : > { %6822 = vst [vmem:[%s10502_s14 + $0x38] sm:$0xff] %v6759_v29   ;;  %v6082_v61 = vadd.f32 %v10455_v51, %v6043_v7  ;;  %v6007_v22 = vadd.f32 %v8117_v39, %v5702_v1  ;;  %v6145_v41 = vmax.f32 %v6113_v48, 0.0  ;;  %v6111_v26 = vadd.f32 %v8380_v30, %v6079_v53 }
 0x448   : > { %v6754_v54 = vpack.c.bf16 %v6140_v17, %v6139_v16  ;;  %v6041_v57 = vmul.f32 %v10446_v14, %v6002_v59  ;;  %v5938_v19 = vpop.f32.mrf.mxu1  ;;  %v5706_v62 = vadd.f32 %v10550_v24, %v10916_v56  ;;  %v5704_v29 = vadd.f32 %v10562_v55, %v10917_v18  ;;  %v10918_v17 = vld [vmem:[#allocation21_spill] sm:$0xff] }
 0x449   : > { %v6114_v13 = vadd.f32 %v8379_v44, %v6082_v61  ;;  %v6046_v52 = vmul.f32 %v10446_v14, %v6007_v22  ;;  %v6005_v6 = vadd.f32 %v5938_v19, %v5700_v9  ;;  %v6143_v25 = vmax.f32 %v6111_v26, 0.0  ;;  %v5665_v9 = vpop.f32.mrf.mxu0  ;;  %v8384_v61 = vld [vmem:[#allocation2 + $0x129] sm:$0xff]  ;;  %v10922_v44 = vld [vmem:[#allocation26_spill] sm:$0xff] }
 0x44a   : > { %6821 = vst [vmem:[%s10502_s14 + $0x30] sm:$0xff] %v6754_v54   ;;  %v6080_v2 = vadd.f32 %v10455_v51, %v6041_v57  ;;  %v8118_v38 = vpop.f32.mrf.mxu1  ;;  %v5094_v48 = vadd.f32 %v10919_v33, %v10918_v17  ;;  %v5707_v53 = vadd.f32 %v8074_v37, %v5402_v35  ;;  %v8388_v17 = vld [vmem:[#allocation2 + $0x139] sm:$0xff] }
 0x44b   : > { %v6146_v60 = vmax.f32 %v6114_v13, 0.0  ;;  %v6085_v36 = vadd.f32 %v10455_v51, %v6046_v52  ;;  %v6044_v20 = vmul.f32 %v10446_v14, %v6005_v6  ;;  %v6008_v32 = vadd.f32 %v8118_v38, %v5703_v21  ;;  %v10921_v21 = vld [vmem:[#allocation23_spill] sm:$0xff]  ;;  %v8385_v6 = vld [vmem:[#allocation2 + $0x111] sm:$0xff]  ;;  %v8078_v30 = vpop.f32.mrf.mxu0 }
 0x44c   : > { %v6112_v47 = vadd.f32 %v8381_v45, %v6080_v2  ;;  %v5941_v58 = vpop.f32.mrf.mxu1  ;;  %v5400_v3 = vadd.f32 %v10920_v50, %v5094_v48  ;;  %v5100_v13 = vadd.f32 %v10922_v44, %v10921_v21  ;;  %v10923_v45 = vld [vmem:[#allocation36_spill] sm:$0xff] }
 0x44d   : > { %v6769_v43 = vpack.c.bf16 %v6146_v60, %v6145_v41  ;;  %v6083_v15 = vadd.f32 %v10455_v51, %v6044_v20  ;;  %v6047_v40 = vmul.f32 %v10446_v14, %v6008_v32  ;;  %v6117_v1 = vadd.f32 %v8382_v11, %v6085_v36  ;;  %v8386_v36 = vld [vmem:[#allocation2 + $0x151] sm:$0xff]  ;;  %v5668_v11 = vpop.f32.mrf.mxu0  ;;  %v8391_v21 = vld [vmem:[#allocation2 + $0x189] sm:$0xff] }
 0x44e   : > { %v6144_v4 = vmax.f32 %v6112_v47, 0.0  ;;  %v6006_v34 = vadd.f32 %v5941_v58, %v5701_v12  ;;  %v8121_v16 = vpop.f32.mrf.mxu1  ;;  %v5705_v52 = vadd.f32 %v5652_v27, %v5400_v3  ;;  %v5710_v41 = vadd.f32 %v8077_v8, %v10428_v28  ;;  %v10924_v47 = vld [vmem:[#allocation63_spill] sm:$0xff] }
 0x44f   : > { %6824 = vst [vmem:[%s10502_s14 + $0x48] sm:$0xff] %v6769_v43   ;;  %v6086_v7 = vadd.f32 %v10455_v51, %v6047_v40  ;;  %v6011_v24 = vadd.f32 %v8121_v16, %v5706_v62  ;;  %v6115_v5 = vadd.f32 %v8383_v63, %v6083_v15  ;;  %v6149_v0 = vmax.f32 %v6117_v1, 0.0  ;;  %v10925_v62 = vld [vmem:[#allocation25_spill] sm:$0xff]  ;;  %v10926_v8 = vld [vmem:[#allocation27_spill] sm:$0xff] }
 0x450   : > { %v6764_v59 = vpack.c.bf16 %v6144_v4, %v6143_v25  ;;  %v6045_v39 = vmul.f32 %v10446_v14, %v6006_v34  ;;  %v5954_v42 = vpop.f32.mrf.mxu1  ;;  %v5406_v27 = vadd.f32 %v10923_v45, %v5100_v13  ;;  %v5708_v58 = vadd.f32 %v5665_v9, %v10924_v47  ;;  %v8387_v1 = vld [vmem:[#allocation2 + $0x159] sm:$0xff]  ;;  %v8392_v13 = vld [vmem:[#allocation2 + $0x169] sm:$0xff] }
 0x451   : > { %v6118_v22 = vadd.f32 %v8384_v61, %v6086_v7  ;;  %v6050_v55 = vmul.f32 %v10446_v14, %v6011_v24  ;;  %v6009_v46 = vadd.f32 %v5954_v42, %v5704_v29  ;;  %v6147_v26 = vmax.f32 %v6115_v5, 0.0  ;;  %v10927_v29 = vld [vmem:[#allocation37_spill] sm:$0xff]  ;;  %v8389_v5 = vld [vmem:[#allocation2 + $0x141] sm:$0xff] }
 0x452   : > { %6823 = vst [vmem:[%s10502_s14 + $0x40] sm:$0xff] %v6764_v59   ;;  %v6084_v23 = vadd.f32 %v10455_v51, %v6045_v39  ;;  %v8122_v49 = vpop.f32.mrf.mxu1  ;;  %v5098_v43 = vadd.f32 %v10926_v8, %v10925_v62  ;;  %v5711_v4 = vadd.f32 %v8078_v30, %v5406_v27 }
 0x453   : > { %v6150_v37 = vmax.f32 %v6118_v22, 0.0  ;;  %v6089_v54 = vadd.f32 %v10455_v51, %v6050_v55  ;;  %v6048_v57 = vmul.f32 %v10446_v14, %v6009_v46  ;;  %v6012_v19 = vadd.f32 %v8122_v49, %v5707_v53  ;;  %v8390_v49 = vld [vmem:[#allocation2 + $0x181] sm:$0xff] }
 0x454   : > { %v6116_v31 = vadd.f32 %v8385_v6, %v6084_v23  ;;  %v5957_v10 = vpop.f32.mrf.mxu1  ;;  %v5404_v7 = vadd.f32 %v10927_v29, %v5098_v43 }
 0x455   : > { %v6779_v2 = vpack.c.bf16 %v6150_v37, %v6149_v0  ;;  %v6051_v38 = vmul.f32 %v10446_v14, %v6012_v19  ;;  %v6121_v20 = vadd.f32 %v8386_v36, %v6089_v54  ;;  %v6087_v32 = vadd.f32 %v10455_v51, %v6048_v57 }
 0x456   : > { %v6148_v60 = vmax.f32 %v6116_v31, 0.0  ;;  %v6010_v12 = vadd.f32 %v5957_v10, %v5705_v52  ;;  %v8125_v35 = vpop.f32.mrf.mxu1  ;;  %v5709_v63 = vadd.f32 %v5668_v11, %v5404_v7 }
 0x457   : > { %6826 = vst [vmem:[%s10502_s14 + $0x58] sm:$0xff] %v6779_v2   ;;  %v6090_v28 = vadd.f32 %v10455_v51, %v6051_v38  ;;  %v6015_v56 = vadd.f32 %v8125_v35, %v5710_v41  ;;  %v6153_v24 = vmax.f32 %v6121_v20, 0.0  ;;  %v6119_v33 = vadd.f32 %v8388_v17, %v6087_v32  ;;  %v8393_v41 = vld [vmem:[#allocation2 + $0x171] sm:$0xff] }
 0x458   : > { %v6774_v15 = vpack.c.bf16 %v6148_v60, %v6147_v26  ;;  %v6049_v40 = vmul.f32 %v10446_v14, %v6010_v12  ;;  %v5970_v25 = vpop.f32.mrf.mxu1 }
 0x459   : > { %v6122_v34 = vadd.f32 %v8387_v1, %v6090_v28  ;;  %v6054_v16 = vmul.f32 %v10446_v14, %v6015_v56  ;;  %v6013_v18 = vadd.f32 %v5970_v25, %v5708_v58  ;;  %v6151_v50 = vmax.f32 %v6119_v33, 0.0 }
 0x45a   : > { %6825 = vst [vmem:[%s10502_s14 + $0x50] sm:$0xff] %v6774_v15   ;;  %v6088_v48 = vadd.f32 %v10455_v51, %v6049_v40  ;;  %v8126_v53 = vpop.f32.mrf.mxu1 }
 0x45b   : > { %v6154_v59 = vmax.f32 %v6122_v34, 0.0  ;;  %v6093_v39 = vadd.f32 %v10455_v51, %v6054_v16  ;;  %v6052_v42 = vmul.f32 %v10446_v14, %v6013_v18  ;;  %v6016_v9 = vadd.f32 %v8126_v53, %v5711_v4 }
 0x45c   : > { %v6120_v61 = vadd.f32 %v8389_v5, %v6088_v48  ;;  %v5973_v22 = vpop.f32.mrf.mxu1 }
 0x45d   : > { %v6789_v55 = vpack.c.bf16 %v6154_v59, %v6153_v24  ;;  %v6055_v46 = vmul.f32 %v10446_v14, %v6016_v9  ;;  %v6091_v0 = vadd.f32 %v10455_v51, %v6052_v42  ;;  %v6014_v23 = vadd.f32 %v5973_v22, %v5709_v63 }
 0x45e   : > { %v6152_v3 = vmax.f32 %v6120_v61, 0.0  ;;  %v6125_v37 = vadd.f32 %v8390_v49, %v6093_v39 }
 0x45f   : > { %6828 = vst [vmem:[%s10502_s14 + $0x68] sm:$0xff] %v6789_v55   ;;  %v6094_v54 = vadd.f32 %v10455_v51, %v6055_v46  ;;  %v6053_v19 = vmul.f32 %v10446_v14, %v6014_v23  ;;  %v6123_v52 = vadd.f32 %v8392_v13, %v6091_v0 }
 0x460   : > { %v6784_v57 = vpack.c.bf16 %v6152_v3, %v6151_v50  ;;  %v6157_v31 = vmax.f32 %v6125_v37, 0.0 }
 0x461   : > { %v6126_v44 = vadd.f32 %v8391_v21, %v6094_v54  ;;  %v6092_v6 = vadd.f32 %v10455_v51, %v6053_v19  ;;  %v6155_v2 = vmax.f32 %v6123_v52, 0.0 }
 0x462   : > { %6827 = vst [vmem:[%s10502_s14 + $0x60] sm:$0xff] %v6784_v57  }
 0x463   : > { %v6158_v10 = vmax.f32 %v6126_v44, 0.0  ;;  %v6124_v30 = vadd.f32 %v8393_v41, %v6092_v6 }
 0x465   : > { %v6799_v26 = vpack.c.bf16 %v6158_v10, %v6157_v31  ;;  %v6156_v14 = vmax.f32 %v6124_v30, 0.0 }
 0x467   : > { %6830 = vst [vmem:[%s10502_s14 + $0x78] sm:$0xff] %v6799_v26   ;;  %v6794_v51 = vpack.c.bf16 %v6156_v14, %v6155_v2 }
 0x469   : > { %6829 = vst [vmem:[%s10502_s14 + $0x70] sm:$0xff] %v6794_v51  }
 0x46a   : > { %8487 = shalt.err (!%p8484_p3)
}
 0x46b   : > { %s8488_s29 = scalar_lea.hbm %s10644_s10, 2048  ;;  %s8492_s13 = scalar_lea.hbm %s10697_s7, 4096 }
 0x46c   : > { %p8489_p11 = scmp.ne.s32.totalorder %s10644_s10, %s8488_s29  ;;  %p8493_p4 = scmp.lt.s32.totalorder %s10644_s10, %s10697_s7 }
 0x46d   : > { %p8494_p6 = scmp.lt.s32.totalorder %s8492_s13, %s8488_s29 }
 0x46e   : > { %p8490_p9 = pnand %p8489_p11, %p10928_p2 }
 0x46f   : > { %p8495_p8 = por %p8494_p6, %p8493_p4 }
 0x470   : > { %p8491_p1 = pneg %p8490_p9 }
 0x472   : > { %p8496_p5 = pnand %p8495_p8, %p8491_p1 }
 0x474   : > { %8499 = shalt.err (!%p8496_p5)
}
 0x475   : > { %s8551_s1 = smov 64   ;;  %s8552_s15 = smov 4  }
 0x476   : > { %8137 = dma.vmem_to_hbm [thread:$0]  (%p10928_p2), %s10646_s18, 2048, %s10644_s10, %s6320_s30, %s8551_s1, %s8551_s1, %s8552_s15  }
 0x477 PF: > { %s6348_s9 = sand.u32 1, %s8530_s24   ;;  %p10929_p7 = scmp.ne.s32.totalorder %s10708_s8, 0 }
 0x478   : > { %p10930_p12 = scmp.ge.s32.totalorder %s8542_s27, 2  ;;  %s6349_s28 = scalar_lea.sflag [#allocation6], %s6348_s9 }
 0x47a   : > { %p8151_p13 = pnand %p10930_p12, %p10929_p7 }
 0x47c   : > { %p8152_p0 = pneg %p8151_p13 }
 0x47e   : > { %8525 = dma.done.wait (%p8152_p0), %s6349_s28, 2048  }
 0x47f   : > { %8527 = vsyncadd (%p8152_p0), %s6349_s28, 4294965248  ;;  %p21_p10 = scmp.ge.s32.totalorder %s8671_s23, 4   ;;  %s10931_s24 = smov %s8534_s25 }
 0x480   : > { %s10932_s25 = smov %s8538_s26  ;;  %s10933_s26 = smov %s8687_s12 }
 0x481   : > { %s10934_s27 = smov %s8671_s23  ;;  %23 = sbr.rel (!%p21_p10) target bundleno = 8 (0x8), region = 107 }
 0x486   :  { %6354 = vsyncpa [#allocation5], 1 }
 0x487   :  { %6356 = vsyncpa [#allocation5 + $0x1], 1 }
 0x488   :  { %6357 = vsyncpa [#allocation8], 1 }
 0x489   :  { %6358 = vsyncpa [#allocation6], 1 }
 0x48a   :  { %6360 = vsyncpa [#allocation6 + $0x1], 1 }

</bundles_post_ra>
